<compile_context>
chip_gen: v6e
topology: v6e:2x2x1
jax: 0.10.0
libtpu: 0.0.40
codegen_flags: <defaults>
</compile_context>

<pallas_src>
import functools

import numpy as np
import jax
import jax.numpy as jnp
from jax.experimental import pallas as pl
from jax.experimental.pallas import tpu as pltpu

# (Cin, Cout, kh, kw, stride, pad, activation) — matches the PyTorch module.
_LAYERS = (
    (1, 32, 7, 7, 2, 1, "ramp"),
    (32, 32, 3, 3, 2, 1, "ramp"),
    (32, 32, 3, 3, 1, 1, "ramp"),
    (32, 1, 2, 2, 1, 1, "sigmoid"),
)


def _round_up(x, m):
    return (x + m - 1) // m * m


def _spatial_selector(k, stride, pad, n_in, n_out):
    """sel[i, o, h] = 1  iff  h == o*stride + i - pad  and  0 <= h < n_in."""
    sel = np.zeros((k, n_out, n_in), np.float32)
    for i in range(k):
        for o in range(n_out):
            h = o * stride + i - pad
            if 0 <= h < n_in:
                sel[i, o, h] = 1.0
    return sel


def _conv_as_dense(w, b, hin, win, stride, pad):
    """Fold a conv (incl. zero padding) into a dense operator on NHWC-flat features.

    Returns (W_dense [Hin*Win*Cin, Ho*Wo*Cout], b_dense [Ho*Wo*Cout], (Ho, Wo)).
    Row order: (h*Win + w)*Cin + c.  Col order: (ho*Wo + wo)*Cout + co.
    """
    cout, cin, kh, kw = w.shape
    ho = (hin + 2 * pad - kh) // stride + 1
    wo = (win + 2 * pad - kw) // stride + 1
    sh = jnp.asarray(_spatial_selector(kh, stride, pad, hin, ho))  # [kh, ho, hin]
    sw = jnp.asarray(_spatial_selector(kw, stride, pad, win, wo))  # [kw, wo, win]
    dense = jnp.einsum("iah,jbw,ocij->hwcabo", sh, sw, w.astype(jnp.float32))
    dense = dense.reshape(hin * win * cin, ho * wo * cout)
    b_dense = jnp.tile(b.astype(jnp.float32), ho * wo)
    return dense, b_dense, (ho, wo)


# --------------------------- fused Pallas kernel -----------------------------


def _fused_cnn_kernel(x_ref, w1_ref, b1_ref, w2_ref, b2_ref, w3_ref, b3_ref,
                      w4_ref, b4_ref, o_ref, *, acts):
    # One batch tile flows through all four layers without leaving VMEM.
    h = x_ref[...]
    for w_ref, b_ref, act in zip((w1_ref, w2_ref, w3_ref, w4_ref),
                                 (b1_ref, b2_ref, b3_ref, b4_ref), acts):
        acc = jnp.dot(h.astype(w_ref.dtype), w_ref[...],
                      preferred_element_type=jnp.float32)
        acc = acc + b_ref[...]                        # f32 epilogue
        if act == "ramp":                             # x[x<-1]=-1; x[x>1]=1
            h = jnp.clip(acc, -1.0, 1.0)
        else:
            h = jax.nn.sigmoid(acc)
    o_ref[...] = h.astype(o_ref.dtype)


def cnn_forward(params, x, *, matmul_dtype=jnp.bfloat16):
    """x: [N, 1, H, W] (NCHW) -> [N, 1, Ho, Wo] (NCHW)."""
    n, cin, h, w = x.shape
    assert cin == _LAYERS[0][0]

    # ---- trace-time weight prep (cheap JAX glue, analogous to w.reshape) ----
    mats = []
    hin, win = h, w
    f_in_pad = _round_up(hin * win * cin, 128)   # padded layer-1 input features
    k_pad = f_in_pad
    for idx, (ci, co, kh, kw, s, p, act) in enumerate(_LAYERS):
        wgt, bias = params[f"conv{idx + 1}"]
        dense, b_dense, (ho, wo) = _conv_as_dense(wgt, bias, hin, win, s, p)
        fin, fout = dense.shape
        fout_pad = _round_up(fout, 128)          # lane-dense layer outputs
        dense = jnp.pad(dense, ((0, k_pad - fin), (0, fout_pad - fout)))
        b_dense = jnp.pad(b_dense, (0, fout_pad - fout)).reshape(1, fout_pad)
        mats.append((dense.astype(matmul_dtype), b_dense, act))
        hin, win, k_pad = ho, wo, fout_pad

    f_out_real = hin * win * _LAYERS[-1][1]
    f_out_pad = mats[-1][0].shape[1]

    # ---- NHWC-flat input, lane-padded, batch (M) tiled ----
    xf = x.transpose(0, 2, 3, 1).reshape(n, -1)
    xf = jnp.pad(xf, ((0, 0), (0, f_in_pad - xf.shape[1])))
    tm = min(128, _round_up(n, 8))
    n_pad = _round_up(n, tm)
    xf = jnp.pad(xf, ((0, n_pad - n), (0, 0))).astype(matmul_dtype)

    in_specs = [pl.BlockSpec((tm, f_in_pad), lambda i: (i, 0))]
    operands = [xf]
    for dense, b_dense, _ in mats:
        in_specs.append(pl.BlockSpec(dense.shape, lambda i: (0, 0)))
        in_specs.append(pl.BlockSpec(b_dense.shape, lambda i: (0, 0)))
        operands.extend((dense, b_dense))

    out = pl.pallas_call(
        functools.partial(_fused_cnn_kernel, acts=tuple(m[2] for m in mats)),
        out_shape=jax.ShapeDtypeStruct((n_pad, f_out_pad), jnp.float32),
        grid=(n_pad // tm,),
        in_specs=in_specs,
        out_specs=pl.BlockSpec((tm, f_out_pad), lambda i: (i, 0)),
        compiler_params=pltpu.CompilerParams(
            dimension_semantics=("parallel",),      # shard batch across TCs (v7x)
            vmem_limit_bytes=32 * 1024 * 1024,
        ),
    )(*operands)

    out = out[:n, :f_out_real].reshape(n, hin, win, _LAYERS[-1][1])
    return out.transpose(0, 3, 1, 2)


# ---------------- parameters (deterministic, PyTorch-default-like init) ------


def _init_conv(key, c_out, c_in, kh, kw):
    fan_in = c_in * kh * kw
    bound = 1.0 / (fan_in ** 0.5)
    kw_key, kb_key = jax.random.split(key)
    w = jax.random.uniform(kw_key, (c_out, c_in, kh, kw), jnp.float32, -bound, bound)
    b = jax.random.uniform(kb_key, (c_out,), jnp.float32, -bound, bound)
    return w, b


def init_cnn_params(key):
    k1, k2, k3, k4 = jax.random.split(key, 4)
    return {
        "conv1": _init_conv(k1, 32, 1, 7, 7),
        "conv2": _init_conv(k2, 32, 32, 3, 3),
        "conv3": _init_conv(k3, 32, 32, 3, 3),
        "conv4": _init_conv(k4, 1, 32, 2, 2),
    }


# ---------------- pure-JAX reference (for correctness check) -----------------


def _ref_conv(x, w, b, stride, padding):
    y = jax.lax.conv_general_dilated(
        x, w, window_strides=(stride, stride),
        padding=((padding, padding), (padding, padding)),
        dimension_numbers=("NCHW", "OIHW", "NCHW"))
    return y + b[None, :, None, None]


def cnn_forward_ref(params, x):
    w1, b1 = params["conv1"]
    w2, b2 = params["conv2"]
    w3, b3 = params["conv3"]
    w4, b4 = params["conv4"]
    x = jnp.clip(_ref_conv(x, w1, b1, 2, 1), -1.0, 1.0)
    x = jnp.clip(_ref_conv(x, w2, b2, 2, 1), -1.0, 1.0)
    x = jnp.clip(_ref_conv(x, w3, b3, 1, 1), -1.0, 1.0)
    x = jax.nn.sigmoid(_ref_conv(x, w4, b4, 1, 1))
    return x


if __name__ == "__main__":
    key = jax.random.PRNGKey(0)
    pkey, xkey = jax.random.split(key)
    params = init_cnn_params(pkey)

    # NCHW input, in_channels=1 (as required by conv1).
    x = jax.random.normal(xkey, (2, 1, 16, 16), dtype=jnp.float32)

    ref = jax.block_until_ready(cnn_forward_ref(params, x))

    # f32 matmul path: tight check of the fused dense lowering.
    fwd_f32 = jax.jit(functools.partial(cnn_forward, matmul_dtype=jnp.float32))
    out_f32 = jax.block_until_ready(fwd_f32(params, x))
    assert out_f32.shape == ref.shape, (out_f32.shape, ref.shape)
    assert jnp.allclose(out_f32, ref, atol=1e-4, rtol=1e-4), (
        f"f32 mismatch, max abs err {jnp.max(jnp.abs(out_f32 - ref))}")

    # bf16 matmul path (default; v6e/v7x MXU guidance): relaxed tolerance.
    fwd_bf16 = jax.jit(cnn_forward)
    out = jax.block_until_ready(fwd_bf16(params, x))
    assert out.shape == ref.shape, (out.shape, ref.shape)
    assert jnp.allclose(out, ref, atol=2e-2, rtol=2e-2), (
        f"bf16 mismatch, max abs err {jnp.max(jnp.abs(out - ref))}")

    print("KERNEL_OK")
</pallas_src>

<mosaic_0001>
module attributes {stable_mosaic.version = 11 : i64} {
  func.func @_fused_cnn_kernel(%arg0: i32, %arg1: memref<8x256xf32, #tpu.memory_space<vmem>>, %arg2: memref<256x1152xf32, #tpu.memory_space<vmem>>, %arg3: memref<1x1152xf32, #tpu.memory_space<vmem>>, %arg4: memref<1152x384xf32, #tpu.memory_space<vmem>>, %arg5: memref<1x384xf32, #tpu.memory_space<vmem>>, %arg6: memref<384x384xf32, #tpu.memory_space<vmem>>, %arg7: memref<1x384xf32, #tpu.memory_space<vmem>>, %arg8: memref<384x128xf32, #tpu.memory_space<vmem>>, %arg9: memref<1x128xf32, #tpu.memory_space<vmem>>, %arg10: memref<8x128xf32, #tpu.memory_space<vmem>>) attributes {dimension_semantics = [#tpu.dimension_semantics<parallel>], iteration_bounds = array<i64: 1>, scalar_prefetch = 0 : i64, scratch_operands = 0 : i64, tpu.core_type = #tpu.core_type<tc>, window_params = [{transform_indices = @transform_0, window_bounds = array<i64: 8, 256>}, {pipeline_mode = #tpu.pipeline_mode<synchronous>, transform_indices = @transform_1, window_bounds = array<i64: 256, 1152>}, {pipeline_mode = #tpu.pipeline_mode<synchronous>, transform_indices = @transform_2, window_bounds = array<i64: 1, 1152>}, {pipeline_mode = #tpu.pipeline_mode<synchronous>, transform_indices = @transform_3, window_bounds = array<i64: 1152, 384>}, {pipeline_mode = #tpu.pipeline_mode<synchronous>, transform_indices = @transform_4, window_bounds = array<i64: 1, 384>}, {pipeline_mode = #tpu.pipeline_mode<synchronous>, transform_indices = @transform_5, window_bounds = array<i64: 384, 384>}, {pipeline_mode = #tpu.pipeline_mode<synchronous>, transform_indices = @transform_6, window_bounds = array<i64: 1, 384>}, {pipeline_mode = #tpu.pipeline_mode<synchronous>, transform_indices = @transform_7, window_bounds = array<i64: 384, 128>}, {pipeline_mode = #tpu.pipeline_mode<synchronous>, transform_indices = @transform_8, window_bounds = array<i64: 1, 128>}, {transform_indices = @transform_9, window_bounds = array<i64: 8, 128>}]} {
    %c0 = arith.constant 0 : index
    %c0_0 = arith.constant 0 : index
    %0 = vector.load %arg1[%c0, %c0_0] : memref<8x256xf32, #tpu.memory_space<vmem>>, vector<8x256xf32>
    %c0_1 = arith.constant 0 : index
    %c0_2 = arith.constant 0 : index
    %1 = vector.load %arg2[%c0_1, %c0_2] : memref<256x1152xf32, #tpu.memory_space<vmem>>, vector<256x1152xf32>
    %cst = arith.constant dense<0.000000e+00> : vector<8x1152xf32>
    %2 = tpu.matmul %0, %1, %cst {dimension_numbers = #tpu.dot_dimension_numbers<[1], [0], [0], [1], [0, 0, 1, 1], [], []>} : vector<8x256xf32>, vector<256x1152xf32>, vector<8x1152xf32> -> vector<8x1152xf32>
    %c0_3 = arith.constant 0 : index
    %c0_4 = arith.constant 0 : index
    %3 = vector.load %arg3[%c0_3, %c0_4] : memref<1x1152xf32, #tpu.memory_space<vmem>>, vector<1x1152xf32>
    %4 = vector.broadcast %3 : vector<1x1152xf32> to vector<8x1152xf32>
    %5 = arith.addf %2, %4 : vector<8x1152xf32>
    %cst_5 = arith.constant -1.000000e+00 : f32
    %cst_6 = arith.constant 1.000000e+00 : f32
    %6 = vector.broadcast %cst_5 : f32 to vector<8x1152xf32>
    %7 = arith.maximumf %6, %5 : vector<8x1152xf32>
    %8 = vector.broadcast %cst_6 : f32 to vector<8x1152xf32>
    %9 = arith.minimumf %8, %7 : vector<8x1152xf32>
    %c0_7 = arith.constant 0 : index
    %c0_8 = arith.constant 0 : index
    %10 = vector.load %arg4[%c0_7, %c0_8] : memref<1152x384xf32, #tpu.memory_space<vmem>>, vector<1152x384xf32>
    %cst_9 = arith.constant dense<0.000000e+00> : vector<8x384xf32>
    %11 = tpu.matmul %9, %10, %cst_9 {dimension_numbers = #tpu.dot_dimension_numbers<[1], [0], [0], [1], [0, 0, 1, 1], [], []>} : vector<8x1152xf32>, vector<1152x384xf32>, vector<8x384xf32> -> vector<8x384xf32>
    %c0_10 = arith.constant 0 : index
    %c0_11 = arith.constant 0 : index
    %12 = vector.load %arg5[%c0_10, %c0_11] : memref<1x384xf32, #tpu.memory_space<vmem>>, vector<1x384xf32>
    %13 = vector.broadcast %12 : vector<1x384xf32> to vector<8x384xf32>
    %14 = arith.addf %11, %13 : vector<8x384xf32>
    %cst_12 = arith.constant -1.000000e+00 : f32
    %cst_13 = arith.constant 1.000000e+00 : f32
    %15 = vector.broadcast %cst_12 : f32 to vector<8x384xf32>
    %16 = arith.maximumf %15, %14 : vector<8x384xf32>
    %17 = vector.broadcast %cst_13 : f32 to vector<8x384xf32>
    %18 = arith.minimumf %17, %16 : vector<8x384xf32>
    %c0_14 = arith.constant 0 : index
    %c0_15 = arith.constant 0 : index
    %19 = vector.load %arg6[%c0_14, %c0_15] : memref<384x384xf32, #tpu.memory_space<vmem>>, vector<384x384xf32>
    %cst_16 = arith.constant dense<0.000000e+00> : vector<8x384xf32>
    %20 = tpu.matmul %18, %19, %cst_16 {dimension_numbers = #tpu.dot_dimension_numbers<[1], [0], [0], [1], [0, 0, 1, 1], [], []>} : vector<8x384xf32>, vector<384x384xf32>, vector<8x384xf32> -> vector<8x384xf32>
    %c0_17 = arith.constant 0 : index
    %c0_18 = arith.constant 0 : index
    %21 = vector.load %arg7[%c0_17, %c0_18] : memref<1x384xf32, #tpu.memory_space<vmem>>, vector<1x384xf32>
    %22 = vector.broadcast %21 : vector<1x384xf32> to vector<8x384xf32>
    %23 = arith.addf %20, %22 : vector<8x384xf32>
    %cst_19 = arith.constant -1.000000e+00 : f32
    %cst_20 = arith.constant 1.000000e+00 : f32
    %24 = vector.broadcast %cst_19 : f32 to vector<8x384xf32>
    %25 = arith.maximumf %24, %23 : vector<8x384xf32>
    %26 = vector.broadcast %cst_20 : f32 to vector<8x384xf32>
    %27 = arith.minimumf %26, %25 : vector<8x384xf32>
    %c0_21 = arith.constant 0 : index
    %c0_22 = arith.constant 0 : index
    %28 = vector.load %arg8[%c0_21, %c0_22] : memref<384x128xf32, #tpu.memory_space<vmem>>, vector<384x128xf32>
    %cst_23 = arith.constant dense<0.000000e+00> : vector<8x128xf32>
    %29 = tpu.matmul %27, %28, %cst_23 {dimension_numbers = #tpu.dot_dimension_numbers<[1], [0], [0], [1], [0, 0, 1, 1], [], []>} : vector<8x384xf32>, vector<384x128xf32>, vector<8x128xf32> -> vector<8x128xf32>
    %c0_24 = arith.constant 0 : index
    %c0_25 = arith.constant 0 : index
    %30 = vector.load %arg9[%c0_24, %c0_25] : memref<1x128xf32, #tpu.memory_space<vmem>>, vector<1x128xf32>
    %31 = vector.broadcast %30 : vector<1x128xf32> to vector<8x128xf32>
    %32 = arith.addf %29, %31 : vector<8x128xf32>
    %33 = arith.negf %32 : vector<8x128xf32>
    %34 = math.exp %33 : vector<8x128xf32>
    %cst_26 = arith.constant 1.000000e+00 : f32
    %35 = vector.broadcast %cst_26 : f32 to vector<8x128xf32>
    %36 = arith.addf %35, %34 : vector<8x128xf32>
    %37 = arith.divf %35, %36 : vector<8x128xf32>
    %c0_27 = arith.constant 0 : index
    %c0_28 = arith.constant 0 : index
    %38 = vector.load %arg10[%c0_27, %c0_28] : memref<8x128xf32, #tpu.memory_space<vmem>>, vector<8x128xf32>
    tpu.vector_store %arg10[%c0_27, %c0_28], %37 {strides = array<i32>} : memref<8x128xf32, #tpu.memory_space<vmem>>, vector<8x128xf32>,
    return
  }
  func.func @transform_0(%arg0: i32) -> (i32, i32) {
    %c0_i32 = arith.constant 0 : i32
    %c0_i32_0 = arith.constant 0 : i32
    return %arg0, %c0_i32 : i32, i32
  }
  func.func @transform_1(%arg0: i32) -> (i32, i32) {
    %c0_i32 = arith.constant 0 : i32
    %c0_i32_0 = arith.constant 0 : i32
    %c0_i32_1 = arith.constant 0 : i32
    return %c0_i32, %c0_i32_0 : i32, i32
  }
  func.func @transform_2(%arg0: i32) -> (i32, i32) {
    %c0_i32 = arith.constant 0 : i32
    %c0_i32_0 = arith.constant 0 : i32
    %c0_i32_1 = arith.constant 0 : i32
    return %c0_i32, %c0_i32_0 : i32, i32
  }
  func.func @transform_3(%arg0: i32) -> (i32, i32) {
    %c0_i32 = arith.constant 0 : i32
    %c0_i32_0 = arith.constant 0 : i32
    %c0_i32_1 = arith.constant 0 : i32
    return %c0_i32, %c0_i32_0 : i32, i32
  }
  func.func @transform_4(%arg0: i32) -> (i32, i32) {
    %c0_i32 = arith.constant 0 : i32
    %c0_i32_0 = arith.constant 0 : i32
    %c0_i32_1 = arith.constant 0 : i32
    return %c0_i32, %c0_i32_0 : i32, i32
  }
  func.func @transform_5(%arg0: i32) -> (i32, i32) {
    %c0_i32 = arith.constant 0 : i32
    %c0_i32_0 = arith.constant 0 : i32
    %c0_i32_1 = arith.constant 0 : i32
    return %c0_i32, %c0_i32_0 : i32, i32
  }
  func.func @transform_6(%arg0: i32) -> (i32, i32) {
    %c0_i32 = arith.constant 0 : i32
    %c0_i32_0 = arith.constant 0 : i32
    %c0_i32_1 = arith.constant 0 : i32
    return %c0_i32, %c0_i32_0 : i32, i32
  }
  func.func @transform_7(%arg0: i32) -> (i32, i32) {
    %c0_i32 = arith.constant 0 : i32
    %c0_i32_0 = arith.constant 0 : i32
    %c0_i32_1 = arith.constant 0 : i32
    return %c0_i32, %c0_i32_0 : i32, i32
  }
  func.func @transform_8(%arg0: i32) -> (i32, i32) {
    %c0_i32 = arith.constant 0 : i32
    %c0_i32_0 = arith.constant 0 : i32
    %c0_i32_1 = arith.constant 0 : i32
    return %c0_i32, %c0_i32_0 : i32, i32
  }
  func.func @transform_9(%arg0: i32) -> (i32, i32) {
    %c0_i32 = arith.constant 0 : i32
    %c0_i32_0 = arith.constant 0 : i32
    return %arg0, %c0_i32 : i32, i32
  }
}

</mosaic_0001>

<bundles_post_ra>
// kernel: tile.23
= control target key start
LH: loop header
LB: loop body
LE: loop exit
PB: predicated region body
PF: predicated region fallthrough
CT: control target
= control target key end

     0   :  { %s46_s0 = inlined_call_operand.vmem [shape: f32[32], index: 0, kind: input, shape index: {}]   ;;  %s47_s1 = inlined_call_operand.vmem [shape: f32[36,32], index: 1, kind: output, shape index: {}]  }
   0x1   :  { %v4_v0 = vld [vmem:[%s46_s0] ss:$0 sm:$0xff] }
   0x2   :  { %5 = vst [vmem:[%s47_s1] sm:$0xff] %v4_v0  ;;  %14 = vst [vmem:[%s47_s1 + $0x8] sm:$0xff] %v4_v0 }
   0x3   :  { %15 = vst [vmem:[%s47_s1 + $0x10] sm:$0xff] %v4_v0  ;;  %16 = vst [vmem:[%s47_s1 + $0x18] sm:$0xff] %v4_v0 }
   0x4   :  { %17 = vst [vmem:[%s47_s1 + $0x20] sm:$0xff] %v4_v0 }

// kernel: tile.28
= control target key start
LH: loop header
LB: loop body
LE: loop exit
PB: predicated region body
PF: predicated region fallthrough
CT: control target
= control target key end

     0   :  { %s28_s0 = inlined_call_operand.vmem [shape: f32[32], index: 0, kind: input, shape index: {}]   ;;  %s29_s1 = inlined_call_operand.vmem [shape: f32[9,32], index: 1, kind: output, shape index: {}]  }
   0x1   :  { %v4_v0 = vld [vmem:[%s28_s0] ss:$0 sm:$0xff] }
   0x2   :  { %5 = vst [vmem:[%s29_s1] sm:$0xff] %v4_v0  ;;  %8 = vst [vmem:[%s29_s1 + $0x8] sm:$0xff] %v4_v0 }

// kernel: tile.29
= control target key start
LH: loop header
LB: loop body
LE: loop exit
PB: predicated region body
PF: predicated region fallthrough
CT: control target
= control target key end

     0   :  { %s6_s6 = smov 3  ;;  %s13_s11 = smov 3  ;;  %vm3_vm0 = vcmask 261120   ;;  %vm10_vm1 = vcmask 1048320   ;;  %vm17_vm2 = vcmask 785920   ;;  %vm24_vm3 = vcmask 523520   ;;  %s68_s0 = inlined_call_operand.vmem [shape: f32[9,32], index: 0, kind: input, shape index: {}]   ;;  %s69_s1 = inlined_call_operand.vmem [shape: f32[288], index: 1, kind: output, shape index: {}]  }
   0x1   :  { %v2_v0 = vld [vmem:[%s68_s0] ss:$4 sm:$0x7]   ;;  %v34_v1 = vld [vmem:[%s68_s0 + $0x3] ss:$4 sm:%s6_s6]   ;;  %s40_s12 = smov 96  }
   0x2   :  { %8 = vrot.lane.b32.xlu0 %v34_v1, %s40_s12  ;;  %s20_s13 = smov 3  ;;  %4 = vst.msk [vmem:[#allocation0] sm:$0x7] %vm3_vm0, %v2_v0   ;;  %v35_v2 = vld [vmem:[%s68_s0 + $0x2] ss:$4 sm:%s13_s11]   ;;  %s42_s18 = smov 64  }
   0x3   :  { %v36_v3 = vld [vmem:[%s68_s0 + $0x1] ss:$4 sm:%s20_s13]   ;;  %s41_s0 = smov 32  }
   0x4   :  { %22 = vrot.lane.b32.xlu1 %v36_v3, %s41_s0 }
   0x6   :  { %15 = vrot.lane.b32.xlu0 %v35_v2, %s42_s18 }
  0x74   :  { %v9_v4 = vpop.permute.xlu0 %8  }
  0x75   :  { %11 = vst.msk [vmem:[#allocation0] sm:$0x3] %vm10_vm1, %v9_v4  }
  0x76   :  { %v23_v5 = vpop.permute.xlu1 %22  }
  0x78   :  { %v16_v6 = vpop.permute.xlu0 %15  }
  0x79   :  { %18 = vst.msk [vmem:[#allocation0] sm:$0x3] %vm17_vm2, %v16_v6  }
  0x7a   :  { %25 = vst.msk [vmem:[#allocation0] sm:$0x3] %vm24_vm3, %v23_v5  }
  0x81   :  { %v30_v7 = vld [vmem:[#allocation0] sm:$0xf] }
  0x82   :  { %33 = vst [vmem:[%s69_s1] sm:$0xf] %v30_v7 }

// kernel: cnn_forward.1
= control target key start
LH: loop header
LB: loop body
LE: loop exit
PB: predicated region body
PF: predicated region fallthrough
CT: control target
= control target key end

     0   :  { %vm2984_vm0 = vmmov 0   ;;  %s5982_s1 = inlined_call_operand.vmem [shape: f32[256,1152], index: 1, kind: input, shape index: {}]   ;;  %s5983_s0 = inlined_call_operand.vmem [shape: f32[8,256], index: 0, kind: input, shape index: {}]   ;;  %s5984_s3 = inlined_call_operand.vmem [shape: f32[1152,384], index: 3, kind: input, shape index: {}]   ;;  %s5985_s2 = inlined_call_operand.vmem [shape: f32[1,1152], index: 2, kind: input, shape index: {}]   ;;  %s5986_s5 = inlined_call_operand.vmem [shape: f32[384,384], index: 5, kind: input, shape index: {}]   ;;  %s5987_s4 = inlined_call_operand.vmem [shape: f32[1,384], index: 4, kind: input, shape index: {}]   ;;  %s5988_s7 = inlined_call_operand.vmem [shape: f32[384,128], index: 7, kind: input, shape index: {}]   ;;  %s5989_s6 = inlined_call_operand.vmem [shape: f32[1,384], index: 6, kind: input, shape index: {}]   ;;  %s5990_s8 = inlined_call_operand.vmem [shape: f32[1,128], index: 8, kind: input, shape index: {}]   ;;  %s5991_s9 = inlined_call_operand.vmem [shape: f32[8,128], index: 9, kind: output, shape index: {}]  }
   0x1   :  { %v170_v0 = vld [vmem:[%s5982_s1 + $0x440] sm:$0xff]  ;;  %v172_v1 = vld [vmem:[%s5982_s1 + $0x450] sm:$0xff]  ;;  %v169_v2 = vld [vmem:[%s5982_s1 + $0x438] sm:$0xff] }
   0x2   :  { %371 = vmatprep.subr.mxu0 %v170_v0  ;;  %442 = vmatprep.subr.mxu1 %v172_v1  ;;  %v171_v3 = vld [vmem:[%s5982_s1 + $0x448] sm:$0xff]  ;;  %v161_v4 = vld [vmem:[%s5982_s1 + $0x3f8] sm:$0xff]  ;;  %v160_v6 = vld [vmem:[%s5982_s1 + $0x3f0] sm:$0xff] }
   0x3   :  { %v163_v5 = vld [vmem:[%s5982_s1 + $0x408] sm:$0xff]  ;;  %372 = vmatpush1.msra.mxu0 %v169_v2  ;;  %443 = vmatpush1.msra.mxu1 %v171_v3  ;;  %v162_v7 = vld [vmem:[%s5982_s1 + $0x400] sm:$0xff]  ;;  %v152_v8 = vld [vmem:[%s5982_s1 + $0x3b0] sm:$0xff] }
   0x4   :  { %373 = vmatprep.subr.mxu0 %v161_v4  ;;  %444 = vmatprep.subr.mxu1 %v163_v5  ;;  %v154_v9 = vld [vmem:[%s5982_s1 + $0x3c0] sm:$0xff]  ;;  %v151_v10 = vld [vmem:[%s5982_s1 + $0x3a8] sm:$0xff]  ;;  %v153_v11 = vld [vmem:[%s5982_s1 + $0x3b8] sm:$0xff] }
   0x5   :  { %374 = vmatpush1.msra.mxu0 %v160_v6  ;;  %445 = vmatpush1.msra.mxu1 %v162_v7  ;;  %v143_v12 = vld [vmem:[%s5982_s1 + $0x368] sm:$0xff]  ;;  %v145_v13 = vld [vmem:[%s5982_s1 + $0x378] sm:$0xff]  ;;  %v142_v14 = vld [vmem:[%s5982_s1 + $0x360] sm:$0xff] }
   0x6   :  { %375 = vmatprep.subr.mxu0 %v152_v8  ;;  %446 = vmatprep.subr.mxu1 %v154_v9  ;;  %v144_v15 = vld [vmem:[%s5982_s1 + $0x370] sm:$0xff]  ;;  %v134_v16 = vld [vmem:[%s5982_s1 + $0x320] sm:$0xff]  ;;  %v133_v18 = vld [vmem:[%s5982_s1 + $0x318] sm:$0xff] }
   0x7   :  { %376 = vmatpush1.msra.mxu0 %v151_v10  ;;  %447 = vmatpush1.msra.mxu1 %v153_v11  ;;  %v136_v17 = vld [vmem:[%s5982_s1 + $0x330] sm:$0xff]  ;;  %v135_v19 = vld [vmem:[%s5982_s1 + $0x328] sm:$0xff]  ;;  %v125_v20 = vld [vmem:[%s5982_s1 + $0x2d8] sm:$0xff] }
   0x8   :  { %377 = vmatprep.subr.mxu0 %v143_v12  ;;  %448 = vmatprep.subr.mxu1 %v145_v13  ;;  %v127_v21 = vld [vmem:[%s5982_s1 + $0x2e8] sm:$0xff]  ;;  %v124_v22 = vld [vmem:[%s5982_s1 + $0x2d0] sm:$0xff]  ;;  %v126_v23 = vld [vmem:[%s5982_s1 + $0x2e0] sm:$0xff] }
   0x9   :  { %378 = vmatpush1.msra.mxu0 %v142_v14  ;;  %449 = vmatpush1.msra.mxu1 %v144_v15  ;;  %v116_v24 = vld [vmem:[%s5982_s1 + $0x290] sm:$0xff]  ;;  %v118_v25 = vld [vmem:[%s5982_s1 + $0x2a0] sm:$0xff]  ;;  %v115_v26 = vld [vmem:[%s5982_s1 + $0x288] sm:$0xff] }
   0xa   :  { %379 = vmatprep.subr.mxu0 %v134_v16  ;;  %450 = vmatprep.subr.mxu1 %v136_v17  ;;  %v117_v27 = vld [vmem:[%s5982_s1 + $0x298] sm:$0xff]  ;;  %v107_v28 = vld [vmem:[%s5982_s1 + $0x248] sm:$0xff]  ;;  %v106_v30 = vld [vmem:[%s5982_s1 + $0x240] sm:$0xff] }
   0xb   :  { %380 = vmatpush1.msra.mxu0 %v133_v18  ;;  %451 = vmatpush1.msra.mxu1 %v135_v19  ;;  %v109_v29 = vld [vmem:[%s5982_s1 + $0x258] sm:$0xff]  ;;  %v108_v31 = vld [vmem:[%s5982_s1 + $0x250] sm:$0xff]  ;;  %v98_v32 = vld [vmem:[%s5982_s1 + $0x200] sm:$0xff] }
   0xc   :  { %381 = vmatprep.subr.mxu0 %v125_v20  ;;  %452 = vmatprep.subr.mxu1 %v127_v21  ;;  %v100_v33 = vld [vmem:[%s5982_s1 + $0x210] sm:$0xff]  ;;  %v97_v34 = vld [vmem:[%s5982_s1 + $0x1f8] sm:$0xff]  ;;  %v99_v35 = vld [vmem:[%s5982_s1 + $0x208] sm:$0xff] }
   0xd   :  { %382 = vmatpush1.msra.mxu0 %v124_v22  ;;  %453 = vmatpush1.msra.mxu1 %v126_v23  ;;  %v89_v36 = vld [vmem:[%s5982_s1 + $0x1b8] sm:$0xff]  ;;  %v91_v37 = vld [vmem:[%s5982_s1 + $0x1c8] sm:$0xff]  ;;  %v88_v38 = vld [vmem:[%s5982_s1 + $0x1b0] sm:$0xff] }
   0xe   :  { %383 = vmatprep.subr.mxu0 %v116_v24  ;;  %454 = vmatprep.subr.mxu1 %v118_v25  ;;  %v90_v39 = vld [vmem:[%s5982_s1 + $0x1c0] sm:$0xff]  ;;  %v80_v40 = vld [vmem:[%s5982_s1 + $0x170] sm:$0xff]  ;;  %v79_v42 = vld [vmem:[%s5982_s1 + $0x168] sm:$0xff] }
   0xf   :  { %384 = vmatpush1.msra.mxu0 %v115_v26  ;;  %455 = vmatpush1.msra.mxu1 %v117_v27  ;;  %v82_v41 = vld [vmem:[%s5982_s1 + $0x180] sm:$0xff]  ;;  %v81_v43 = vld [vmem:[%s5982_s1 + $0x178] sm:$0xff]  ;;  %v71_v44 = vld [vmem:[%s5982_s1 + $0x128] sm:$0xff] }
  0x10   :  { %385 = vmatprep.subr.mxu0 %v107_v28  ;;  %456 = vmatprep.subr.mxu1 %v109_v29  ;;  %v73_v45 = vld [vmem:[%s5982_s1 + $0x138] sm:$0xff]  ;;  %v70_v46 = vld [vmem:[%s5982_s1 + $0x120] sm:$0xff]  ;;  %v72_v47 = vld [vmem:[%s5982_s1 + $0x130] sm:$0xff] }
  0x11   :  { %386 = vmatpush1.msra.mxu0 %v106_v30  ;;  %457 = vmatpush1.msra.mxu1 %v108_v31  ;;  %v62_v48 = vld [vmem:[%s5982_s1 + $0xe0] sm:$0xff]  ;;  %v64_v49 = vld [vmem:[%s5982_s1 + $0xf0] sm:$0xff]  ;;  %v61_v50 = vld [vmem:[%s5982_s1 + $0xd8] sm:$0xff] }
  0x12   :  { %387 = vmatprep.subr.mxu0 %v98_v32  ;;  %458 = vmatprep.subr.mxu1 %v100_v33  ;;  %v63_v51 = vld [vmem:[%s5982_s1 + $0xe8] sm:$0xff]  ;;  %v53_v52 = vld [vmem:[%s5982_s1 + $0x98] sm:$0xff]  ;;  %v52_v54 = vld [vmem:[%s5982_s1 + $0x90] sm:$0xff] }
  0x13   :  { %388 = vmatpush1.msra.mxu0 %v97_v34  ;;  %459 = vmatpush1.msra.mxu1 %v99_v35  ;;  %v55_v53 = vld [vmem:[%s5982_s1 + $0xa8] sm:$0xff]  ;;  %v54_v55 = vld [vmem:[%s5982_s1 + $0xa0] sm:$0xff]  ;;  %v44_v56 = vld [vmem:[%s5982_s1 + $0x50] sm:$0xff] }
  0x14   :  { %389 = vmatprep.subr.mxu0 %v89_v36  ;;  %460 = vmatprep.subr.mxu1 %v91_v37  ;;  %v46_v57 = vld [vmem:[%s5982_s1 + $0x60] sm:$0xff]  ;;  %v43_v58 = vld [vmem:[%s5982_s1 + $0x48] sm:$0xff]  ;;  %v45_v59 = vld [vmem:[%s5982_s1 + $0x58] sm:$0xff] }
  0x15   :  { %390 = vmatpush1.msra.mxu0 %v88_v38  ;;  %461 = vmatpush1.msra.mxu1 %v90_v39  ;;  %v35_v60 = vld [vmem:[%s5982_s1 + $0x8] sm:$0xff]  ;;  %v37_v61 = vld [vmem:[%s5982_s1 + $0x18] sm:$0xff]  ;;  %v34_v62 = vld [vmem:[%s5982_s1] sm:$0xff] }
  0x16   :  { %391 = vmatprep.subr.mxu0 %v80_v40  ;;  %462 = vmatprep.subr.mxu1 %v82_v41  ;;  %v36_v63 = vld [vmem:[%s5982_s1 + $0x10] sm:$0xff]  ;;  %v314_v0 = vld [vmem:[%s5982_s1 + $0x8c0] sm:$0xff]  ;;  %v313_v2 = vld [vmem:[%s5982_s1 + $0x8b8] sm:$0xff] }
  0x17   :  { %392 = vmatpush1.msra.mxu0 %v79_v42  ;;  %463 = vmatpush1.msra.mxu1 %v81_v43  ;;  %v316_v1 = vld [vmem:[%s5982_s1 + $0x8d0] sm:$0xff]  ;;  %v315_v3 = vld [vmem:[%s5982_s1 + $0x8c8] sm:$0xff]  ;;  %v305_v4 = vld [vmem:[%s5982_s1 + $0x878] sm:$0xff] }
  0x18   :  { %393 = vmatprep.subr.mxu0 %v71_v44  ;;  %464 = vmatprep.subr.mxu1 %v73_v45  ;;  %v307_v5 = vld [vmem:[%s5982_s1 + $0x888] sm:$0xff]  ;;  %v304_v6 = vld [vmem:[%s5982_s1 + $0x870] sm:$0xff]  ;;  %v306_v7 = vld [vmem:[%s5982_s1 + $0x880] sm:$0xff] }
  0x19   :  { %394 = vmatpush1.msra.mxu0 %v70_v46  ;;  %465 = vmatpush1.msra.mxu1 %v72_v47  ;;  %v296_v8 = vld [vmem:[%s5982_s1 + $0x830] sm:$0xff]  ;;  %v298_v9 = vld [vmem:[%s5982_s1 + $0x840] sm:$0xff]  ;;  %v295_v10 = vld [vmem:[%s5982_s1 + $0x828] sm:$0xff] }
  0x1a   :  { %395 = vmatprep.subr.mxu0 %v62_v48  ;;  %466 = vmatprep.subr.mxu1 %v64_v49  ;;  %v297_v11 = vld [vmem:[%s5982_s1 + $0x838] sm:$0xff]  ;;  %v287_v12 = vld [vmem:[%s5982_s1 + $0x7e8] sm:$0xff]  ;;  %v286_v14 = vld [vmem:[%s5982_s1 + $0x7e0] sm:$0xff] }
  0x1b   :  { %396 = vmatpush1.msra.mxu0 %v61_v50  ;;  %467 = vmatpush1.msra.mxu1 %v63_v51  ;;  %v289_v13 = vld [vmem:[%s5982_s1 + $0x7f8] sm:$0xff]  ;;  %v288_v15 = vld [vmem:[%s5982_s1 + $0x7f0] sm:$0xff]  ;;  %v278_v16 = vld [vmem:[%s5982_s1 + $0x7a0] sm:$0xff] }
  0x1c   :  { %397 = vmatprep.subr.mxu0 %v53_v52  ;;  %468 = vmatprep.subr.mxu1 %v55_v53  ;;  %v280_v17 = vld [vmem:[%s5982_s1 + $0x7b0] sm:$0xff]  ;;  %v277_v18 = vld [vmem:[%s5982_s1 + $0x798] sm:$0xff]  ;;  %v279_v19 = vld [vmem:[%s5982_s1 + $0x7a8] sm:$0xff] }
  0x1d   :  { %398 = vmatpush1.msra.mxu0 %v52_v54  ;;  %469 = vmatpush1.msra.mxu1 %v54_v55  ;;  %v269_v20 = vld [vmem:[%s5982_s1 + $0x758] sm:$0xff]  ;;  %v271_v21 = vld [vmem:[%s5982_s1 + $0x768] sm:$0xff]  ;;  %v268_v22 = vld [vmem:[%s5982_s1 + $0x750] sm:$0xff] }
  0x1e   :  { %399 = vmatprep.subr.mxu0 %v44_v56  ;;  %470 = vmatprep.subr.mxu1 %v46_v57  ;;  %v270_v23 = vld [vmem:[%s5982_s1 + $0x760] sm:$0xff]  ;;  %v260_v24 = vld [vmem:[%s5982_s1 + $0x710] sm:$0xff]  ;;  %v259_v26 = vld [vmem:[%s5982_s1 + $0x708] sm:$0xff] }
  0x1f   :  { %400 = vmatpush1.msra.mxu0 %v43_v58  ;;  %471 = vmatpush1.msra.mxu1 %v45_v59  ;;  %v262_v25 = vld [vmem:[%s5982_s1 + $0x720] sm:$0xff]  ;;  %v261_v27 = vld [vmem:[%s5982_s1 + $0x718] sm:$0xff]  ;;  %v251_v28 = vld [vmem:[%s5982_s1 + $0x6c8] sm:$0xff] }
  0x20   :  { %401 = vmatprep.subr.mxu0 %v35_v60  ;;  %472 = vmatprep.subr.mxu1 %v37_v61  ;;  %v253_v29 = vld [vmem:[%s5982_s1 + $0x6d8] sm:$0xff]  ;;  %v250_v30 = vld [vmem:[%s5982_s1 + $0x6c0] sm:$0xff]  ;;  %v252_v31 = vld [vmem:[%s5982_s1 + $0x6d0] sm:$0xff] }
  0x21   :  { %402 = vmatpush1.msra.mxu0 %v34_v62  ;;  %473 = vmatpush1.msra.mxu1 %v36_v63  ;;  %v242_v32 = vld [vmem:[%s5982_s1 + $0x680] sm:$0xff]  ;;  %v244_v33 = vld [vmem:[%s5982_s1 + $0x690] sm:$0xff]  ;;  %v241_v34 = vld [vmem:[%s5982_s1 + $0x678] sm:$0xff] }
  0x22   :  { %403 = vmatprep.subr.mxu0 %v314_v0  ;;  %474 = vmatprep.subr.mxu1 %v316_v1  ;;  %v243_v35 = vld [vmem:[%s5982_s1 + $0x688] sm:$0xff]  ;;  %v233_v36 = vld [vmem:[%s5982_s1 + $0x638] sm:$0xff]  ;;  %v232_v38 = vld [vmem:[%s5982_s1 + $0x630] sm:$0xff] }
  0x23   :  { %404 = vmatpush2.msra.mxu0 %v313_v2  ;;  %475 = vmatpush2.msra.mxu1 %v315_v3  ;;  %v235_v37 = vld [vmem:[%s5982_s1 + $0x648] sm:$0xff]  ;;  %v234_v39 = vld [vmem:[%s5982_s1 + $0x640] sm:$0xff]  ;;  %v224_v40 = vld [vmem:[%s5982_s1 + $0x5f0] sm:$0xff] }
  0x24   :  { %405 = vmatprep.subr.mxu0 %v305_v4  ;;  %476 = vmatprep.subr.mxu1 %v307_v5  ;;  %v226_v41 = vld [vmem:[%s5982_s1 + $0x600] sm:$0xff]  ;;  %v223_v42 = vld [vmem:[%s5982_s1 + $0x5e8] sm:$0xff]  ;;  %v225_v43 = vld [vmem:[%s5982_s1 + $0x5f8] sm:$0xff] }
  0x25   :  { %406 = vmatpush2.msra.mxu0 %v304_v6  ;;  %477 = vmatpush2.msra.mxu1 %v306_v7  ;;  %v215_v44 = vld [vmem:[%s5982_s1 + $0x5a8] sm:$0xff]  ;;  %v217_v45 = vld [vmem:[%s5982_s1 + $0x5b8] sm:$0xff]  ;;  %v214_v46 = vld [vmem:[%s5982_s1 + $0x5a0] sm:$0xff] }
  0x26   :  { %407 = vmatprep.subr.mxu0 %v296_v8  ;;  %478 = vmatprep.subr.mxu1 %v298_v9  ;;  %v216_v47 = vld [vmem:[%s5982_s1 + $0x5b0] sm:$0xff]  ;;  %v206_v48 = vld [vmem:[%s5982_s1 + $0x560] sm:$0xff]  ;;  %v205_v50 = vld [vmem:[%s5982_s1 + $0x558] sm:$0xff] }
  0x27   :  { %408 = vmatpush2.msra.mxu0 %v295_v10  ;;  %479 = vmatpush2.msra.mxu1 %v297_v11  ;;  %v208_v49 = vld [vmem:[%s5982_s1 + $0x570] sm:$0xff]  ;;  %v207_v51 = vld [vmem:[%s5982_s1 + $0x568] sm:$0xff]  ;;  %v197_v52 = vld [vmem:[%s5982_s1 + $0x518] sm:$0xff] }
  0x28   :  { %409 = vmatprep.subr.mxu0 %v287_v12  ;;  %480 = vmatprep.subr.mxu1 %v289_v13  ;;  %v199_v53 = vld [vmem:[%s5982_s1 + $0x528] sm:$0xff]  ;;  %v196_v54 = vld [vmem:[%s5982_s1 + $0x510] sm:$0xff]  ;;  %v198_v55 = vld [vmem:[%s5982_s1 + $0x520] sm:$0xff] }
  0x29   :  { %410 = vmatpush2.msra.mxu0 %v286_v14  ;;  %481 = vmatpush2.msra.mxu1 %v288_v15  ;;  %v188_v56 = vld [vmem:[%s5982_s1 + $0x4d0] sm:$0xff]  ;;  %v190_v57 = vld [vmem:[%s5982_s1 + $0x4e0] sm:$0xff]  ;;  %v187_v58 = vld [vmem:[%s5982_s1 + $0x4c8] sm:$0xff] }
  0x2a   :  { %411 = vmatprep.subr.mxu0 %v278_v16  ;;  %482 = vmatprep.subr.mxu1 %v280_v17  ;;  %v189_v59 = vld [vmem:[%s5982_s1 + $0x4d8] sm:$0xff]  ;;  %v179_v60 = vld [vmem:[%s5982_s1 + $0x488] sm:$0xff]  ;;  %v178_v62 = vld [vmem:[%s5982_s1 + $0x480] sm:$0xff] }
  0x2b   :  { %412 = vmatpush2.msra.mxu0 %v277_v18  ;;  %483 = vmatpush2.msra.mxu1 %v279_v19  ;;  %v181_v61 = vld [vmem:[%s5982_s1 + $0x498] sm:$0xff]  ;;  %v3419_v63 = vld [vmem:[%s5983_s0 + $0x8] sm:$0xff]  ;;  %v180_v0 = vld [vmem:[%s5982_s1 + $0x490] sm:$0xff] }
  0x2c   :  { %413 = vmatprep.subr.mxu0 %v269_v20  ;;  %484 = vmatprep.subr.mxu1 %v271_v21  ;;  %v3427_v1 = vld [vmem:[%s5983_s0] sm:$0xff]  ;;  %v176_v3 = vld [vmem:[%s5982_s1 + $0x470] sm:$0xff]  ;;  %v173_v4 = vld [vmem:[%s5982_s1 + $0x458] sm:$0xff] }
  0x2d   :  { %414 = vmatpush2.msra.mxu0 %v268_v22  ;;  %485 = vmatpush2.msra.mxu1 %v270_v23  ;;  %v174_v2 = vld [vmem:[%s5982_s1 + $0x460] sm:$0xff]  ;;  %v175_v5 = vld [vmem:[%s5982_s1 + $0x468] sm:$0xff]  ;;  %v165_v6 = vld [vmem:[%s5982_s1 + $0x418] sm:$0xff] }
  0x2e   :  { %415 = vmatprep.subr.mxu0 %v260_v24  ;;  %486 = vmatprep.subr.mxu1 %v262_v25  ;;  %v167_v7 = vld [vmem:[%s5982_s1 + $0x428] sm:$0xff]  ;;  %v164_v8 = vld [vmem:[%s5982_s1 + $0x410] sm:$0xff]  ;;  %v166_v9 = vld [vmem:[%s5982_s1 + $0x420] sm:$0xff] }
  0x2f   :  { %416 = vmatpush2.msra.mxu0 %v259_v26  ;;  %487 = vmatpush2.msra.mxu1 %v261_v27  ;;  %v156_v10 = vld [vmem:[%s5982_s1 + $0x3d0] sm:$0xff]  ;;  %v158_v11 = vld [vmem:[%s5982_s1 + $0x3e0] sm:$0xff]  ;;  %v155_v12 = vld [vmem:[%s5982_s1 + $0x3c8] sm:$0xff] }
  0x30   :  { %417 = vmatprep.subr.mxu0 %v251_v28  ;;  %488 = vmatprep.subr.mxu1 %v253_v29  ;;  %v157_v13 = vld [vmem:[%s5982_s1 + $0x3d8] sm:$0xff]  ;;  %v147_v14 = vld [vmem:[%s5982_s1 + $0x388] sm:$0xff]  ;;  %v146_v16 = vld [vmem:[%s5982_s1 + $0x380] sm:$0xff] }
  0x31   :  { %418 = vmatpush2.msra.mxu0 %v250_v30  ;;  %489 = vmatpush2.msra.mxu1 %v252_v31  ;;  %v149_v15 = vld [vmem:[%s5982_s1 + $0x398] sm:$0xff]  ;;  %v148_v17 = vld [vmem:[%s5982_s1 + $0x390] sm:$0xff]  ;;  %v138_v18 = vld [vmem:[%s5982_s1 + $0x340] sm:$0xff] }
  0x32   :  { %419 = vmatprep.subr.mxu0 %v242_v32  ;;  %490 = vmatprep.subr.mxu1 %v244_v33  ;;  %v140_v19 = vld [vmem:[%s5982_s1 + $0x350] sm:$0xff]  ;;  %v137_v20 = vld [vmem:[%s5982_s1 + $0x338] sm:$0xff]  ;;  %v139_v21 = vld [vmem:[%s5982_s1 + $0x348] sm:$0xff] }
  0x33   :  { %420 = vmatpush2.msra.mxu0 %v241_v34  ;;  %491 = vmatpush2.msra.mxu1 %v243_v35  ;;  %v129_v22 = vld [vmem:[%s5982_s1 + $0x2f8] sm:$0xff]  ;;  %v131_v23 = vld [vmem:[%s5982_s1 + $0x308] sm:$0xff]  ;;  %v128_v24 = vld [vmem:[%s5982_s1 + $0x2f0] sm:$0xff] }
  0x34   :  { %421 = vmatprep.subr.mxu0 %v233_v36  ;;  %492 = vmatprep.subr.mxu1 %v235_v37  ;;  %v130_v25 = vld [vmem:[%s5982_s1 + $0x300] sm:$0xff]  ;;  %v120_v26 = vld [vmem:[%s5982_s1 + $0x2b0] sm:$0xff]  ;;  %v119_v28 = vld [vmem:[%s5982_s1 + $0x2a8] sm:$0xff] }
  0x35   :  { %422 = vmatpush2.msra.mxu0 %v232_v38  ;;  %493 = vmatpush2.msra.mxu1 %v234_v39  ;;  %v122_v27 = vld [vmem:[%s5982_s1 + $0x2c0] sm:$0xff]  ;;  %v121_v29 = vld [vmem:[%s5982_s1 + $0x2b8] sm:$0xff]  ;;  %v111_v30 = vld [vmem:[%s5982_s1 + $0x268] sm:$0xff] }
  0x36   :  { %423 = vmatprep.subr.mxu0 %v224_v40  ;;  %494 = vmatprep.subr.mxu1 %v226_v41  ;;  %v113_v31 = vld [vmem:[%s5982_s1 + $0x278] sm:$0xff]  ;;  %v110_v32 = vld [vmem:[%s5982_s1 + $0x260] sm:$0xff]  ;;  %v112_v33 = vld [vmem:[%s5982_s1 + $0x270] sm:$0xff] }
  0x37   :  { %424 = vmatpush2.msra.mxu0 %v223_v42  ;;  %495 = vmatpush2.msra.mxu1 %v225_v43  ;;  %v102_v34 = vld [vmem:[%s5982_s1 + $0x220] sm:$0xff]  ;;  %v104_v35 = vld [vmem:[%s5982_s1 + $0x230] sm:$0xff]  ;;  %v101_v36 = vld [vmem:[%s5982_s1 + $0x218] sm:$0xff] }
  0x38   :  { %425 = vmatprep.subr.mxu0 %v215_v44  ;;  %496 = vmatprep.subr.mxu1 %v217_v45  ;;  %v103_v37 = vld [vmem:[%s5982_s1 + $0x228] sm:$0xff]  ;;  %v93_v38 = vld [vmem:[%s5982_s1 + $0x1d8] sm:$0xff]  ;;  %v92_v40 = vld [vmem:[%s5982_s1 + $0x1d0] sm:$0xff] }
  0x39   :  { %426 = vmatpush2.msra.mxu0 %v214_v46  ;;  %497 = vmatpush2.msra.mxu1 %v216_v47  ;;  %v95_v39 = vld [vmem:[%s5982_s1 + $0x1e8] sm:$0xff]  ;;  %v94_v41 = vld [vmem:[%s5982_s1 + $0x1e0] sm:$0xff]  ;;  %v84_v42 = vld [vmem:[%s5982_s1 + $0x190] sm:$0xff] }
  0x3a   :  { %427 = vmatprep.subr.mxu0 %v206_v48  ;;  %498 = vmatprep.subr.mxu1 %v208_v49  ;;  %v86_v43 = vld [vmem:[%s5982_s1 + $0x1a0] sm:$0xff]  ;;  %v83_v44 = vld [vmem:[%s5982_s1 + $0x188] sm:$0xff]  ;;  %v85_v45 = vld [vmem:[%s5982_s1 + $0x198] sm:$0xff] }
  0x3b   :  { %428 = vmatpush2.msra.mxu0 %v205_v50  ;;  %499 = vmatpush2.msra.mxu1 %v207_v51  ;;  %v75_v46 = vld [vmem:[%s5982_s1 + $0x148] sm:$0xff]  ;;  %v77_v47 = vld [vmem:[%s5982_s1 + $0x158] sm:$0xff]  ;;  %v74_v48 = vld [vmem:[%s5982_s1 + $0x140] sm:$0xff] }
  0x3c   :  { %429 = vmatprep.subr.mxu0 %v197_v52  ;;  %500 = vmatprep.subr.mxu1 %v199_v53  ;;  %v76_v49 = vld [vmem:[%s5982_s1 + $0x150] sm:$0xff]  ;;  %v66_v50 = vld [vmem:[%s5982_s1 + $0x100] sm:$0xff]  ;;  %v65_v52 = vld [vmem:[%s5982_s1 + $0xf8] sm:$0xff] }
  0x3d   :  { %430 = vmatpush2.msra.mxu0 %v196_v54  ;;  %501 = vmatpush2.msra.mxu1 %v198_v55  ;;  %v68_v51 = vld [vmem:[%s5982_s1 + $0x110] sm:$0xff]  ;;  %v67_v53 = vld [vmem:[%s5982_s1 + $0x108] sm:$0xff]  ;;  %v57_v54 = vld [vmem:[%s5982_s1 + $0xb8] sm:$0xff] }
  0x3e   :  { %431 = vmatprep.subr.mxu0 %v188_v56  ;;  %502 = vmatprep.subr.mxu1 %v190_v57  ;;  %v59_v55 = vld [vmem:[%s5982_s1 + $0xc8] sm:$0xff]  ;;  %v56_v56 = vld [vmem:[%s5982_s1 + $0xb0] sm:$0xff]  ;;  %v58_v57 = vld [vmem:[%s5982_s1 + $0xc0] sm:$0xff] }
  0x3f   :  { %432 = vmatpush2.msra.mxu0 %v187_v58  ;;  %503 = vmatpush2.msra.mxu1 %v189_v59  ;;  %v48_v58 = vld [vmem:[%s5982_s1 + $0x70] sm:$0xff]  ;;  %v50_v59 = vld [vmem:[%s5982_s1 + $0x80] sm:$0xff] }
  0x40   :  { %433 = vmatprep.subr.mxu0 %v179_v60  ;;  %504 = vmatprep.subr.mxu1 %v181_v61  ;;  %v47_v60 = vld [vmem:[%s5982_s1 + $0x68] sm:$0xff]  ;;  %v49_v61 = vld [vmem:[%s5982_s1 + $0x78] sm:$0xff] }
  0x41   :  { %434 = vmatpush2.msra.mxu0 %v178_v62  ;;  %435 = vmatprep.mubr.f32.mxu0 %v3419_v63  ;;  %v39_v62 = vld [vmem:[%s5982_s1 + $0x28] sm:$0xff] }
  0x42   :  { %505 = vmatpush2.msra.mxu1 %v180_v0  ;;  %506 = vmatprep.mubr.f32.mxu1 %v3419_v63  ;;  %v41_v0 = vld [vmem:[%s5982_s1 + $0x38] sm:$0xff] }
  0x43   :  { %436 = vmatmul.mubr.f32.vlgmr.msra.gmra.mxu0 %v3427_v1  ;;  %507 = vmatmul.mubr.f32.vlgmr.msra.gmra.mxu1 %v3427_v1 }
  0x44   :  { %513 = vmatprep.subr.mxu0 %v174_v2  ;;  %584 = vmatprep.subr.mxu1 %v176_v3  ;;  %v38_v2 = vld [vmem:[%s5982_s1 + $0x20] sm:$0xff]  ;;  %v40_v3 = vld [vmem:[%s5982_s1 + $0x30] sm:$0xff] }
  0x45   :  { %514 = vmatpush1.msra.mxu0 %v173_v4  ;;  %585 = vmatpush1.msra.mxu1 %v175_v5  ;;  %v318_v4 = vld [vmem:[%s5982_s1 + $0x8e0] sm:$0xff]  ;;  %v320_v5 = vld [vmem:[%s5982_s1 + $0x8f0] sm:$0xff] }
  0x46   :  { %515 = vmatprep.subr.mxu0 %v165_v6  ;;  %586 = vmatprep.subr.mxu1 %v167_v7  ;;  %v317_v6 = vld [vmem:[%s5982_s1 + $0x8d8] sm:$0xff]  ;;  %v319_v7 = vld [vmem:[%s5982_s1 + $0x8e8] sm:$0xff] }
  0x47   :  { %516 = vmatpush1.msra.mxu0 %v164_v8  ;;  %587 = vmatpush1.msra.mxu1 %v166_v9  ;;  %v309_v8 = vld [vmem:[%s5982_s1 + $0x898] sm:$0xff]  ;;  %v311_v9 = vld [vmem:[%s5982_s1 + $0x8a8] sm:$0xff] }
  0x48   :  { %517 = vmatprep.subr.mxu0 %v156_v10  ;;  %588 = vmatprep.subr.mxu1 %v158_v11  ;;  %v308_v10 = vld [vmem:[%s5982_s1 + $0x890] sm:$0xff]  ;;  %v310_v11 = vld [vmem:[%s5982_s1 + $0x8a0] sm:$0xff] }
  0x49   :  { %518 = vmatpush1.msra.mxu0 %v155_v12  ;;  %589 = vmatpush1.msra.mxu1 %v157_v13  ;;  %v300_v12 = vld [vmem:[%s5982_s1 + $0x850] sm:$0xff]  ;;  %v302_v13 = vld [vmem:[%s5982_s1 + $0x860] sm:$0xff] }
  0x4a   :  { %519 = vmatprep.subr.mxu0 %v147_v14  ;;  %590 = vmatprep.subr.mxu1 %v149_v15  ;;  %v299_v14 = vld [vmem:[%s5982_s1 + $0x848] sm:$0xff]  ;;  %v301_v15 = vld [vmem:[%s5982_s1 + $0x858] sm:$0xff] }
  0x4b   :  { %520 = vmatpush1.msra.mxu0 %v146_v16  ;;  %591 = vmatpush1.msra.mxu1 %v148_v17  ;;  %v291_v16 = vld [vmem:[%s5982_s1 + $0x808] sm:$0xff]  ;;  %v293_v17 = vld [vmem:[%s5982_s1 + $0x818] sm:$0xff] }
  0x4c   :  { %521 = vmatprep.subr.mxu0 %v138_v18  ;;  %592 = vmatprep.subr.mxu1 %v140_v19  ;;  %v290_v18 = vld [vmem:[%s5982_s1 + $0x800] sm:$0xff]  ;;  %v292_v19 = vld [vmem:[%s5982_s1 + $0x810] sm:$0xff] }
  0x4d   :  { %522 = vmatpush1.msra.mxu0 %v137_v20  ;;  %593 = vmatpush1.msra.mxu1 %v139_v21  ;;  %v282_v20 = vld [vmem:[%s5982_s1 + $0x7c0] sm:$0xff]  ;;  %v284_v21 = vld [vmem:[%s5982_s1 + $0x7d0] sm:$0xff] }
  0x4e   :  { %523 = vmatprep.subr.mxu0 %v129_v22  ;;  %594 = vmatprep.subr.mxu1 %v131_v23  ;;  %v281_v22 = vld [vmem:[%s5982_s1 + $0x7b8] sm:$0xff]  ;;  %v283_v23 = vld [vmem:[%s5982_s1 + $0x7c8] sm:$0xff] }
  0x4f   :  { %524 = vmatpush1.msra.mxu0 %v128_v24  ;;  %595 = vmatpush1.msra.mxu1 %v130_v25  ;;  %v273_v24 = vld [vmem:[%s5982_s1 + $0x778] sm:$0xff]  ;;  %v275_v25 = vld [vmem:[%s5982_s1 + $0x788] sm:$0xff] }
  0x50   :  { %525 = vmatprep.subr.mxu0 %v120_v26  ;;  %596 = vmatprep.subr.mxu1 %v122_v27  ;;  %v272_v26 = vld [vmem:[%s5982_s1 + $0x770] sm:$0xff]  ;;  %v274_v27 = vld [vmem:[%s5982_s1 + $0x780] sm:$0xff] }
  0x51   :  { %526 = vmatpush1.msra.mxu0 %v119_v28  ;;  %597 = vmatpush1.msra.mxu1 %v121_v29  ;;  %v264_v28 = vld [vmem:[%s5982_s1 + $0x730] sm:$0xff]  ;;  %v266_v29 = vld [vmem:[%s5982_s1 + $0x740] sm:$0xff] }
  0x52   :  { %527 = vmatprep.subr.mxu0 %v111_v30  ;;  %598 = vmatprep.subr.mxu1 %v113_v31  ;;  %v263_v30 = vld [vmem:[%s5982_s1 + $0x728] sm:$0xff]  ;;  %v265_v31 = vld [vmem:[%s5982_s1 + $0x738] sm:$0xff] }
  0x53   :  { %528 = vmatpush1.msra.mxu0 %v110_v32  ;;  %599 = vmatpush1.msra.mxu1 %v112_v33  ;;  %v255_v32 = vld [vmem:[%s5982_s1 + $0x6e8] sm:$0xff]  ;;  %v257_v33 = vld [vmem:[%s5982_s1 + $0x6f8] sm:$0xff] }
  0x54   :  { %529 = vmatprep.subr.mxu0 %v102_v34  ;;  %600 = vmatprep.subr.mxu1 %v104_v35  ;;  %v254_v34 = vld [vmem:[%s5982_s1 + $0x6e0] sm:$0xff]  ;;  %v256_v35 = vld [vmem:[%s5982_s1 + $0x6f0] sm:$0xff] }
  0x55   :  { %530 = vmatpush1.msra.mxu0 %v101_v36  ;;  %601 = vmatpush1.msra.mxu1 %v103_v37  ;;  %v246_v36 = vld [vmem:[%s5982_s1 + $0x6a0] sm:$0xff]  ;;  %v248_v37 = vld [vmem:[%s5982_s1 + $0x6b0] sm:$0xff] }
  0x56   :  { %531 = vmatprep.subr.mxu0 %v93_v38  ;;  %602 = vmatprep.subr.mxu1 %v95_v39  ;;  %v245_v38 = vld [vmem:[%s5982_s1 + $0x698] sm:$0xff]  ;;  %v247_v39 = vld [vmem:[%s5982_s1 + $0x6a8] sm:$0xff] }
  0x57   :  { %532 = vmatpush1.msra.mxu0 %v92_v40  ;;  %603 = vmatpush1.msra.mxu1 %v94_v41  ;;  %v237_v40 = vld [vmem:[%s5982_s1 + $0x658] sm:$0xff]  ;;  %v239_v41 = vld [vmem:[%s5982_s1 + $0x668] sm:$0xff] }
  0x58   :  { %533 = vmatprep.subr.mxu0 %v84_v42  ;;  %604 = vmatprep.subr.mxu1 %v86_v43  ;;  %v236_v42 = vld [vmem:[%s5982_s1 + $0x650] sm:$0xff]  ;;  %v238_v43 = vld [vmem:[%s5982_s1 + $0x660] sm:$0xff] }
  0x59   :  { %534 = vmatpush1.msra.mxu0 %v83_v44  ;;  %605 = vmatpush1.msra.mxu1 %v85_v45  ;;  %v228_v44 = vld [vmem:[%s5982_s1 + $0x610] sm:$0xff]  ;;  %v230_v45 = vld [vmem:[%s5982_s1 + $0x620] sm:$0xff] }
  0x5a   :  { %535 = vmatprep.subr.mxu0 %v75_v46  ;;  %606 = vmatprep.subr.mxu1 %v77_v47  ;;  %v227_v46 = vld [vmem:[%s5982_s1 + $0x608] sm:$0xff]  ;;  %v229_v47 = vld [vmem:[%s5982_s1 + $0x618] sm:$0xff] }
  0x5b   :  { %536 = vmatpush1.msra.mxu0 %v74_v48  ;;  %607 = vmatpush1.msra.mxu1 %v76_v49  ;;  %v219_v48 = vld [vmem:[%s5982_s1 + $0x5c8] sm:$0xff]  ;;  %v221_v49 = vld [vmem:[%s5982_s1 + $0x5d8] sm:$0xff] }
  0x5c   :  { %537 = vmatprep.subr.mxu0 %v66_v50  ;;  %608 = vmatprep.subr.mxu1 %v68_v51  ;;  %v218_v50 = vld [vmem:[%s5982_s1 + $0x5c0] sm:$0xff]  ;;  %v220_v51 = vld [vmem:[%s5982_s1 + $0x5d0] sm:$0xff] }
  0x5d   :  { %538 = vmatpush1.msra.mxu0 %v65_v52  ;;  %609 = vmatpush1.msra.mxu1 %v67_v53  ;;  %v210_v52 = vld [vmem:[%s5982_s1 + $0x580] sm:$0xff]  ;;  %v212_v53 = vld [vmem:[%s5982_s1 + $0x590] sm:$0xff] }
  0x5e   :  { %539 = vmatprep.subr.mxu0 %v57_v54  ;;  %610 = vmatprep.subr.mxu1 %v59_v55  ;;  %v209_v54 = vld [vmem:[%s5982_s1 + $0x578] sm:$0xff]  ;;  %v211_v55 = vld [vmem:[%s5982_s1 + $0x588] sm:$0xff] }
  0x5f   :  { %540 = vmatpush1.msra.mxu0 %v56_v56  ;;  %611 = vmatpush1.msra.mxu1 %v58_v57  ;;  %v201_v56 = vld [vmem:[%s5982_s1 + $0x538] sm:$0xff]  ;;  %v203_v57 = vld [vmem:[%s5982_s1 + $0x548] sm:$0xff] }
  0x60   :  { %541 = vmatprep.subr.mxu0 %v48_v58  ;;  %612 = vmatprep.subr.mxu1 %v50_v59  ;;  %v200_v58 = vld [vmem:[%s5982_s1 + $0x530] sm:$0xff]  ;;  %v202_v59 = vld [vmem:[%s5982_s1 + $0x540] sm:$0xff] }
  0x61   :  { %542 = vmatpush1.msra.mxu0 %v47_v60  ;;  %613 = vmatpush1.msra.mxu1 %v49_v61  ;;  %v192_v60 = vld [vmem:[%s5982_s1 + $0x4f0] sm:$0xff]  ;;  %v194_v61 = vld [vmem:[%s5982_s1 + $0x500] sm:$0xff] }
  0x62   :  { %543 = vmatprep.subr.mxu0 %v39_v62  ;;  %614 = vmatprep.subr.mxu1 %v41_v0  ;;  %v191_v62 = vld [vmem:[%s5982_s1 + $0x4e8] sm:$0xff]  ;;  %v193_v0 = vld [vmem:[%s5982_s1 + $0x4f8] sm:$0xff] }
  0x63   :  { %544 = vmatpush1.msra.mxu0 %v38_v2  ;;  %615 = vmatpush1.msra.mxu1 %v40_v3  ;;  %v183_v2 = vld [vmem:[%s5982_s1 + $0x4a8] sm:$0xff]  ;;  %v185_v3 = vld [vmem:[%s5982_s1 + $0x4b8] sm:$0xff] }
  0x64   :  { %545 = vmatprep.subr.mxu0 %v318_v4  ;;  %616 = vmatprep.subr.mxu1 %v320_v5  ;;  %v182_v4 = vld [vmem:[%s5982_s1 + $0x4a0] sm:$0xff]  ;;  %v184_v5 = vld [vmem:[%s5982_s1 + $0x4b0] sm:$0xff] }
  0x65   :  { %546 = vmatpush2.msra.mxu0 %v317_v6  ;;  %617 = vmatpush2.msra.mxu1 %v319_v7  ;;  %v321_v6 = vld [vmem:[%s5982_s1 + $0x8f8] sm:$0xff] }
  0x66   :  { %547 = vmatprep.subr.mxu0 %v309_v8  ;;  %618 = vmatprep.subr.mxu1 %v311_v9  ;;  %v177_v7 = vld [vmem:[%s5982_s1 + $0x478] sm:$0xff]  ;;  %v789_v8 = vld [vmem:[%s5984_s3 + $0x170] sm:$0xff] }
  0x67   :  { %548 = vmatpush2.msra.mxu0 %v308_v10  ;;  %619 = vmatpush2.msra.mxu1 %v310_v11  ;;  %v312_v9 = vld [vmem:[%s5982_s1 + $0x8b0] sm:$0xff]  ;;  %v788_v10 = vld [vmem:[%s5984_s3 + $0x168] sm:$0xff] }
  0x68   :  { %549 = vmatprep.subr.mxu0 %v300_v12  ;;  %620 = vmatprep.subr.mxu1 %v302_v13  ;;  %v168_v11 = vld [vmem:[%s5982_s1 + $0x430] sm:$0xff]  ;;  %v786_v12 = vld [vmem:[%s5984_s3 + $0x158] sm:$0xff]  ;;  %v303_v13 = vld [vmem:[%s5982_s1 + $0x868] sm:$0xff] }
  0x69   :  { %550 = vmatpush2.msra.mxu0 %v299_v14  ;;  %621 = vmatpush2.msra.mxu1 %v301_v15  ;;  %v785_v14 = vld [vmem:[%s5984_s3 + $0x150] sm:$0xff]  ;;  %v159_v15 = vld [vmem:[%s5982_s1 + $0x3e8] sm:$0xff] }
  0x6a   :  { %551 = vmatprep.subr.mxu0 %v291_v16  ;;  %622 = vmatprep.subr.mxu1 %v293_v17  ;;  %v294_v16 = vld [vmem:[%s5982_s1 + $0x820] sm:$0xff]  ;;  %v782_v17 = vld [vmem:[%s5984_s3 + $0x138] sm:$0xff] }
  0x6b   :  { %552 = vmatpush2.msra.mxu0 %v290_v18  ;;  %623 = vmatpush2.msra.mxu1 %v292_v19  ;;  %v150_v18 = vld [vmem:[%s5982_s1 + $0x3a0] sm:$0xff]  ;;  %v780_v19 = vld [vmem:[%s5984_s3 + $0x128] sm:$0xff] }
  0x6c   :  { %553 = vmatprep.subr.mxu0 %v282_v20  ;;  %624 = vmatprep.subr.mxu1 %v284_v21  ;;  %v285_v20 = vld [vmem:[%s5982_s1 + $0x7d8] sm:$0xff]  ;;  %v779_v21 = vld [vmem:[%s5984_s3 + $0x120] sm:$0xff] }
  0x6d   :  { %554 = vmatpush2.msra.mxu0 %v281_v22  ;;  %625 = vmatpush2.msra.mxu1 %v283_v23  ;;  %v141_v22 = vld [vmem:[%s5982_s1 + $0x358] sm:$0xff]  ;;  %v777_v23 = vld [vmem:[%s5984_s3 + $0x110] sm:$0xff] }
  0x6e   :  { %555 = vmatprep.subr.mxu0 %v273_v24  ;;  %626 = vmatprep.subr.mxu1 %v275_v25  ;;  %v276_v24 = vld [vmem:[%s5982_s1 + $0x790] sm:$0xff]  ;;  %v776_v25 = vld [vmem:[%s5984_s3 + $0x108] sm:$0xff] }
  0x6f   :  { %556 = vmatpush2.msra.mxu0 %v272_v26  ;;  %627 = vmatpush2.msra.mxu1 %v274_v27  ;;  %v132_v26 = vld [vmem:[%s5982_s1 + $0x310] sm:$0xff]  ;;  %v774_v27 = vld [vmem:[%s5984_s3 + $0xf8] sm:$0xff] }
  0x70   :  { %557 = vmatprep.subr.mxu0 %v264_v28  ;;  %628 = vmatprep.subr.mxu1 %v266_v29  ;;  %v267_v28 = vld [vmem:[%s5982_s1 + $0x748] sm:$0xff]  ;;  %v773_v29 = vld [vmem:[%s5984_s3 + $0xf0] sm:$0xff] }
  0x71   :  { %558 = vmatpush2.msra.mxu0 %v263_v30  ;;  %629 = vmatpush2.msra.mxu1 %v265_v31  ;;  %v123_v30 = vld [vmem:[%s5982_s1 + $0x2c8] sm:$0xff]  ;;  %v771_v31 = vld [vmem:[%s5984_s3 + $0xe0] sm:$0xff] }
  0x72   :  { %559 = vmatprep.subr.mxu0 %v255_v32  ;;  %630 = vmatprep.subr.mxu1 %v257_v33  ;;  %v258_v32 = vld [vmem:[%s5982_s1 + $0x700] sm:$0xff]  ;;  %v770_v33 = vld [vmem:[%s5984_s3 + $0xd8] sm:$0xff] }
  0x73   :  { %560 = vmatpush2.msra.mxu0 %v254_v34  ;;  %631 = vmatpush2.msra.mxu1 %v256_v35  ;;  %v114_v34 = vld [vmem:[%s5982_s1 + $0x280] sm:$0xff]  ;;  %v768_v35 = vld [vmem:[%s5984_s3 + $0xc8] sm:$0xff] }
  0x74   :  { %561 = vmatprep.subr.mxu0 %v246_v36  ;;  %632 = vmatprep.subr.mxu1 %v248_v37  ;;  %v249_v36 = vld [vmem:[%s5982_s1 + $0x6b8] sm:$0xff]  ;;  %v767_v37 = vld [vmem:[%s5984_s3 + $0xc0] sm:$0xff] }
  0x75   :  { %562 = vmatpush2.msra.mxu0 %v245_v38  ;;  %633 = vmatpush2.msra.mxu1 %v247_v39  ;;  %v105_v38 = vld [vmem:[%s5982_s1 + $0x238] sm:$0xff]  ;;  %v765_v39 = vld [vmem:[%s5984_s3 + $0xb0] sm:$0xff] }
  0x76   :  { %563 = vmatprep.subr.mxu0 %v237_v40  ;;  %634 = vmatprep.subr.mxu1 %v239_v41  ;;  %v240_v40 = vld [vmem:[%s5982_s1 + $0x670] sm:$0xff]  ;;  %v764_v41 = vld [vmem:[%s5984_s3 + $0xa8] sm:$0xff] }
  0x77   :  { %564 = vmatpush2.msra.mxu0 %v236_v42  ;;  %635 = vmatpush2.msra.mxu1 %v238_v43  ;;  %v96_v42 = vld [vmem:[%s5982_s1 + $0x1f0] sm:$0xff]  ;;  %v762_v43 = vld [vmem:[%s5984_s3 + $0x98] sm:$0xff] }
  0x78   :  { %565 = vmatprep.subr.mxu0 %v228_v44  ;;  %636 = vmatprep.subr.mxu1 %v230_v45  ;;  %v231_v44 = vld [vmem:[%s5982_s1 + $0x628] sm:$0xff]  ;;  %v761_v45 = vld [vmem:[%s5984_s3 + $0x90] sm:$0xff] }
  0x79   :  { %566 = vmatpush2.msra.mxu0 %v227_v46  ;;  %637 = vmatpush2.msra.mxu1 %v229_v47  ;;  %v87_v46 = vld [vmem:[%s5982_s1 + $0x1a8] sm:$0xff]  ;;  %v759_v47 = vld [vmem:[%s5984_s3 + $0x80] sm:$0xff] }
  0x7a   :  { %567 = vmatprep.subr.mxu0 %v219_v48  ;;  %638 = vmatprep.subr.mxu1 %v221_v49  ;;  %v222_v48 = vld [vmem:[%s5982_s1 + $0x5e0] sm:$0xff]  ;;  %v758_v49 = vld [vmem:[%s5984_s3 + $0x78] sm:$0xff] }
  0x7b   :  { %568 = vmatpush2.msra.mxu0 %v218_v50  ;;  %639 = vmatpush2.msra.mxu1 %v220_v51  ;;  %v78_v50 = vld [vmem:[%s5982_s1 + $0x160] sm:$0xff]  ;;  %v756_v51 = vld [vmem:[%s5984_s3 + $0x68] sm:$0xff] }
  0x7c   :  { %569 = vmatprep.subr.mxu0 %v210_v52  ;;  %640 = vmatprep.subr.mxu1 %v212_v53  ;;  %v213_v52 = vld [vmem:[%s5982_s1 + $0x598] sm:$0xff]  ;;  %v755_v53 = vld [vmem:[%s5984_s3 + $0x60] sm:$0xff] }
  0x7d   :  { %570 = vmatpush2.msra.mxu0 %v209_v54  ;;  %641 = vmatpush2.msra.mxu1 %v211_v55  ;;  %v69_v54 = vld [vmem:[%s5982_s1 + $0x118] sm:$0xff]  ;;  %v753_v55 = vld [vmem:[%s5984_s3 + $0x50] sm:$0xff] }
  0x7e   :  { %571 = vmatprep.subr.mxu0 %v201_v56  ;;  %642 = vmatprep.subr.mxu1 %v203_v57  ;;  %v204_v56 = vld [vmem:[%s5982_s1 + $0x550] sm:$0xff]  ;;  %v752_v57 = vld [vmem:[%s5984_s3 + $0x48] sm:$0xff] }
  0x7f   :  { %572 = vmatpush2.msra.mxu0 %v200_v58  ;;  %643 = vmatpush2.msra.mxu1 %v202_v59  ;;  %v60_v58 = vld [vmem:[%s5982_s1 + $0xd0] sm:$0xff]  ;;  %v750_v59 = vld [vmem:[%s5984_s3 + $0x38] sm:$0xff] }
  0x80   :  { %573 = vmatprep.subr.mxu0 %v192_v60  ;;  %644 = vmatprep.subr.mxu1 %v194_v61  ;;  %v195_v60 = vld [vmem:[%s5982_s1 + $0x508] sm:$0xff]  ;;  %v749_v61 = vld [vmem:[%s5984_s3 + $0x30] sm:$0xff] }
  0x81   :  { %574 = vmatpush2.msra.mxu0 %v191_v62  ;;  %645 = vmatpush2.msra.mxu1 %v193_v0  ;;  %v51_v62 = vld [vmem:[%s5982_s1 + $0x88] sm:$0xff]  ;;  %v747_v0 = vld [vmem:[%s5984_s3 + $0x20] sm:$0xff] }
  0x82   :  { %575 = vmatprep.subr.mxu0 %v183_v2  ;;  %646 = vmatprep.subr.mxu1 %v185_v3  ;;  %v186_v2 = vld [vmem:[%s5982_s1 + $0x4c0] sm:$0xff]  ;;  %v746_v3 = vld [vmem:[%s5984_s3 + $0x18] sm:$0xff] }
  0x83   :  { %576 = vmatpush2.msra.mxu0 %v182_v4  ;;  %577 = vmatprep.mubr.f32.mxu0 %v3419_v63  ;;  %v42_v4 = vld [vmem:[%s5982_s1 + $0x40] sm:$0xff] }
  0x84   :  { %647 = vmatpush2.msra.mxu1 %v184_v5  ;;  %648 = vmatprep.mubr.f32.mxu1 %v3419_v63  ;;  %v744_v5 = vld [vmem:[%s5984_s3 + $0x8] sm:$0xff] }
  0x85   :  { %578 = vmatmul.mubr.f32.vlgmr.msra.gmra.mxu0 %v3427_v1  ;;  %649 = vmatmul.mubr.f32.vlgmr.msra.gmra.mxu1 %v3427_v1 }
  0x86   :  { %2576 = vmatprep.subr.mxu0 %v321_v6  ;;  %719 = vmatprep.mubr.f32.mxu0 %v3419_v63  ;;  %v783_v63 = vld [vmem:[%s5984_s3 + $0x140] sm:$0xff]  ;;  %v885_v6 = vld [vmem:[%s5984_s3 + $0x470] sm:$0xff] }
  0x87   :  { %2577 = vmatpush3.msra.mxu0 %v177_v7  ;;  %1192 = vmatprep.subr.mxu1 %v789_v8  ;;  %v884_v7 = vld [vmem:[%s5984_s3 + $0x468] sm:$0xff]  ;;  %v743_v8 = vld [vmem:[%s5984_s3] sm:$0xff] }
  0x88   :  { %2578 = vmatprep.subr.mxu0 %v312_v9  ;;  %1193 = vmatpush1.msra.mxu1 %v788_v10  ;;  %v882_v9 = vld [vmem:[%s5984_s3 + $0x458] sm:$0xff]  ;;  %v837_v10 = vld [vmem:[%s5984_s3 + $0x2f0] sm:$0xff] }
  0x89   :  { %2579 = vmatpush3.msra.mxu0 %v168_v11  ;;  %1194 = vmatprep.subr.mxu1 %v786_v12  ;;  %v881_v11 = vld [vmem:[%s5984_s3 + $0x450] sm:$0xff]  ;;  %v836_v12 = vld [vmem:[%s5984_s3 + $0x2e8] sm:$0xff] }
  0x8a   :  { %2580 = vmatprep.subr.mxu0 %v303_v13  ;;  %1195 = vmatpush1.msra.mxu1 %v785_v14  ;;  %v879_v13 = vld [vmem:[%s5984_s3 + $0x440] sm:$0xff]  ;;  %v834_v14 = vld [vmem:[%s5984_s3 + $0x2d8] sm:$0xff] }
  0x8b   :  { %2581 = vmatpush3.msra.mxu0 %v159_v15  ;;  %1196 = vmatprep.subr.mxu1 %v783_v63  ;;  %v833_v15 = vld [vmem:[%s5984_s3 + $0x2d0] sm:$0xff]  ;;  %v876_v63 = vld [vmem:[%s5984_s3 + $0x428] sm:$0xff] }
  0x8c   :  { %2582 = vmatprep.subr.mxu0 %v294_v16  ;;  %1197 = vmatpush1.msra.mxu1 %v782_v17  ;;  %v831_v16 = vld [vmem:[%s5984_s3 + $0x2c0] sm:$0xff] }
  0x8d   :  { %2583 = vmatpush3.msra.mxu0 %v150_v18  ;;  %1198 = vmatprep.subr.mxu1 %v780_v19  ;;  %v875_v17 = vld [vmem:[%s5984_s3 + $0x420] sm:$0xff]  ;;  %v830_v18 = vld [vmem:[%s5984_s3 + $0x2b8] sm:$0xff]  ;;  %v873_v19 = vld [vmem:[%s5984_s3 + $0x410] sm:$0xff] }
  0x8e   :  { %2584 = vmatprep.subr.mxu0 %v285_v20  ;;  %1199 = vmatpush1.msra.mxu1 %v779_v21  ;;  %v828_v20 = vld [vmem:[%s5984_s3 + $0x2a8] sm:$0xff] }
  0x8f   :  { %2585 = vmatpush3.msra.mxu0 %v141_v22  ;;  %1200 = vmatprep.subr.mxu1 %v777_v23  ;;  %v872_v21 = vld [vmem:[%s5984_s3 + $0x408] sm:$0xff]  ;;  %v827_v22 = vld [vmem:[%s5984_s3 + $0x2a0] sm:$0xff]  ;;  %v870_v23 = vld [vmem:[%s5984_s3 + $0x3f8] sm:$0xff] }
  0x90   :  { %2586 = vmatprep.subr.mxu0 %v276_v24  ;;  %1201 = vmatpush1.msra.mxu1 %v776_v25  ;;  %v825_v24 = vld [vmem:[%s5984_s3 + $0x290] sm:$0xff] }
  0x91   :  { %2587 = vmatpush3.msra.mxu0 %v132_v26  ;;  %1202 = vmatprep.subr.mxu1 %v774_v27  ;;  %v869_v25 = vld [vmem:[%s5984_s3 + $0x3f0] sm:$0xff]  ;;  %v824_v26 = vld [vmem:[%s5984_s3 + $0x288] sm:$0xff]  ;;  %v867_v27 = vld [vmem:[%s5984_s3 + $0x3e0] sm:$0xff] }
  0x92   :  { %2588 = vmatprep.subr.mxu0 %v267_v28  ;;  %1203 = vmatpush1.msra.mxu1 %v773_v29  ;;  %v822_v28 = vld [vmem:[%s5984_s3 + $0x278] sm:$0xff] }
  0x93   :  { %2589 = vmatpush3.msra.mxu0 %v123_v30  ;;  %1204 = vmatprep.subr.mxu1 %v771_v31  ;;  %v866_v29 = vld [vmem:[%s5984_s3 + $0x3d8] sm:$0xff]  ;;  %v821_v30 = vld [vmem:[%s5984_s3 + $0x270] sm:$0xff]  ;;  %v864_v31 = vld [vmem:[%s5984_s3 + $0x3c8] sm:$0xff] }
  0x94   :  { %2590 = vmatprep.subr.mxu0 %v258_v32  ;;  %1205 = vmatpush1.msra.mxu1 %v770_v33  ;;  %v819_v32 = vld [vmem:[%s5984_s3 + $0x260] sm:$0xff] }
  0x95   :  { %2591 = vmatpush3.msra.mxu0 %v114_v34  ;;  %1206 = vmatprep.subr.mxu1 %v768_v35  ;;  %v863_v33 = vld [vmem:[%s5984_s3 + $0x3c0] sm:$0xff]  ;;  %v818_v34 = vld [vmem:[%s5984_s3 + $0x258] sm:$0xff]  ;;  %v861_v35 = vld [vmem:[%s5984_s3 + $0x3b0] sm:$0xff] }
  0x96   :  { %2592 = vmatprep.subr.mxu0 %v249_v36  ;;  %1207 = vmatpush1.msra.mxu1 %v767_v37  ;;  %v816_v36 = vld [vmem:[%s5984_s3 + $0x248] sm:$0xff] }
  0x97   :  { %2593 = vmatpush3.msra.mxu0 %v105_v38  ;;  %1208 = vmatprep.subr.mxu1 %v765_v39  ;;  %v860_v37 = vld [vmem:[%s5984_s3 + $0x3a8] sm:$0xff]  ;;  %v815_v38 = vld [vmem:[%s5984_s3 + $0x240] sm:$0xff]  ;;  %v858_v39 = vld [vmem:[%s5984_s3 + $0x398] sm:$0xff] }
  0x98   :  { %2594 = vmatprep.subr.mxu0 %v240_v40  ;;  %1209 = vmatpush1.msra.mxu1 %v764_v41  ;;  %v813_v40 = vld [vmem:[%s5984_s3 + $0x230] sm:$0xff] }
  0x99   :  { %2595 = vmatpush3.msra.mxu0 %v96_v42  ;;  %1210 = vmatprep.subr.mxu1 %v762_v43  ;;  %v857_v41 = vld [vmem:[%s5984_s3 + $0x390] sm:$0xff]  ;;  %v812_v42 = vld [vmem:[%s5984_s3 + $0x228] sm:$0xff]  ;;  %v855_v43 = vld [vmem:[%s5984_s3 + $0x380] sm:$0xff] }
  0x9a   :  { %2596 = vmatprep.subr.mxu0 %v231_v44  ;;  %1211 = vmatpush1.msra.mxu1 %v761_v45  ;;  %v810_v44 = vld [vmem:[%s5984_s3 + $0x218] sm:$0xff] }
  0x9b   :  { %2597 = vmatpush3.msra.mxu0 %v87_v46  ;;  %1212 = vmatprep.subr.mxu1 %v759_v47  ;;  %v854_v45 = vld [vmem:[%s5984_s3 + $0x378] sm:$0xff]  ;;  %v809_v46 = vld [vmem:[%s5984_s3 + $0x210] sm:$0xff]  ;;  %v852_v47 = vld [vmem:[%s5984_s3 + $0x368] sm:$0xff] }
  0x9c   :  { %2598 = vmatprep.subr.mxu0 %v222_v48  ;;  %1213 = vmatpush1.msra.mxu1 %v758_v49  ;;  %v807_v48 = vld [vmem:[%s5984_s3 + $0x200] sm:$0xff] }
  0x9d   :  { %2599 = vmatpush3.msra.mxu0 %v78_v50  ;;  %1214 = vmatprep.subr.mxu1 %v756_v51  ;;  %v851_v49 = vld [vmem:[%s5984_s3 + $0x360] sm:$0xff]  ;;  %v806_v50 = vld [vmem:[%s5984_s3 + $0x1f8] sm:$0xff]  ;;  %v849_v51 = vld [vmem:[%s5984_s3 + $0x350] sm:$0xff] }
  0x9e   :  { %2600 = vmatprep.subr.mxu0 %v213_v52  ;;  %1215 = vmatpush1.msra.mxu1 %v755_v53  ;;  %v804_v52 = vld [vmem:[%s5984_s3 + $0x1e8] sm:$0xff] }
  0x9f   :  { %2601 = vmatpush3.msra.mxu0 %v69_v54  ;;  %1216 = vmatprep.subr.mxu1 %v753_v55  ;;  %v848_v53 = vld [vmem:[%s5984_s3 + $0x348] sm:$0xff]  ;;  %v803_v54 = vld [vmem:[%s5984_s3 + $0x1e0] sm:$0xff]  ;;  %v846_v55 = vld [vmem:[%s5984_s3 + $0x338] sm:$0xff] }
  0xa0   :  { %2602 = vmatprep.subr.mxu0 %v204_v56  ;;  %1217 = vmatpush1.msra.mxu1 %v752_v57  ;;  %v801_v56 = vld [vmem:[%s5984_s3 + $0x1d0] sm:$0xff] }
  0xa1   :  { %2603 = vmatpush3.msra.mxu0 %v60_v58  ;;  %1218 = vmatprep.subr.mxu1 %v750_v59  ;;  %v845_v57 = vld [vmem:[%s5984_s3 + $0x330] sm:$0xff]  ;;  %v800_v58 = vld [vmem:[%s5984_s3 + $0x1c8] sm:$0xff]  ;;  %v843_v59 = vld [vmem:[%s5984_s3 + $0x320] sm:$0xff] }
  0xa2   :  { %2604 = vmatprep.subr.mxu0 %v195_v60  ;;  %1219 = vmatpush1.msra.mxu1 %v749_v61  ;;  %v798_v60 = vld [vmem:[%s5984_s3 + $0x1b8] sm:$0xff] }
  0xa3   :  { %2605 = vmatpush3.msra.mxu0 %v51_v62  ;;  %1220 = vmatprep.subr.mxu1 %v747_v0  ;;  %v842_v61 = vld [vmem:[%s5984_s3 + $0x318] sm:$0xff]  ;;  %v797_v62 = vld [vmem:[%s5984_s3 + $0x1b0] sm:$0xff]  ;;  %v840_v0 = vld [vmem:[%s5984_s3 + $0x308] sm:$0xff] }
  0xa4   :  { %2606 = vmatprep.subr.mxu0 %v186_v2  ;;  %1221 = vmatpush1.msra.mxu1 %v746_v3  ;;  %v795_v2 = vld [vmem:[%s5984_s3 + $0x1a0] sm:$0xff] }
  0xa5   :  { %2607 = vmatpush3.msra.mxu0 %v42_v4  ;;  %1222 = vmatprep.subr.mxu1 %v744_v5  ;;  %v839_v3 = vld [vmem:[%s5984_s3 + $0x300] sm:$0xff]  ;;  %v794_v4 = vld [vmem:[%s5984_s3 + $0x198] sm:$0xff]  ;;  %v933_v5 = vld [vmem:[%s5984_s3 + $0x5f0] sm:$0xff] }
  0xa6   :  { %720 = vmatmul.mubr.f32.vlgmr.msra.gmra.mxu0 %v3427_v1  ;;  %1263 = vmatprep.subr.mxu0 %v885_v6  ;;  %v878_v1 = vld [vmem:[%s5984_s3 + $0x438] sm:$0xff]  ;;  %v792_v6 = vld [vmem:[%s5984_s3 + $0x188] sm:$0xff] }
  0xa7   :  { %1264 = vmatpush1.msra.mxu0 %v884_v7  ;;  %1223 = vmatpush1.msra.mxu1 %v743_v8  ;;  %v932_v7 = vld [vmem:[%s5984_s3 + $0x5e8] sm:$0xff]  ;;  %v791_v8 = vld [vmem:[%s5984_s3 + $0x180] sm:$0xff] }
  0xa8   :  { %1265 = vmatprep.subr.mxu0 %v882_v9  ;;  %1224 = vmatprep.subr.mxu1 %v837_v10  ;;  %v930_v9 = vld [vmem:[%s5984_s3 + $0x5d8] sm:$0xff]  ;;  %v981_v10 = vld [vmem:[%s5984_s3 + $0x770] sm:$0xff] }
  0xa9   :  { %1266 = vmatpush1.msra.mxu0 %v881_v11  ;;  %1225 = vmatpush2.msra.mxu1 %v836_v12  ;;  %v929_v11 = vld [vmem:[%s5984_s3 + $0x5d0] sm:$0xff]  ;;  %v927_v12 = vld [vmem:[%s5984_s3 + $0x5c0] sm:$0xff] }
  0xaa   :  { %1267 = vmatprep.subr.mxu0 %v879_v13  ;;  %1226 = vmatprep.subr.mxu1 %v834_v14  ;;  %v926_v13 = vld [vmem:[%s5984_s3 + $0x5b8] sm:$0xff]  ;;  %v924_v14 = vld [vmem:[%s5984_s3 + $0x5a8] sm:$0xff] }
  0xab   :  { %1268 = vmatpush1.msra.mxu0 %v878_v1  ;;  %1227 = vmatpush2.msra.mxu1 %v833_v15  ;;  %v923_v1 = vld [vmem:[%s5984_s3 + $0x5a0] sm:$0xff]  ;;  %v921_v15 = vld [vmem:[%s5984_s3 + $0x590] sm:$0xff] }
  0xac   :  { %1269 = vmatprep.subr.mxu0 %v876_v63  ;;  %1228 = vmatprep.subr.mxu1 %v831_v16  ;;  %v920_v63 = vld [vmem:[%s5984_s3 + $0x588] sm:$0xff]  ;;  %v918_v16 = vld [vmem:[%s5984_s3 + $0x578] sm:$0xff] }
  0xad   :  { %1270 = vmatpush1.msra.mxu0 %v875_v17  ;;  %1229 = vmatpush2.msra.mxu1 %v830_v18  ;;  %v917_v17 = vld [vmem:[%s5984_s3 + $0x570] sm:$0xff]  ;;  %v915_v18 = vld [vmem:[%s5984_s3 + $0x560] sm:$0xff] }
  0xae   :  { %1271 = vmatprep.subr.mxu0 %v873_v19  ;;  %1230 = vmatprep.subr.mxu1 %v828_v20  ;;  %v914_v19 = vld [vmem:[%s5984_s3 + $0x558] sm:$0xff]  ;;  %v912_v20 = vld [vmem:[%s5984_s3 + $0x548] sm:$0xff] }
  0xaf   :  { %1272 = vmatpush1.msra.mxu0 %v872_v21  ;;  %1231 = vmatpush2.msra.mxu1 %v827_v22  ;;  %v911_v21 = vld [vmem:[%s5984_s3 + $0x540] sm:$0xff]  ;;  %v909_v22 = vld [vmem:[%s5984_s3 + $0x530] sm:$0xff] }
  0xb0   :  { %1273 = vmatprep.subr.mxu0 %v870_v23  ;;  %1232 = vmatprep.subr.mxu1 %v825_v24  ;;  %v908_v23 = vld [vmem:[%s5984_s3 + $0x528] sm:$0xff]  ;;  %v906_v24 = vld [vmem:[%s5984_s3 + $0x518] sm:$0xff] }
  0xb1   :  { %1274 = vmatpush1.msra.mxu0 %v869_v25  ;;  %1233 = vmatpush2.msra.mxu1 %v824_v26  ;;  %v905_v25 = vld [vmem:[%s5984_s3 + $0x510] sm:$0xff]  ;;  %v903_v26 = vld [vmem:[%s5984_s3 + $0x500] sm:$0xff] }
  0xb2   :  { %1275 = vmatprep.subr.mxu0 %v867_v27  ;;  %1234 = vmatprep.subr.mxu1 %v822_v28  ;;  %v902_v27 = vld [vmem:[%s5984_s3 + $0x4f8] sm:$0xff]  ;;  %v900_v28 = vld [vmem:[%s5984_s3 + $0x4e8] sm:$0xff] }
  0xb3   :  { %1276 = vmatpush1.msra.mxu0 %v866_v29  ;;  %1235 = vmatpush2.msra.mxu1 %v821_v30  ;;  %v899_v29 = vld [vmem:[%s5984_s3 + $0x4e0] sm:$0xff]  ;;  %v897_v30 = vld [vmem:[%s5984_s3 + $0x4d0] sm:$0xff] }
  0xb4   :  { %1277 = vmatprep.subr.mxu0 %v864_v31  ;;  %1236 = vmatprep.subr.mxu1 %v819_v32  ;;  %v896_v31 = vld [vmem:[%s5984_s3 + $0x4c8] sm:$0xff]  ;;  %v894_v32 = vld [vmem:[%s5984_s3 + $0x4b8] sm:$0xff] }
  0xb5   :  { %1278 = vmatpush1.msra.mxu0 %v863_v33  ;;  %1237 = vmatpush2.msra.mxu1 %v818_v34  ;;  %v893_v33 = vld [vmem:[%s5984_s3 + $0x4b0] sm:$0xff]  ;;  %v891_v34 = vld [vmem:[%s5984_s3 + $0x4a0] sm:$0xff] }
  0xb6   :  { %1279 = vmatprep.subr.mxu0 %v861_v35  ;;  %1238 = vmatprep.subr.mxu1 %v816_v36  ;;  %v890_v35 = vld [vmem:[%s5984_s3 + $0x498] sm:$0xff]  ;;  %v888_v36 = vld [vmem:[%s5984_s3 + $0x488] sm:$0xff] }
  0xb7   :  { %1280 = vmatpush1.msra.mxu0 %v860_v37  ;;  %1239 = vmatpush2.msra.mxu1 %v815_v38  ;;  %v887_v37 = vld [vmem:[%s5984_s3 + $0x480] sm:$0xff]  ;;  %v1077_v38 = vld [vmem:[%s5984_s3 + $0xa70] sm:$0xff] }
  0xb8   :  { %1281 = vmatprep.subr.mxu0 %v858_v39  ;;  %1240 = vmatprep.subr.mxu1 %v813_v40  ;;  %v326_v39 = vlaneseq }
  0xb9   :  { %1282 = vmatpush1.msra.mxu0 %v857_v41  ;;  %1241 = vmatpush2.msra.mxu1 %v812_v42 }
  0xba   :  { %1283 = vmatprep.subr.mxu0 %v855_v43  ;;  %1242 = vmatprep.subr.mxu1 %v810_v44  ;;  %v4309_v40 = vshrl.u32 %v326_v39, 7  ;;  %v4320_v43 = vld [vmem:[%s5985_s2] sm:$0xff]  ;;  %v950_v39 = vld [vmem:[%s5984_s3 + $0x678] sm:$0xff] }
  0xbb   :  { %1284 = vmatpush1.msra.mxu0 %v854_v45  ;;  %1243 = vmatpush2.msra.mxu1 %v809_v46 }
  0xbc   :  { %1285 = vmatprep.subr.mxu0 %v852_v47  ;;  %1244 = vmatprep.subr.mxu1 %v807_v48  ;;  %v4312_v41 = vsub.s32 2, %v4309_v40  ;;  %v4315_v42 = vsub.s32 0, %v4309_v40  ;;  %v4323_v44 = vsub.s32 1, %v4309_v40  ;;  %v340_v45 = vsub.s32 3, %v4309_v40 }
  0xbd   :  { %1286 = vmatpush1.msra.mxu0 %v851_v49  ;;  %1245 = vmatpush2.msra.mxu1 %v806_v50 }
  0xbe   :  { %1287 = vmatprep.subr.mxu0 %v849_v51  ;;  %1246 = vmatprep.subr.mxu1 %v804_v52  ;;  %v337_v46 = vrot.slane %v4320_v43, %v4312_v41  ;;  %v329_v47 = vrot.slane %v4320_v43, %v4315_v42  ;;  %v333_v48 = vrot.slane %v4320_v43, %v4323_v44 }
  0xbf   :  { %1288 = vmatpush1.msra.mxu0 %v848_v53  ;;  %1247 = vmatpush2.msra.mxu1 %v803_v54  ;;  %v341_v49 = vrot.slane %v4320_v43, %v340_v45  ;;  %v1044_v45 = vld [vmem:[%s5984_s3 + $0x968] sm:$0xff] }
  0xc0   :  { %1289 = vmatprep.subr.mxu0 %v846_v55  ;;  %1248 = vmatprep.subr.mxu1 %v801_v56 }
  0xc1   :  { %1290 = vmatpush1.msra.mxu0 %v845_v57  ;;  %1249 = vmatpush2.msra.mxu1 %v800_v58 }
  0xc2   :  { %1291 = vmatprep.subr.mxu0 %v843_v59  ;;  %1250 = vmatprep.subr.mxu1 %v798_v60 }
  0xc3   :  { %1292 = vmatpush1.msra.mxu0 %v842_v61  ;;  %1251 = vmatpush2.msra.mxu1 %v797_v62  ;;  %v1076_v62 = vld [vmem:[%s5984_s3 + $0xa68] sm:$0xff] }
  0xc4   :  { %1293 = vmatprep.subr.mxu0 %v840_v0  ;;  %1252 = vmatprep.subr.mxu1 %v795_v2  ;;  %v980_v0 = vld [vmem:[%s5984_s3 + $0x768] sm:$0xff]  ;;  %v1074_v2 = vld [vmem:[%s5984_s3 + $0xa58] sm:$0xff] }
  0xc5   :  { %1294 = vmatpush1.msra.mxu0 %v839_v3  ;;  %1253 = vmatpush2.msra.mxu1 %v794_v4  ;;  %v978_v3 = vld [vmem:[%s5984_s3 + $0x758] sm:$0xff]  ;;  %v1073_v4 = vld [vmem:[%s5984_s3 + $0xa50] sm:$0xff] }
  0xc6   :  { %1295 = vmatprep.subr.mxu0 %v933_v5  ;;  %1254 = vmatprep.subr.mxu1 %v792_v6  ;;  %v977_v5 = vld [vmem:[%s5984_s3 + $0x750] sm:$0xff]  ;;  %v1071_v6 = vld [vmem:[%s5984_s3 + $0xa40] sm:$0xff] }
  0xc7   :  { %1296 = vmatpush2.msra.mxu0 %v932_v7  ;;  %1255 = vmatpush2.msra.mxu1 %v791_v8  ;;  %v975_v7 = vld [vmem:[%s5984_s3 + $0x740] sm:$0xff]  ;;  %v1070_v8 = vld [vmem:[%s5984_s3 + $0xa38] sm:$0xff] }
  0xc8   :  { %1297 = vmatprep.subr.mxu0 %v930_v9  ;;  %1334 = vmatprep.subr.mxu1 %v981_v10  ;;  %v974_v9 = vld [vmem:[%s5984_s3 + $0x738] sm:$0xff]  ;;  %v1068_v10 = vld [vmem:[%s5984_s3 + $0xa28] sm:$0xff] }
  0xc9   :  { %1298 = vmatpush2.msra.mxu0 %v929_v11  ;;  %v972_v11 = vld [vmem:[%s5984_s3 + $0x728] sm:$0xff] }
  0xca   :  { %1299 = vmatprep.subr.mxu0 %v927_v12  ;;  %v1067_v12 = vld [vmem:[%s5984_s3 + $0xa20] sm:$0xff] }
  0xcb   :  { %1300 = vmatpush2.msra.mxu0 %v926_v13  ;;  %v971_v13 = vld [vmem:[%s5984_s3 + $0x720] sm:$0xff] }
  0xcc   :  { %1301 = vmatprep.subr.mxu0 %v924_v14  ;;  %v1065_v14 = vld [vmem:[%s5984_s3 + $0xa10] sm:$0xff] }
  0xcd   :  { %1302 = vmatpush2.msra.mxu0 %v923_v1  ;;  %v969_v1 = vld [vmem:[%s5984_s3 + $0x710] sm:$0xff] }
  0xce   :  { %1303 = vmatprep.subr.mxu0 %v921_v15  ;;  %v1064_v15 = vld [vmem:[%s5984_s3 + $0xa08] sm:$0xff] }
  0xcf   :  { %1304 = vmatpush2.msra.mxu0 %v920_v63  ;;  %v968_v63 = vld [vmem:[%s5984_s3 + $0x708] sm:$0xff] }
  0xd0   :  { %1305 = vmatprep.subr.mxu0 %v918_v16  ;;  %v1062_v16 = vld [vmem:[%s5984_s3 + $0x9f8] sm:$0xff] }
  0xd1   :  { %1306 = vmatpush2.msra.mxu0 %v917_v17  ;;  %v966_v17 = vld [vmem:[%s5984_s3 + $0x6f8] sm:$0xff] }
  0xd2   :  { %1307 = vmatprep.subr.mxu0 %v915_v18  ;;  %v1061_v18 = vld [vmem:[%s5984_s3 + $0x9f0] sm:$0xff] }
  0xd3   :  { %1308 = vmatpush2.msra.mxu0 %v914_v19  ;;  %v965_v19 = vld [vmem:[%s5984_s3 + $0x6f0] sm:$0xff] }
  0xd4   :  { %1309 = vmatprep.subr.mxu0 %v912_v20  ;;  %v1059_v20 = vld [vmem:[%s5984_s3 + $0x9e0] sm:$0xff] }
  0xd5   :  { %1310 = vmatpush2.msra.mxu0 %v911_v21  ;;  %v963_v21 = vld [vmem:[%s5984_s3 + $0x6e0] sm:$0xff] }
  0xd6   :  { %1311 = vmatprep.subr.mxu0 %v909_v22  ;;  %v1058_v22 = vld [vmem:[%s5984_s3 + $0x9d8] sm:$0xff] }
  0xd7   :  { %1312 = vmatpush2.msra.mxu0 %v908_v23  ;;  %v962_v23 = vld [vmem:[%s5984_s3 + $0x6d8] sm:$0xff] }
  0xd8   :  { %1313 = vmatprep.subr.mxu0 %v906_v24  ;;  %v1056_v24 = vld [vmem:[%s5984_s3 + $0x9c8] sm:$0xff] }
  0xd9   :  { %1314 = vmatpush2.msra.mxu0 %v905_v25  ;;  %v960_v25 = vld [vmem:[%s5984_s3 + $0x6c8] sm:$0xff] }
  0xda   :  { %1315 = vmatprep.subr.mxu0 %v903_v26  ;;  %v1055_v26 = vld [vmem:[%s5984_s3 + $0x9c0] sm:$0xff] }
  0xdb   :  { %1316 = vmatpush2.msra.mxu0 %v902_v27  ;;  %v959_v27 = vld [vmem:[%s5984_s3 + $0x6c0] sm:$0xff] }
  0xdc   :  { %1317 = vmatprep.subr.mxu0 %v900_v28  ;;  %v1053_v28 = vld [vmem:[%s5984_s3 + $0x9b0] sm:$0xff] }
  0xdd   :  { %1318 = vmatpush2.msra.mxu0 %v899_v29  ;;  %v957_v29 = vld [vmem:[%s5984_s3 + $0x6b0] sm:$0xff] }
  0xde   :  { %1319 = vmatprep.subr.mxu0 %v897_v30  ;;  %v1052_v30 = vld [vmem:[%s5984_s3 + $0x9a8] sm:$0xff] }
  0xdf   :  { %1320 = vmatpush2.msra.mxu0 %v896_v31  ;;  %v956_v31 = vld [vmem:[%s5984_s3 + $0x6a8] sm:$0xff] }
  0xe0   :  { %1321 = vmatprep.subr.mxu0 %v894_v32  ;;  %v1050_v32 = vld [vmem:[%s5984_s3 + $0x998] sm:$0xff] }
  0xe1   :  { %1322 = vmatpush2.msra.mxu0 %v893_v33  ;;  %v954_v33 = vld [vmem:[%s5984_s3 + $0x698] sm:$0xff] }
  0xe2   :  { %1323 = vmatprep.subr.mxu0 %v891_v34  ;;  %v1049_v34 = vld [vmem:[%s5984_s3 + $0x990] sm:$0xff] }
  0xe3   :  { %1324 = vmatpush2.msra.mxu0 %v890_v35  ;;  %v953_v35 = vld [vmem:[%s5984_s3 + $0x690] sm:$0xff] }
  0xe4   :  { %1325 = vmatprep.subr.mxu0 %v888_v36  ;;  %v1047_v36 = vld [vmem:[%s5984_s3 + $0x980] sm:$0xff] }
  0xe5   :  { %1326 = vmatpush2.msra.mxu0 %v887_v37  ;;  %v951_v37 = vld [vmem:[%s5984_s3 + $0x680] sm:$0xff] }
  0xe6   :  { %1405 = vmatprep.subr.mxu0 %v1077_v38  ;;  %v1046_v38 = vld [vmem:[%s5984_s3 + $0x978] sm:$0xff] }
 0x103   :  { %v437_v50 = vpop.f32.mrf.mxu0  ;;  %v508_v51 = vpop.f32.mrf.mxu1 }
 0x104   :  { %v4333_v52 = vadd.f32 %v508_v51, %v337_v46  ;;  %v4335_v53 = vadd.f32 %v437_v50, %v329_v47  ;;  %v948_v46 = vld [vmem:[%s5984_s3 + $0x668] sm:$0xff]  ;;  %v1043_v47 = vld [vmem:[%s5984_s3 + $0x960] sm:$0xff]  ;;  %v945_v50 = vld [vmem:[%s5984_s3 + $0x650] sm:$0xff] }
 0x105   :  { %v439_v54 = vpop.f32.mrf.mxu0  ;;  %v510_v55 = vpop.f32.mrf.mxu1  ;;  %v1040_v51 = vld [vmem:[%s5984_s3 + $0x948] sm:$0xff] }
 0x106   :  { %v4337_v56 = vadd.f32 %v439_v54, %v333_v48  ;;  %v4339_v57 = vadd.f32 %v510_v55, %v341_v49  ;;  %v2561_v58 = vclamps-f32 %v4333_v52, 1.0  ;;  %v2559_v61 = vclamps-f32 %v4335_v53, 1.0  ;;  %v947_v48 = vld [vmem:[%s5984_s3 + $0x660] sm:$0xff]  ;;  %v1041_v49 = vld [vmem:[%s5984_s3 + $0x950] sm:$0xff]  ;;  %v944_v54 = vld [vmem:[%s5984_s3 + $0x648] sm:$0xff] }
 0x107   :  { %v1038_v55 = vld [vmem:[%s5984_s3 + $0x938] sm:$0xff]  ;;  %v979_v53 = vld [vmem:[%s5984_s3 + $0x760] sm:$0xff]  ;;  %v1120_v52 = vld [vmem:[%s5984_s3 + $0xbc8] sm:$0xff] }
 0x108   :  { %v2560_v59 = vclamps-f32 %v4337_v56, 1.0  ;;  %v2562_v60 = vclamps-f32 %v4339_v57, 1.0  ;;  %v1164_v56 = vld [vmem:[%s5984_s3 + $0xd28] sm:$0xff]  ;;  %v973_v57 = vld [vmem:[%s5984_s3 + $0x730] sm:$0xff] }
 0x10a   :  { %1256 = vmatprep.mubr.f32.mxu1 %v2560_v59  ;;  %1327 = vmatprep.mubr.f32.mxu0 %v2562_v60 }
 0x10b   :  { %1257 = vmatmul.mubr.f32.vlgmr.msra.gmra.mxu1 %v2559_v61  ;;  %1328 = vmatmul.mubr.f32.vlgmr.msra.gmra.mxu0 %v2561_v58 }
 0x10c   :  { %1406 = vmatpush1.msra.mxu0 %v1076_v62  ;;  %1335 = vmatpush1.msra.mxu1 %v980_v0  ;;  %v942_v62 = vld [vmem:[%s5984_s3 + $0x638] sm:$0xff]  ;;  %v1037_v0 = vld [vmem:[%s5984_s3 + $0x930] sm:$0xff] }
 0x10d   :  { %1407 = vmatprep.subr.mxu0 %v1074_v2  ;;  %1336 = vmatprep.subr.mxu1 %v978_v3  ;;  %v941_v2 = vld [vmem:[%s5984_s3 + $0x630] sm:$0xff]  ;;  %v1035_v3 = vld [vmem:[%s5984_s3 + $0x920] sm:$0xff] }
 0x10e   :  { %1408 = vmatpush1.msra.mxu0 %v1073_v4  ;;  %1337 = vmatpush1.msra.mxu1 %v977_v5  ;;  %v939_v4 = vld [vmem:[%s5984_s3 + $0x620] sm:$0xff]  ;;  %v1034_v5 = vld [vmem:[%s5984_s3 + $0x918] sm:$0xff] }
 0x10f   :  { %1409 = vmatprep.subr.mxu0 %v1071_v6  ;;  %1338 = vmatprep.subr.mxu1 %v975_v7  ;;  %v938_v6 = vld [vmem:[%s5984_s3 + $0x618] sm:$0xff]  ;;  %v1032_v7 = vld [vmem:[%s5984_s3 + $0x908] sm:$0xff] }
 0x110   :  { %1410 = vmatpush1.msra.mxu0 %v1070_v8  ;;  %1339 = vmatpush1.msra.mxu1 %v974_v9  ;;  %v936_v8 = vld [vmem:[%s5984_s3 + $0x608] sm:$0xff]  ;;  %v1031_v9 = vld [vmem:[%s5984_s3 + $0x900] sm:$0xff] }
 0x111   :  { %1411 = vmatprep.subr.mxu0 %v1068_v10  ;;  %1340 = vmatprep.subr.mxu1 %v972_v11  ;;  %v935_v10 = vld [vmem:[%s5984_s3 + $0x600] sm:$0xff]  ;;  %v1125_v11 = vld [vmem:[%s5984_s3 + $0xbf0] sm:$0xff] }
 0x112   :  { %1412 = vmatpush1.msra.mxu0 %v1067_v12  ;;  %1341 = vmatpush1.msra.mxu1 %v971_v13  ;;  %v1029_v12 = vld [vmem:[%s5984_s3 + $0x8f0] sm:$0xff]  ;;  %v1124_v13 = vld [vmem:[%s5984_s3 + $0xbe8] sm:$0xff] }
 0x113   :  { %1413 = vmatprep.subr.mxu0 %v1065_v14  ;;  %1342 = vmatprep.subr.mxu1 %v969_v1  ;;  %v1028_v14 = vld [vmem:[%s5984_s3 + $0x8e8] sm:$0xff]  ;;  %v1122_v1 = vld [vmem:[%s5984_s3 + $0xbd8] sm:$0xff] }
 0x114   :  { %1414 = vmatpush1.msra.mxu0 %v1064_v15  ;;  %1343 = vmatpush1.msra.mxu1 %v968_v63  ;;  %v1026_v15 = vld [vmem:[%s5984_s3 + $0x8d8] sm:$0xff]  ;;  %v1121_v63 = vld [vmem:[%s5984_s3 + $0xbd0] sm:$0xff] }
 0x115   :  { %1415 = vmatprep.subr.mxu0 %v1062_v16  ;;  %1344 = vmatprep.subr.mxu1 %v966_v17  ;;  %v1025_v16 = vld [vmem:[%s5984_s3 + $0x8d0] sm:$0xff]  ;;  %v1119_v17 = vld [vmem:[%s5984_s3 + $0xbc0] sm:$0xff] }
 0x116   :  { %1416 = vmatpush1.msra.mxu0 %v1061_v18  ;;  %1345 = vmatpush1.msra.mxu1 %v965_v19  ;;  %v1023_v18 = vld [vmem:[%s5984_s3 + $0x8c0] sm:$0xff]  ;;  %v1118_v19 = vld [vmem:[%s5984_s3 + $0xbb8] sm:$0xff] }
 0x117   :  { %1417 = vmatprep.subr.mxu0 %v1059_v20  ;;  %1346 = vmatprep.subr.mxu1 %v963_v21  ;;  %v1022_v20 = vld [vmem:[%s5984_s3 + $0x8b8] sm:$0xff]  ;;  %v1116_v21 = vld [vmem:[%s5984_s3 + $0xba8] sm:$0xff] }
 0x118   :  { %1418 = vmatpush1.msra.mxu0 %v1058_v22  ;;  %1347 = vmatpush1.msra.mxu1 %v962_v23  ;;  %v1020_v22 = vld [vmem:[%s5984_s3 + $0x8a8] sm:$0xff]  ;;  %v1115_v23 = vld [vmem:[%s5984_s3 + $0xba0] sm:$0xff] }
 0x119   :  { %1419 = vmatprep.subr.mxu0 %v1056_v24  ;;  %1348 = vmatprep.subr.mxu1 %v960_v25  ;;  %v1019_v24 = vld [vmem:[%s5984_s3 + $0x8a0] sm:$0xff]  ;;  %v1113_v25 = vld [vmem:[%s5984_s3 + $0xb90] sm:$0xff] }
 0x11a   :  { %1420 = vmatpush1.msra.mxu0 %v1055_v26  ;;  %1349 = vmatpush1.msra.mxu1 %v959_v27  ;;  %v1017_v26 = vld [vmem:[%s5984_s3 + $0x890] sm:$0xff]  ;;  %v1112_v27 = vld [vmem:[%s5984_s3 + $0xb88] sm:$0xff] }
 0x11b   :  { %1421 = vmatprep.subr.mxu0 %v1053_v28  ;;  %1350 = vmatprep.subr.mxu1 %v957_v29  ;;  %v1016_v28 = vld [vmem:[%s5984_s3 + $0x888] sm:$0xff]  ;;  %v1110_v29 = vld [vmem:[%s5984_s3 + $0xb78] sm:$0xff] }
 0x11c   :  { %1422 = vmatpush1.msra.mxu0 %v1052_v30  ;;  %1351 = vmatpush1.msra.mxu1 %v956_v31  ;;  %v1014_v30 = vld [vmem:[%s5984_s3 + $0x878] sm:$0xff]  ;;  %v1109_v31 = vld [vmem:[%s5984_s3 + $0xb70] sm:$0xff] }
 0x11d   :  { %1423 = vmatprep.subr.mxu0 %v1050_v32  ;;  %1352 = vmatprep.subr.mxu1 %v954_v33  ;;  %v1013_v32 = vld [vmem:[%s5984_s3 + $0x870] sm:$0xff]  ;;  %v1107_v33 = vld [vmem:[%s5984_s3 + $0xb60] sm:$0xff] }
 0x11e   :  { %1424 = vmatpush1.msra.mxu0 %v1049_v34  ;;  %1353 = vmatpush1.msra.mxu1 %v953_v35  ;;  %v1011_v34 = vld [vmem:[%s5984_s3 + $0x860] sm:$0xff]  ;;  %v1106_v35 = vld [vmem:[%s5984_s3 + $0xb58] sm:$0xff] }
 0x11f   :  { %1425 = vmatprep.subr.mxu0 %v1047_v36  ;;  %1354 = vmatprep.subr.mxu1 %v951_v37  ;;  %v1010_v36 = vld [vmem:[%s5984_s3 + $0x858] sm:$0xff]  ;;  %v1104_v37 = vld [vmem:[%s5984_s3 + $0xb48] sm:$0xff] }
 0x120   :  { %1426 = vmatpush1.msra.mxu0 %v1046_v38  ;;  %1355 = vmatpush1.msra.mxu1 %v950_v39  ;;  %v1008_v38 = vld [vmem:[%s5984_s3 + $0x848] sm:$0xff]  ;;  %v1103_v39 = vld [vmem:[%s5984_s3 + $0xb40] sm:$0xff] }
 0x121   :  { %1427 = vmatprep.subr.mxu0 %v1044_v45  ;;  %1356 = vmatprep.subr.mxu1 %v948_v46  ;;  %v1007_v45 = vld [vmem:[%s5984_s3 + $0x840] sm:$0xff]  ;;  %v1101_v46 = vld [vmem:[%s5984_s3 + $0xb30] sm:$0xff] }
 0x122   :  { %1428 = vmatpush1.msra.mxu0 %v1043_v47  ;;  %1357 = vmatpush1.msra.mxu1 %v947_v48  ;;  %v1005_v47 = vld [vmem:[%s5984_s3 + $0x830] sm:$0xff]  ;;  %v1100_v48 = vld [vmem:[%s5984_s3 + $0xb28] sm:$0xff] }
 0x123   :  { %1429 = vmatprep.subr.mxu0 %v1041_v49  ;;  %1358 = vmatprep.subr.mxu1 %v945_v50  ;;  %v1004_v49 = vld [vmem:[%s5984_s3 + $0x828] sm:$0xff]  ;;  %v1098_v50 = vld [vmem:[%s5984_s3 + $0xb18] sm:$0xff] }
 0x124   :  { %1430 = vmatpush1.msra.mxu0 %v1040_v51  ;;  %1359 = vmatpush1.msra.mxu1 %v944_v54  ;;  %v1002_v51 = vld [vmem:[%s5984_s3 + $0x818] sm:$0xff]  ;;  %v1097_v54 = vld [vmem:[%s5984_s3 + $0xb10] sm:$0xff] }
 0x125   :  { %1431 = vmatprep.subr.mxu0 %v1038_v55  ;;  %1360 = vmatprep.subr.mxu1 %v942_v62  ;;  %v1001_v55 = vld [vmem:[%s5984_s3 + $0x810] sm:$0xff]  ;;  %v1095_v62 = vld [vmem:[%s5984_s3 + $0xb00] sm:$0xff] }
 0x126   :  { %1432 = vmatpush1.msra.mxu0 %v1037_v0  ;;  %1361 = vmatpush1.msra.mxu1 %v941_v2  ;;  %v999_v0 = vld [vmem:[%s5984_s3 + $0x800] sm:$0xff]  ;;  %v1094_v2 = vld [vmem:[%s5984_s3 + $0xaf8] sm:$0xff] }
 0x127   :  { %1433 = vmatprep.subr.mxu0 %v1035_v3  ;;  %1362 = vmatprep.subr.mxu1 %v939_v4  ;;  %v998_v3 = vld [vmem:[%s5984_s3 + $0x7f8] sm:$0xff]  ;;  %v1092_v4 = vld [vmem:[%s5984_s3 + $0xae8] sm:$0xff] }
 0x128   :  { %1434 = vmatpush1.msra.mxu0 %v1034_v5  ;;  %1363 = vmatpush1.msra.mxu1 %v938_v6  ;;  %v996_v5 = vld [vmem:[%s5984_s3 + $0x7e8] sm:$0xff]  ;;  %v352_v6 = vsub.s32 6, %v4309_v40 }
 0x129   :  { %1435 = vmatprep.subr.mxu0 %v1032_v7  ;;  %1364 = vmatprep.subr.mxu1 %v936_v8  ;;  %v1091_v7 = vld [vmem:[%s5984_s3 + $0xae0] sm:$0xff] }
 0x12a   :  { %1436 = vmatpush1.msra.mxu0 %v1031_v9  ;;  %1365 = vmatpush1.msra.mxu1 %v935_v10  ;;  %v995_v8 = vld [vmem:[%s5984_s3 + $0x7e0] sm:$0xff]  ;;  %v344_v9 = vsub.s32 4, %v4309_v40  ;;  %v1089_v10 = vld [vmem:[%s5984_s3 + $0xad0] sm:$0xff] }
 0x12b   :  { %1437 = vmatprep.subr.mxu0 %v1125_v11  ;;  %1366 = vmatprep.subr.mxu1 %v1029_v12  ;;  %v993_v11 = vld [vmem:[%s5984_s3 + $0x7d0] sm:$0xff]  ;;  %v348_v12 = vsub.s32 5, %v4309_v40 }
 0x12c   :  { %1438 = vmatpush2.msra.mxu0 %v1124_v13  ;;  %1367 = vmatpush2.msra.mxu1 %v1028_v14  ;;  %v356_v13 = vsub.s32 7, %v4309_v40  ;;  %v1088_v14 = vld [vmem:[%s5984_s3 + $0xac8] sm:$0xff]  ;;  %v990_v40 = vld [vmem:[%s5984_s3 + $0x7b8] sm:$0xff] }
 0x12d   :  { %1439 = vmatprep.subr.mxu0 %v1122_v1  ;;  %1368 = vmatprep.subr.mxu1 %v1026_v15  ;;  %v992_v1 = vld [vmem:[%s5984_s3 + $0x7c8] sm:$0xff]  ;;  %v353_v15 = vrot.slane %v4320_v43, %v352_v6  ;;  %v1161_v6 = vld [vmem:[%s5984_s3 + $0xd10] sm:$0xff] }
 0x12e   :  { %1440 = vmatpush2.msra.mxu0 %v1121_v63  ;;  %1369 = vmatpush2.msra.mxu1 %v1025_v16  ;;  %v1086_v63 = vld [vmem:[%s5984_s3 + $0xab8] sm:$0xff]  ;;  %v345_v16 = vrot.slane %v4320_v43, %v344_v9  ;;  %v823_v9 = vld [vmem:[%s5984_s3 + $0x280] sm:$0xff] }
 0x12f   :  { %1441 = vmatprep.subr.mxu0 %v1119_v17  ;;  %1370 = vmatprep.subr.mxu1 %v1023_v18  ;;  %v1085_v17 = vld [vmem:[%s5984_s3 + $0xab0] sm:$0xff] }
 0x130   :  { %1442 = vmatpush2.msra.mxu0 %v1118_v19  ;;  %1371 = vmatpush2.msra.mxu1 %v1022_v20  ;;  %v989_v18 = vld [vmem:[%s5984_s3 + $0x7b0] sm:$0xff]  ;;  %v349_v19 = vrot.slane %v4320_v43, %v348_v12  ;;  %v357_v20 = vrot.slane %v4320_v43, %v356_v13  ;;  %v986_v43 = vld [vmem:[%s5984_s3 + $0x798] sm:$0xff]  ;;  %v820_v13 = vld [vmem:[%s5984_s3 + $0x268] sm:$0xff] }
 0x131   :  { %1443 = vmatprep.subr.mxu0 %v1116_v21  ;;  %1372 = vmatprep.subr.mxu1 %v1020_v22  ;;  %v1083_v21 = vld [vmem:[%s5984_s3 + $0xaa0] sm:$0xff]  ;;  %v1157_v12 = vld [vmem:[%s5984_s3 + $0xcf0] sm:$0xff] }
 0x132   :  { %1444 = vmatpush2.msra.mxu0 %v1115_v23  ;;  %1373 = vmatpush2.msra.mxu1 %v1019_v24  ;;  %v987_v22 = vld [vmem:[%s5984_s3 + $0x7a0] sm:$0xff] }
 0x133   :  { %1445 = vmatprep.subr.mxu0 %v1113_v25  ;;  %1374 = vmatprep.subr.mxu1 %v1017_v26  ;;  %v1082_v25 = vld [vmem:[%s5984_s3 + $0xa98] sm:$0xff] }
 0x134   :  { %1446 = vmatpush2.msra.mxu0 %v1112_v27  ;;  %1375 = vmatpush2.msra.mxu1 %v1016_v28  ;;  %v1080_v27 = vld [vmem:[%s5984_s3 + $0xa88] sm:$0xff] }
 0x135   :  { %1447 = vmatprep.subr.mxu0 %v1110_v29  ;;  %1376 = vmatprep.subr.mxu1 %v1014_v30  ;;  %v984_v28 = vld [vmem:[%s5984_s3 + $0x788] sm:$0xff] }
 0x136   :  { %1448 = vmatpush2.msra.mxu0 %v1109_v31  ;;  %1377 = vmatpush2.msra.mxu1 %v1013_v32  ;;  %v1079_v32 = vld [vmem:[%s5984_s3 + $0xa80] sm:$0xff] }
 0x137   :  { %1449 = vmatprep.subr.mxu0 %v1107_v33  ;;  %1378 = vmatprep.subr.mxu1 %v1011_v34  ;;  %v983_v33 = vld [vmem:[%s5984_s3 + $0x780] sm:$0xff] }
 0x138   :  { %1450 = vmatpush2.msra.mxu0 %v1106_v35  ;;  %1379 = vmatpush2.msra.mxu1 %v1010_v36  ;;  %v838_v36 = vld [vmem:[%s5984_s3 + $0x2f8] sm:$0xff] }
 0x139   :  { %1451 = vmatprep.subr.mxu0 %v1104_v37  ;;  %1380 = vmatprep.subr.mxu1 %v1008_v38  ;;  %v1173_v37 = vld [vmem:[%s5984_s3 + $0xd70] sm:$0xff] }
 0x13a   :  { %1452 = vmatpush2.msra.mxu0 %v1103_v39  ;;  %1381 = vmatpush2.msra.mxu1 %v1007_v45 }
 0x13b   :  { %1453 = vmatprep.subr.mxu0 %v1101_v46  ;;  %1382 = vmatprep.subr.mxu1 %v1005_v47  ;;  %v790_v47 = vld [vmem:[%s5984_s3 + $0x178] sm:$0xff] }
 0x13c   :  { %1454 = vmatpush2.msra.mxu0 %v1100_v48  ;;  %1383 = vmatpush2.msra.mxu1 %v1004_v49  ;;  %v1172_v48 = vld [vmem:[%s5984_s3 + $0xd68] sm:$0xff]  ;;  %v835_v49 = vld [vmem:[%s5984_s3 + $0x2e0] sm:$0xff] }
 0x13d   :  { %1455 = vmatprep.subr.mxu0 %v1098_v50  ;;  %1384 = vmatprep.subr.mxu1 %v1002_v51  ;;  %v1170_v50 = vld [vmem:[%s5984_s3 + $0xd58] sm:$0xff]  ;;  %v787_v51 = vld [vmem:[%s5984_s3 + $0x160] sm:$0xff] }
 0x13e   :  { %1456 = vmatpush2.msra.mxu0 %v1097_v54  ;;  %1385 = vmatpush2.msra.mxu1 %v1001_v55  ;;  %v1169_v54 = vld [vmem:[%s5984_s3 + $0xd50] sm:$0xff]  ;;  %v832_v55 = vld [vmem:[%s5984_s3 + $0x2c8] sm:$0xff] }
 0x13f   :  { %1457 = vmatprep.subr.mxu0 %v1095_v62  ;;  %1386 = vmatprep.subr.mxu1 %v999_v0  ;;  %v1167_v62 = vld [vmem:[%s5984_s3 + $0xd40] sm:$0xff]  ;;  %v784_v0 = vld [vmem:[%s5984_s3 + $0x148] sm:$0xff] }
 0x140   :  { %1458 = vmatpush2.msra.mxu0 %v1094_v2  ;;  %1387 = vmatpush2.msra.mxu1 %v998_v3  ;;  %v1166_v2 = vld [vmem:[%s5984_s3 + $0xd38] sm:$0xff]  ;;  %v829_v3 = vld [vmem:[%s5984_s3 + $0x2b0] sm:$0xff] }
 0x141   :  { %1459 = vmatprep.subr.mxu0 %v1092_v4  ;;  %1388 = vmatprep.subr.mxu1 %v996_v5  ;;  %v1163_v4 = vld [vmem:[%s5984_s3 + $0xd20] sm:$0xff]  ;;  %v826_v5 = vld [vmem:[%s5984_s3 + $0x298] sm:$0xff] }
 0x142   :  { %1460 = vmatpush2.msra.mxu0 %v1091_v7  ;;  %1389 = vmatpush2.msra.mxu1 %v995_v8  ;;  %v778_v7 = vld [vmem:[%s5984_s3 + $0x118] sm:$0xff]  ;;  %v1160_v8 = vld [vmem:[%s5984_s3 + $0xd08] sm:$0xff] }
 0x143   :  { %1461 = vmatprep.subr.mxu0 %v1089_v10  ;;  %1390 = vmatprep.subr.mxu1 %v993_v11  ;;  %v1158_v10 = vld [vmem:[%s5984_s3 + $0xcf8] sm:$0xff]  ;;  %v775_v11 = vld [vmem:[%s5984_s3 + $0x100] sm:$0xff] }
 0x144   :  { %1462 = vmatpush2.msra.mxu0 %v1088_v14  ;;  %1391 = vmatpush2.msra.mxu1 %v992_v1  ;;  %v1155_v14 = vld [vmem:[%s5984_s3 + $0xce0] sm:$0xff]  ;;  %v772_v1 = vld [vmem:[%s5984_s3 + $0xe8] sm:$0xff] }
 0x145   :  { %v579_v23 = vpop.f32.mrf.mxu0  ;;  %v650_v24 = vpop.f32.mrf.mxu1  ;;  %1463 = vmatprep.subr.mxu0 %v1086_v63  ;;  %1392 = vmatprep.subr.mxu1 %v990_v40  ;;  %v817_v63 = vld [vmem:[%s5984_s3 + $0x250] sm:$0xff]  ;;  %v1152_v40 = vld [vmem:[%s5984_s3 + $0xcc8] sm:$0xff] }
 0x146   :  { %v4727_v26 = vadd.f32 %v650_v24, %v353_v15  ;;  %1464 = vmatpush2.msra.mxu0 %v1085_v17  ;;  %1393 = vmatpush2.msra.mxu1 %v989_v18  ;;  %v4735_v29 = vadd.f32 %v579_v23, %v345_v16  ;;  %v1154_v15 = vld [vmem:[%s5984_s3 + $0xcd8] sm:$0xff]  ;;  %v769_v16 = vld [vmem:[%s5984_s3 + $0xd0] sm:$0xff]  ;;  %v1151_v17 = vld [vmem:[%s5984_s3 + $0xcc0] sm:$0xff] }
 0x147   :  { %v581_v30 = vpop.f32.mrf.mxu0  ;;  %v652_v31 = vpop.f32.mrf.mxu1  ;;  %1465 = vmatprep.subr.mxu0 %v1083_v21  ;;  %1394 = vmatprep.subr.mxu1 %v987_v22  ;;  %v814_v18 = vld [vmem:[%s5984_s3 + $0x238] sm:$0xff]  ;;  %v1148_v21 = vld [vmem:[%s5984_s3 + $0xca8] sm:$0xff]  ;;  %v811_v22 = vld [vmem:[%s5984_s3 + $0x220] sm:$0xff] }
 0x148   :  { %v4743_v34 = vadd.f32 %v581_v30, %v349_v19  ;;  %v4745_v35 = vadd.f32 %v652_v31, %v357_v20  ;;  %1466 = vmatpush2.msra.mxu0 %v1082_v25  ;;  %1395 = vmatpush2.msra.mxu1 %v986_v43  ;;  %v2565_v38 = vclamps-f32 %v4727_v26, 1.0  ;;  %v2563_v46 = vclamps-f32 %v4735_v29, 1.0  ;;  %v1149_v19 = vld [vmem:[%s5984_s3 + $0xcb0] sm:$0xff]  ;;  %v766_v20 = vld [vmem:[%s5984_s3 + $0xb8] sm:$0xff]  ;;  %v763_v24 = vld [vmem:[%s5984_s3 + $0xa0] sm:$0xff] }
 0x149   :  { %1467 = vmatprep.subr.mxu0 %v1080_v27  ;;  %1396 = vmatprep.subr.mxu1 %v984_v28  ;;  %v1146_v23 = vld [vmem:[%s5984_s3 + $0xc98] sm:$0xff]  ;;  %v1145_v25 = vld [vmem:[%s5984_s3 + $0xc90] sm:$0xff]  ;;  %v808_v43 = vld [vmem:[%s5984_s3 + $0x208] sm:$0xff] }
 0x14a   :  { %v2564_v39 = vclamps-f32 %v4743_v34, 1.0  ;;  %v2566_v45 = vclamps-f32 %v4745_v35, 1.0  ;;  %1468 = vmatpush2.msra.mxu0 %v1079_v32  ;;  %1397 = vmatpush2.msra.mxu1 %v983_v33  ;;  %v1143_v27 = vld [vmem:[%s5984_s3 + $0xc80] sm:$0xff]  ;;  %v760_v28 = vld [vmem:[%s5984_s3 + $0x88] sm:$0xff]  ;;  %v1142_v30 = vld [vmem:[%s5984_s3 + $0xc78] sm:$0xff] }
 0x14b   :  { %2611 = vmatprep.subr.mxu0 %v838_v36  ;;  %1476 = vmatprep.subr.mxu1 %v1173_v37  ;;  %v805_v31 = vld [vmem:[%s5984_s3 + $0x1f0] sm:$0xff]  ;;  %v1140_v32 = vld [vmem:[%s5984_s3 + $0xc68] sm:$0xff]  ;;  %v1139_v36 = vld [vmem:[%s5984_s3 + $0xc60] sm:$0xff] }
 0x14c   :  { %1398 = vmatprep.mubr.f32.mxu1 %v2564_v39  ;;  %1469 = vmatprep.mubr.f32.mxu0 %v2566_v45  ;;  %v757_v33 = vld [vmem:[%s5984_s3 + $0x70] sm:$0xff]  ;;  %v802_v37 = vld [vmem:[%s5984_s3 + $0x1d8] sm:$0xff]  ;;  %v928_v34 = vld [vmem:[%s5984_s3 + $0x5c8] sm:$0xff] }
 0x14d   :  { %1399 = vmatmul.mubr.f32.vlgmr.msra.gmra.mxu1 %v2563_v46  ;;  %1470 = vmatmul.mubr.f32.vlgmr.msra.gmra.mxu0 %v2565_v38  ;;  %v1075_v29 = vld [vmem:[%s5984_s3 + $0xa60] sm:$0xff]  ;;  %v1117_v35 = vld [vmem:[%s5984_s3 + $0xbb0] sm:$0xff]  ;;  %v1942_v26 = vld [vmem:[%s5986_s5 + $0x138] sm:$0xff] }
 0x14e   :  { %2612 = vmatpush3.msra.mxu0 %v790_v47  ;;  %1477 = vmatpush1.msra.mxu1 %v1172_v48  ;;  %v1137_v47 = vld [vmem:[%s5984_s3 + $0xc50] sm:$0xff]  ;;  %v754_v48 = vld [vmem:[%s5984_s3 + $0x58] sm:$0xff] }
 0x14f   :  { %2613 = vmatprep.subr.mxu0 %v835_v49  ;;  %1611 = vmatprep.mubr.f32.mxu0 %v2560_v59  ;;  %v781_v59 = vld [vmem:[%s5984_s3 + $0x130] sm:$0xff]  ;;  %v1136_v49 = vld [vmem:[%s5984_s3 + $0xc48] sm:$0xff] }
 0x150   :  { %1478 = vmatprep.subr.mxu1 %v1170_v50  ;;  %2614 = vmatpush3.msra.mxu0 %v787_v51  ;;  %v799_v50 = vld [vmem:[%s5984_s3 + $0x1c0] sm:$0xff]  ;;  %v1134_v51 = vld [vmem:[%s5984_s3 + $0xc38] sm:$0xff] }
 0x151   :  { %1479 = vmatpush1.msra.mxu1 %v1169_v54  ;;  %2615 = vmatprep.subr.mxu0 %v832_v55  ;;  %v751_v54 = vld [vmem:[%s5984_s3 + $0x40] sm:$0xff] }
 0x152   :  { %1480 = vmatprep.subr.mxu1 %v1167_v62  ;;  %2616 = vmatpush3.msra.mxu0 %v784_v0  ;;  %v1133_v62 = vld [vmem:[%s5984_s3 + $0xc30] sm:$0xff]  ;;  %v796_v0 = vld [vmem:[%s5984_s3 + $0x1a8] sm:$0xff] }
 0x153   :  { %1481 = vmatpush1.msra.mxu1 %v1166_v2  ;;  %2617 = vmatprep.subr.mxu0 %v829_v3  ;;  %v1131_v2 = vld [vmem:[%s5984_s3 + $0xc20] sm:$0xff]  ;;  %v748_v3 = vld [vmem:[%s5984_s3 + $0x28] sm:$0xff] }
 0x154   :  { %1482 = vmatprep.subr.mxu1 %v1164_v56  ;;  %2618 = vmatpush3.msra.mxu0 %v781_v59  ;;  %v2558_v56 = vld [vmem:[%s5985_s2 + $0x8] ss:$0 sm:$0xff] }
 0x155   :  { %1483 = vmatpush1.msra.mxu1 %v1163_v4  ;;  %2619 = vmatprep.subr.mxu0 %v826_v5  ;;  %v1130_v4 = vld [vmem:[%s5984_s3 + $0xc18] sm:$0xff]  ;;  %v793_v5 = vld [vmem:[%s5984_s3 + $0x190] sm:$0xff] }
 0x156   :  { %1484 = vmatprep.subr.mxu1 %v1161_v6  ;;  %2620 = vmatpush3.msra.mxu0 %v778_v7  ;;  %v1128_v7 = vld [vmem:[%s5984_s3 + $0xc08] sm:$0xff] }
 0x157   :  { %1485 = vmatpush1.msra.mxu1 %v1160_v8  ;;  %2621 = vmatprep.subr.mxu0 %v823_v9  ;;  %v745_v8 = vld [vmem:[%s5984_s3 + $0x10] sm:$0xff]  ;;  %v1127_v9 = vld [vmem:[%s5984_s3 + $0xc00] sm:$0xff] }
 0x158   :  { %1486 = vmatprep.subr.mxu1 %v1158_v10  ;;  %2622 = vmatpush3.msra.mxu0 %v775_v11  ;;  %v1030_v11 = vld [vmem:[%s5984_s3 + $0x8f8] sm:$0xff] }
 0x159   :  { %1487 = vmatpush1.msra.mxu1 %v1157_v12  ;;  %2623 = vmatprep.subr.mxu0 %v820_v13  ;;  %v934_v12 = vld [vmem:[%s5984_s3 + $0x5f8] sm:$0xff] }
 0x15a   :  { %1488 = vmatprep.subr.mxu1 %v1155_v14  ;;  %2624 = vmatpush3.msra.mxu0 %v772_v1  ;;  %v982_v13 = vld [vmem:[%s5984_s3 + $0x778] sm:$0xff]  ;;  %v2983_v1 = vmov 0.0  }
 0x15b   :  { %1489 = vmatpush1.msra.mxu1 %v1154_v15  ;;  %2625 = vmatprep.subr.mxu0 %v817_v63  ;;  %v886_v15 = vld [vmem:[%s5984_s3 + $0x478] sm:$0xff]  ;;  %v1027_v63 = vld [vmem:[%s5984_s3 + $0x8e0] sm:$0xff] }
 0x15c   :  { %1490 = vmatprep.subr.mxu1 %v1152_v40  ;;  %2626 = vmatpush3.msra.mxu0 %v769_v16  ;;  %v931_v40 = vld [vmem:[%s5984_s3 + $0x5e0] sm:$0xff]  ;;  %v1024_v16 = vld [vmem:[%s5984_s3 + $0x8c8] sm:$0xff] }
 0x15d   :  { %1491 = vmatpush1.msra.mxu1 %v1151_v17  ;;  %2627 = vmatprep.subr.mxu0 %v814_v18  ;;  %v880_v17 = vld [vmem:[%s5984_s3 + $0x448] sm:$0xff]  ;;  %v1021_v18 = vld [vmem:[%s5984_s3 + $0x8b0] sm:$0xff] }
 0x15e   :  { %1492 = vmatprep.subr.mxu1 %v1149_v19  ;;  %2628 = vmatpush3.msra.mxu0 %v766_v20  ;;  %v925_v19 = vld [vmem:[%s5984_s3 + $0x5b0] sm:$0xff]  ;;  %v1018_v20 = vld [vmem:[%s5984_s3 + $0x898] sm:$0xff] }
 0x15f   :  { %1493 = vmatpush1.msra.mxu1 %v1148_v21  ;;  %2629 = vmatprep.subr.mxu0 %v811_v22  ;;  %v922_v21 = vld [vmem:[%s5984_s3 + $0x598] sm:$0xff] }
 0x160   :  { %1494 = vmatprep.subr.mxu1 %v1146_v23  ;;  %2630 = vmatpush3.msra.mxu0 %v763_v24  ;;  %v970_v22 = vld [vmem:[%s5984_s3 + $0x718] sm:$0xff]  ;;  %v1015_v24 = vld [vmem:[%s5984_s3 + $0x880] sm:$0xff] }
 0x161   :  { %1495 = vmatpush1.msra.mxu1 %v1145_v25  ;;  %2631 = vmatprep.subr.mxu0 %v808_v43  ;;  %v874_v23 = vld [vmem:[%s5984_s3 + $0x418] sm:$0xff]  ;;  %v919_v25 = vld [vmem:[%s5984_s3 + $0x580] sm:$0xff] }
 0x162   :  { %1496 = vmatprep.subr.mxu1 %v1143_v27  ;;  %2632 = vmatpush3.msra.mxu0 %v760_v28  ;;  %v967_v43 = vld [vmem:[%s5984_s3 + $0x700] sm:$0xff]  ;;  %v1012_v28 = vld [vmem:[%s5984_s3 + $0x868] sm:$0xff] }
 0x163   :  { %1497 = vmatpush1.msra.mxu1 %v1142_v30  ;;  %2633 = vmatprep.subr.mxu0 %v805_v31  ;;  %v871_v27 = vld [vmem:[%s5984_s3 + $0x400] sm:$0xff]  ;;  %v916_v30 = vld [vmem:[%s5984_s3 + $0x568] sm:$0xff] }
 0x164   :  { %1498 = vmatprep.subr.mxu1 %v1140_v32  ;;  %2634 = vmatpush3.msra.mxu0 %v757_v33  ;;  %v964_v31 = vld [vmem:[%s5984_s3 + $0x6e8] sm:$0xff]  ;;  %v1009_v33 = vld [vmem:[%s5984_s3 + $0x850] sm:$0xff] }
 0x165   :  { %1499 = vmatpush1.msra.mxu1 %v1139_v36  ;;  %2635 = vmatprep.subr.mxu0 %v802_v37  ;;  %v868_v32 = vld [vmem:[%s5984_s3 + $0x3e8] sm:$0xff]  ;;  %v913_v36 = vld [vmem:[%s5984_s3 + $0x550] sm:$0xff] }
 0x166   :  { %v2608_v55 = vpop.f32.mrf.mxu0  ;;  %1500 = vmatprep.subr.mxu1 %v1137_v47  ;;  %2636 = vmatpush3.msra.mxu0 %v754_v48  ;;  %v961_v37 = vld [vmem:[%s5984_s3 + $0x6d0] sm:$0xff]  ;;  %v1006_v48 = vld [vmem:[%s5984_s3 + $0x838] sm:$0xff] }
 0x167   :  { %1501 = vmatpush1.msra.mxu1 %v1136_v49  ;;  %2637 = vmatprep.subr.mxu0 %v799_v50  ;;  %v865_v47 = vld [vmem:[%s5984_s3 + $0x3d0] sm:$0xff]  ;;  %v910_v49 = vld [vmem:[%s5984_s3 + $0x538] sm:$0xff] }
 0x168   :  { %v2609_v59 = vpop.f32.mrf.mxu0  ;;  %1502 = vmatprep.subr.mxu1 %v1134_v51  ;;  %2638 = vmatpush3.msra.mxu0 %v751_v54  ;;  %v958_v50 = vld [vmem:[%s5984_s3 + $0x6b8] sm:$0xff]  ;;  %v1003_v54 = vld [vmem:[%s5984_s3 + $0x820] sm:$0xff] }
 0x169   :  { %v2610_v6 = vadd.f32 %v2609_v59, %v2608_v55  ;;  %1503 = vmatpush1.msra.mxu1 %v1133_v62  ;;  %2639 = vmatprep.subr.mxu0 %v796_v0  ;;  %v862_v51 = vld [vmem:[%s5984_s3 + $0x3b8] sm:$0xff]  ;;  %v907_v55 = vld [vmem:[%s5984_s3 + $0x520] sm:$0xff]  ;;  %v856_v59 = vld [vmem:[%s5984_s3 + $0x388] sm:$0xff] }
 0x16a   :  { %1504 = vmatprep.subr.mxu1 %v1131_v2  ;;  %2640 = vmatpush3.msra.mxu0 %v748_v3  ;;  %v955_v62 = vld [vmem:[%s5984_s3 + $0x6a0] sm:$0xff]  ;;  %v1000_v2 = vld [vmem:[%s5984_s3 + $0x808] sm:$0xff] }
 0x16b   :  { %v4956_v10 = vadd.f32 %v2610_v6, %v2558_v56  ;;  %1505 = vmatpush1.msra.mxu1 %v1130_v4  ;;  %2641 = vmatprep.subr.mxu0 %v793_v5  ;;  %v859_v0 = vld [vmem:[%s5984_s3 + $0x3a0] sm:$0xff]  ;;  %v904_v3 = vld [vmem:[%s5984_s3 + $0x508] sm:$0xff]  ;;  %v997_v4 = vld [vmem:[%s5984_s3 + $0x7f0] sm:$0xff] }
 0x16c   :  { %1506 = vmatprep.subr.mxu1 %v1128_v7  ;;  %2642 = vmatpush3.msra.mxu0 %v745_v8  ;;  %v952_v56 = vld [vmem:[%s5984_s3 + $0x688] sm:$0xff]  ;;  %v901_v5 = vld [vmem:[%s5984_s3 + $0x4f0] sm:$0xff]  ;;  %v994_v8 = vld [vmem:[%s5984_s3 + $0x7d8] sm:$0xff] }
 0x16d   :  { %v2567_v14 = vclamps-f32 %v4956_v10, 1.0  ;;  %1507 = vmatpush1.msra.mxu1 %v1127_v9  ;;  %1612 = vmatmul.mubr.f32.vlgmr.msra.gmra.mxu0 %v2559_v61  ;;  %v883_v61 = vld [vmem:[%s5984_s3 + $0x460] sm:$0xff]  ;;  %v949_v6 = vld [vmem:[%s5984_s3 + $0x670] sm:$0xff]  ;;  %v898_v9 = vld [vmem:[%s5984_s3 + $0x4d8] sm:$0xff] }
 0x16e   :  { %2681 = vmatprep.subr.mxu0 %v1030_v11  ;;  %1540 = vmatprep.mubr.f32.mxu1 %v2983_v1  ;;  %v853_v7 = vld [vmem:[%s5984_s3 + $0x370] sm:$0xff]  ;;  %v946_v11 = vld [vmem:[%s5984_s3 + $0x658] sm:$0xff]  ;;  %v1943_v10 = vld [vmem:[%s5986_s5 + $0x140] sm:$0xff] }
 0x16f   :  { %2646 = vmatprep.subr.mxu1 %v934_v12  ;;  %2682 = vmatpush3.msra.mxu0 %v982_v13  ;;  %v850_v12 = vld [vmem:[%s5984_s3 + $0x358] sm:$0xff]  ;;  %v991_v13 = vld [vmem:[%s5984_s3 + $0x7c0] sm:$0xff] }
 0x170   :  { %1751 = vmatprep.mubr.f32.mxu0 %v2564_v39  ;;  %1541 = vmatmul.mubr.f32.vlgmr.msra.gmra.mxu1 %v2567_v14  ;;  %v976_v39 = vld [vmem:[%s5984_s3 + $0x748] sm:$0xff] }
 0x171   :  { %2647 = vmatpush3.msra.mxu1 %v886_v15  ;;  %2683 = vmatprep.subr.mxu0 %v1027_v63  ;;  %v895_v15 = vld [vmem:[%s5984_s3 + $0x4c0] sm:$0xff] }
 0x172   :  { %2648 = vmatprep.subr.mxu1 %v931_v40  ;;  %1681 = vmatprep.mubr.f32.mxu1 %v2562_v60  ;;  %v877_v60 = vld [vmem:[%s5984_s3 + $0x430] sm:$0xff]  ;;  %v943_v63 = vld [vmem:[%s5984_s3 + $0x640] sm:$0xff] }
 0x173   :  { %2684 = vmatpush3.msra.mxu0 %v979_v53  ;;  %2649 = vmatpush3.msra.mxu1 %v883_v61  ;;  %v847_v40 = vld [vmem:[%s5984_s3 + $0x340] sm:$0xff]  ;;  %v988_v53 = vld [vmem:[%s5984_s3 + $0x7a8] sm:$0xff] }
 0x174   :  { %2685 = vmatprep.subr.mxu0 %v1024_v16  ;;  %2650 = vmatprep.subr.mxu1 %v928_v34  ;;  %v892_v61 = vld [vmem:[%s5984_s3 + $0x4a8] sm:$0xff] }
 0x175   :  { %2686 = vmatpush3.msra.mxu0 %v976_v39  ;;  %2651 = vmatpush3.msra.mxu1 %v880_v17  ;;  %v940_v16 = vld [vmem:[%s5984_s3 + $0x628] sm:$0xff]  ;;  %v985_v39 = vld [vmem:[%s5984_s3 + $0x790] sm:$0xff] }
 0x176   :  { %2687 = vmatprep.subr.mxu0 %v1021_v18  ;;  %2652 = vmatprep.subr.mxu1 %v925_v19  ;;  %v844_v34 = vld [vmem:[%s5984_s3 + $0x328] sm:$0xff]  ;;  %v889_v17 = vld [vmem:[%s5984_s3 + $0x490] sm:$0xff] }
 0x177   :  { %2688 = vmatpush3.msra.mxu0 %v973_v57  ;;  %2653 = vmatpush3.msra.mxu1 %v877_v60  ;;  %v937_v18 = vld [vmem:[%s5984_s3 + $0x610] sm:$0xff]  ;;  %v1126_v57 = vld [vmem:[%s5984_s3 + $0xbf8] sm:$0xff] }
 0x178   :  { %2689 = vmatprep.subr.mxu0 %v1018_v20  ;;  %2654 = vmatprep.subr.mxu1 %v922_v21  ;;  %v841_v19 = vld [vmem:[%s5984_s3 + $0x310] sm:$0xff]  ;;  %v1174_v60 = vld [vmem:[%s5984_s3 + $0xd78] sm:$0xff]  ;;  %v1123_v21 = vld [vmem:[%s5984_s3 + $0xbe0] sm:$0xff] }
 0x179   :  { %2690 = vmatpush3.msra.mxu0 %v970_v22  ;;  %2655 = vmatpush3.msra.mxu1 %v874_v23  ;;  %v1078_v20 = vld [vmem:[%s5984_s3 + $0xa78] sm:$0xff]  ;;  %v1171_v22 = vld [vmem:[%s5984_s3 + $0xd60] sm:$0xff]  ;;  %v1069_v23 = vld [vmem:[%s5984_s3 + $0xa30] sm:$0xff] }
 0x17a   :  { %2691 = vmatprep.subr.mxu0 %v1015_v24  ;;  %2656 = vmatprep.subr.mxu1 %v919_v25  ;;  %v1114_v24 = vld [vmem:[%s5984_s3 + $0xb98] sm:$0xff] }
 0x17b   :  { %2692 = vmatpush3.msra.mxu0 %v967_v43  ;;  %2657 = vmatpush3.msra.mxu1 %v871_v27  ;;  %v1162_v25 = vld [vmem:[%s5984_s3 + $0xd18] sm:$0xff]  ;;  %v1111_v27 = vld [vmem:[%s5984_s3 + $0xb80] sm:$0xff] }
 0x17c   :  { %2693 = vmatprep.subr.mxu0 %v1012_v28  ;;  %2658 = vmatprep.subr.mxu1 %v916_v30  ;;  %v1066_v43 = vld [vmem:[%s5984_s3 + $0xa18] sm:$0xff]  ;;  %v1159_v28 = vld [vmem:[%s5984_s3 + $0xd00] sm:$0xff] }
 0x17d   :  { %2694 = vmatpush3.msra.mxu0 %v964_v31  ;;  %2659 = vmatpush3.msra.mxu1 %v868_v32  ;;  %v1063_v30 = vld [vmem:[%s5984_s3 + $0xa00] sm:$0xff]  ;;  %v1108_v31 = vld [vmem:[%s5984_s3 + $0xb68] sm:$0xff] }
 0x17e   :  { %2695 = vmatprep.subr.mxu0 %v1009_v33  ;;  %2660 = vmatprep.subr.mxu1 %v913_v36  ;;  %v1156_v32 = vld [vmem:[%s5984_s3 + $0xce8] sm:$0xff]  ;;  %v1105_v36 = vld [vmem:[%s5984_s3 + $0xb50] sm:$0xff] }
 0x17f   :  { %2696 = vmatpush3.msra.mxu0 %v961_v37  ;;  %2661 = vmatpush3.msra.mxu1 %v865_v47  ;;  %v1060_v33 = vld [vmem:[%s5984_s3 + $0x9e8] sm:$0xff]  ;;  %v1153_v37 = vld [vmem:[%s5984_s3 + $0xcd0] sm:$0xff] }
 0x180   :  { %2697 = vmatprep.subr.mxu0 %v1006_v48  ;;  %2662 = vmatprep.subr.mxu1 %v910_v49  ;;  %v1057_v47 = vld [vmem:[%s5984_s3 + $0x9d0] sm:$0xff]  ;;  %v1102_v48 = vld [vmem:[%s5984_s3 + $0xb38] sm:$0xff] }
 0x181   :  { %2698 = vmatpush3.msra.mxu0 %v958_v50  ;;  %2663 = vmatpush3.msra.mxu1 %v862_v51  ;;  %v1150_v49 = vld [vmem:[%s5984_s3 + $0xcb8] sm:$0xff]  ;;  %v1099_v51 = vld [vmem:[%s5984_s3 + $0xb20] sm:$0xff] }
 0x182   :  { %2699 = vmatprep.subr.mxu0 %v1003_v54  ;;  %2664 = vmatprep.subr.mxu1 %v907_v55  ;;  %v1054_v50 = vld [vmem:[%s5984_s3 + $0x9b8] sm:$0xff]  ;;  %v1147_v54 = vld [vmem:[%s5984_s3 + $0xca0] sm:$0xff] }
 0x183   :  { %2700 = vmatpush3.msra.mxu0 %v955_v62  ;;  %2665 = vmatpush3.msra.mxu1 %v859_v0  ;;  %v1051_v55 = vld [vmem:[%s5984_s3 + $0x9a0] sm:$0xff]  ;;  %v1096_v62 = vld [vmem:[%s5984_s3 + $0xb08] sm:$0xff] }
 0x184   :  { %2701 = vmatprep.subr.mxu0 %v1000_v2  ;;  %2666 = vmatprep.subr.mxu1 %v904_v3  ;;  %v1144_v0 = vld [vmem:[%s5984_s3 + $0xc88] sm:$0xff]  ;;  %v1093_v3 = vld [vmem:[%s5984_s3 + $0xaf0] sm:$0xff] }
 0x185   :  { %2702 = vmatpush3.msra.mxu0 %v952_v56  ;;  %2667 = vmatpush3.msra.mxu1 %v856_v59  ;;  %v1048_v2 = vld [vmem:[%s5984_s3 + $0x988] sm:$0xff]  ;;  %v1141_v56 = vld [vmem:[%s5984_s3 + $0xc70] sm:$0xff] }
 0x186   :  { %2703 = vmatprep.subr.mxu0 %v997_v4  ;;  %2668 = vmatprep.subr.mxu1 %v901_v5  ;;  %v1045_v59 = vld [vmem:[%s5984_s3 + $0x970] sm:$0xff]  ;;  %v1090_v4 = vld [vmem:[%s5984_s3 + $0xad8] sm:$0xff] }
 0x187   :  { %2704 = vmatpush3.msra.mxu0 %v949_v6  ;;  %2669 = vmatpush3.msra.mxu1 %v853_v7  ;;  %v1138_v5 = vld [vmem:[%s5984_s3 + $0xc58] sm:$0xff]  ;;  %v1087_v7 = vld [vmem:[%s5984_s3 + $0xac0] sm:$0xff] }
 0x188   :  { %2705 = vmatprep.subr.mxu0 %v994_v8  ;;  %2670 = vmatprep.subr.mxu1 %v898_v9  ;;  %v1042_v6 = vld [vmem:[%s5984_s3 + $0x958] sm:$0xff]  ;;  %v1135_v8 = vld [vmem:[%s5984_s3 + $0xc40] sm:$0xff] }
 0x189   :  { %2706 = vmatpush3.msra.mxu0 %v946_v11  ;;  %2671 = vmatpush3.msra.mxu1 %v850_v12  ;;  %v1039_v9 = vld [vmem:[%s5984_s3 + $0x940] sm:$0xff]  ;;  %v1084_v11 = vld [vmem:[%s5984_s3 + $0xaa8] sm:$0xff] }
 0x18a   :  { %2707 = vmatprep.subr.mxu0 %v991_v13  ;;  %2672 = vmatprep.subr.mxu1 %v895_v15  ;;  %v1132_v12 = vld [vmem:[%s5984_s3 + $0xc28] sm:$0xff]  ;;  %v1081_v15 = vld [vmem:[%s5984_s3 + $0xa90] sm:$0xff] }
 0x18b   :  { %2708 = vmatpush3.msra.mxu0 %v943_v63  ;;  %2673 = vmatpush3.msra.mxu1 %v847_v40  ;;  %v1036_v13 = vld [vmem:[%s5984_s3 + $0x928] sm:$0xff]  ;;  %v1129_v63 = vld [vmem:[%s5984_s3 + $0xc10] sm:$0xff] }
 0x18c   :  { %2709 = vmatprep.subr.mxu0 %v988_v53  ;;  %2674 = vmatprep.subr.mxu1 %v892_v61  ;;  %v1033_v40 = vld [vmem:[%s5984_s3 + $0x910] sm:$0xff]  ;;  %v1948_v61 = vld [vmem:[%s5986_s5 + $0x168] sm:$0xff] }
 0x18d   :  { %2710 = vmatpush3.msra.mxu0 %v940_v16  ;;  %2675 = vmatpush3.msra.mxu1 %v844_v34  ;;  %v1949_v53 = vld [vmem:[%s5986_s5 + $0x170] sm:$0xff]  ;;  %v1946_v16 = vld [vmem:[%s5986_s5 + $0x158] sm:$0xff] }
 0x18e   :  { %2711 = vmatprep.subr.mxu0 %v985_v39  ;;  %2676 = vmatprep.subr.mxu1 %v889_v17  ;;  %v1945_v34 = vld [vmem:[%s5986_s5 + $0x150] sm:$0xff]  ;;  %v1936_v17 = vld [vmem:[%s5986_s5 + $0x108] sm:$0xff] }
 0x18f   :  { %2712 = vmatpush3.msra.mxu0 %v937_v18  ;;  %2677 = vmatpush3.msra.mxu1 %v841_v19  ;;  %v1937_v39 = vld [vmem:[%s5986_s5 + $0x110] sm:$0xff]  ;;  %v1934_v18 = vld [vmem:[%s5986_s5 + $0xf8] sm:$0xff] }
 0x190   :  { %1752 = vmatmul.mubr.f32.vlgmr.msra.gmra.mxu0 %v2563_v46  ;;  %2872 = vmatprep.subr.mxu0 %v2983_v1  ;;  %v1072_v46 = vld [vmem:[%s5984_s3 + $0xa48] sm:$0xff]  ;;  %v1933_v19 = vld [vmem:[%s5986_s5 + $0xf0] sm:$0xff] }
 0x191   :  { %1682 = vmatmul.mubr.f32.vlgmr.msra.gmra.mxu1 %v2561_v58  ;;  %2716 = vmatprep.subr.mxu1 %v1126_v57  ;;  %v1168_v58 = vld [vmem:[%s5984_s3 + $0xd48] sm:$0xff]  ;;  %v1931_v57 = vld [vmem:[%s5986_s5 + $0xe0] sm:$0xff] }
 0x192   :  { %2873 = vmatpush3.msra.mxu0 %v1174_v60  ;;  %2717 = vmatpush3.msra.mxu1 %v1078_v20  ;;  %v1930_v60 = vld [vmem:[%s5986_s5 + $0xd8] sm:$0xff]  ;;  %v1928_v20 = vld [vmem:[%s5986_s5 + $0xc8] sm:$0xff] }
 0x193   :  { %1821 = vmatprep.mubr.f32.mxu1 %v2566_v45  ;;  %2874 = vmatprep.subr.mxu0 %v2983_v1  ;;  %v1165_v45 = vld [vmem:[%s5984_s3 + $0xd30] sm:$0xff] }
 0x194   :  { %2718 = vmatprep.subr.mxu1 %v1123_v21  ;;  %2875 = vmatpush3.msra.mxu0 %v1171_v22  ;;  %v1927_v21 = vld [vmem:[%s5986_s5 + $0xc0] sm:$0xff]  ;;  %v1925_v22 = vld [vmem:[%s5986_s5 + $0xb0] sm:$0xff] }
 0x195   :  { %2719 = vmatpush3.msra.mxu1 %v1075_v29  ;;  %2876 = vmatprep.subr.mxu0 %v2983_v1  ;;  %v1924_v29 = vld [vmem:[%s5986_s5 + $0xa8] sm:$0xff] }
 0x196   :  { %2720 = vmatprep.subr.mxu1 %v1120_v52  ;;  %2877 = vmatpush3.msra.mxu0 %v1168_v58  ;;  %v1922_v52 = vld [vmem:[%s5986_s5 + $0x98] sm:$0xff]  ;;  %v1921_v58 = vld [vmem:[%s5986_s5 + $0x90] sm:$0xff] }
 0x197   :  { %2721 = vmatpush3.msra.mxu1 %v1072_v46  ;;  %2878 = vmatprep.subr.mxu0 %v2983_v1  ;;  %v1919_v46 = vld [vmem:[%s5986_s5 + $0x80] sm:$0xff] }
 0x198   :  { %2722 = vmatprep.subr.mxu1 %v1117_v35  ;;  %2879 = vmatpush3.msra.mxu0 %v1165_v45  ;;  %v1918_v35 = vld [vmem:[%s5986_s5 + $0x78] sm:$0xff]  ;;  %v1916_v45 = vld [vmem:[%s5986_s5 + $0x68] sm:$0xff] }
 0x199   :  { %2723 = vmatpush3.msra.mxu1 %v1069_v23  ;;  %2880 = vmatprep.subr.mxu0 %v2983_v1  ;;  %v1915_v23 = vld [vmem:[%s5986_s5 + $0x60] sm:$0xff] }
 0x19a   :  { %2724 = vmatprep.subr.mxu1 %v1114_v24  ;;  %2881 = vmatpush3.msra.mxu0 %v1162_v25  ;;  %v1913_v24 = vld [vmem:[%s5986_s5 + $0x50] sm:$0xff]  ;;  %v1912_v25 = vld [vmem:[%s5986_s5 + $0x48] sm:$0xff] }
 0x19b   :  { %2725 = vmatpush3.msra.mxu1 %v1066_v43  ;;  %2882 = vmatprep.subr.mxu0 %v2983_v1  ;;  %v1910_v43 = vld [vmem:[%s5986_s5 + $0x38] sm:$0xff] }
 0x19c   :  { %2726 = vmatprep.subr.mxu1 %v1111_v27  ;;  %2883 = vmatpush3.msra.mxu0 %v1159_v28  ;;  %v1909_v27 = vld [vmem:[%s5986_s5 + $0x30] sm:$0xff]  ;;  %v1907_v28 = vld [vmem:[%s5986_s5 + $0x20] sm:$0xff] }
 0x19d   :  { %2727 = vmatpush3.msra.mxu1 %v1063_v30  ;;  %2884 = vmatprep.subr.mxu0 %v2983_v1  ;;  %v1906_v30 = vld [vmem:[%s5986_s5 + $0x18] sm:$0xff] }
 0x19e   :  { %2728 = vmatprep.subr.mxu1 %v1108_v31  ;;  %2885 = vmatpush3.msra.mxu0 %v1156_v32  ;;  %v1904_v31 = vld [vmem:[%s5986_s5 + $0x8] sm:$0xff]  ;;  %v1903_v32 = vld [vmem:[%s5986_s5] sm:$0xff] }
 0x19f   :  { %2729 = vmatpush3.msra.mxu1 %v1060_v33  ;;  %2886 = vmatprep.subr.mxu0 %v2983_v1  ;;  %v1997_v33 = vld [vmem:[%s5986_s5 + $0x2f0] sm:$0xff] }
 0x1a0   :  { %2730 = vmatprep.subr.mxu1 %v1105_v36  ;;  %2887 = vmatpush3.msra.mxu0 %v1153_v37  ;;  %v1996_v36 = vld [vmem:[%s5986_s5 + $0x2e8] sm:$0xff]  ;;  %v1994_v37 = vld [vmem:[%s5986_s5 + $0x2d8] sm:$0xff] }
 0x1a1   :  { %2731 = vmatpush3.msra.mxu1 %v1057_v47  ;;  %2888 = vmatprep.subr.mxu0 %v2983_v1  ;;  %v1993_v47 = vld [vmem:[%s5986_s5 + $0x2d0] sm:$0xff] }
 0x1a2   :  { %2732 = vmatprep.subr.mxu1 %v1102_v48  ;;  %2889 = vmatpush3.msra.mxu0 %v1150_v49  ;;  %v1991_v48 = vld [vmem:[%s5986_s5 + $0x2c0] sm:$0xff]  ;;  %v1990_v49 = vld [vmem:[%s5986_s5 + $0x2b8] sm:$0xff] }
 0x1a3   :  { %2733 = vmatpush3.msra.mxu1 %v1054_v50  ;;  %2890 = vmatprep.subr.mxu0 %v2983_v1  ;;  %v1988_v50 = vld [vmem:[%s5986_s5 + $0x2a8] sm:$0xff] }
 0x1a4   :  { %2734 = vmatprep.subr.mxu1 %v1099_v51  ;;  %2891 = vmatpush3.msra.mxu0 %v1147_v54  ;;  %v2045_v51 = vld [vmem:[%s5986_s5 + $0x470] sm:$0xff]  ;;  %v2044_v54 = vld [vmem:[%s5986_s5 + $0x468] sm:$0xff] }
 0x1a5   :  { %2735 = vmatpush3.msra.mxu1 %v1051_v55  ;;  %2892 = vmatprep.subr.mxu0 %v2983_v1  ;;  %v2042_v55 = vld [vmem:[%s5986_s5 + $0x458] sm:$0xff] }
 0x1a6   :  { %2736 = vmatprep.subr.mxu1 %v1096_v62  ;;  %2893 = vmatpush3.msra.mxu0 %v1144_v0  ;;  %v1987_v62 = vld [vmem:[%s5986_s5 + $0x2a0] sm:$0xff]  ;;  %v2041_v0 = vld [vmem:[%s5986_s5 + $0x450] sm:$0xff] }
 0x1a7   :  { %2737 = vmatpush3.msra.mxu1 %v1048_v2  ;;  %2894 = vmatprep.subr.mxu0 %v2983_v1  ;;  %v1985_v2 = vld [vmem:[%s5986_s5 + $0x290] sm:$0xff] }
 0x1a8   :  { %2738 = vmatprep.subr.mxu1 %v1093_v3  ;;  %2895 = vmatpush3.msra.mxu0 %v1141_v56  ;;  %v2039_v3 = vld [vmem:[%s5986_s5 + $0x440] sm:$0xff]  ;;  %v1984_v56 = vld [vmem:[%s5986_s5 + $0x288] sm:$0xff] }
 0x1a9   :  { %2739 = vmatpush3.msra.mxu1 %v1045_v59  ;;  %2896 = vmatprep.subr.mxu0 %v2983_v1  ;;  %v2038_v59 = vld [vmem:[%s5986_s5 + $0x438] sm:$0xff] }
 0x1aa   :  { %2740 = vmatprep.subr.mxu1 %v1090_v4  ;;  %2897 = vmatpush3.msra.mxu0 %v1138_v5  ;;  %v1982_v4 = vld [vmem:[%s5986_s5 + $0x278] sm:$0xff]  ;;  %v2036_v5 = vld [vmem:[%s5986_s5 + $0x428] sm:$0xff] }
 0x1ab   :  { %2741 = vmatpush3.msra.mxu1 %v1042_v6  ;;  %2898 = vmatprep.subr.mxu0 %v2983_v1  ;;  %v1981_v6 = vld [vmem:[%s5986_s5 + $0x270] sm:$0xff] }
 0x1ac   :  { %2742 = vmatprep.subr.mxu1 %v1087_v7  ;;  %2899 = vmatpush3.msra.mxu0 %v1135_v8  ;;  %v2035_v7 = vld [vmem:[%s5986_s5 + $0x420] sm:$0xff] }
 0x1ad   :  { %2743 = vmatpush3.msra.mxu1 %v1039_v9  ;;  %2900 = vmatprep.subr.mxu0 %v2983_v1  ;;  %v1979_v8 = vld [vmem:[%s5986_s5 + $0x260] sm:$0xff]  ;;  %v2033_v9 = vld [vmem:[%s5986_s5 + $0x410] sm:$0xff] }
 0x1ae   :  { %2744 = vmatprep.subr.mxu1 %v1084_v11  ;;  %2901 = vmatpush3.msra.mxu0 %v1132_v12  ;;  %v1978_v11 = vld [vmem:[%s5986_s5 + $0x258] sm:$0xff]  ;;  %v2032_v12 = vld [vmem:[%s5986_s5 + $0x408] sm:$0xff] }
 0x1af   :  { %2745 = vmatpush3.msra.mxu1 %v1036_v13  ;;  %2902 = vmatprep.subr.mxu0 %v2983_v1  ;;  %v1976_v13 = vld [vmem:[%s5986_s5 + $0x248] sm:$0xff] }
 0x1b0   :  { %2746 = vmatprep.subr.mxu1 %v1081_v15  ;;  %2903 = vmatpush3.msra.mxu0 %v1129_v63  ;;  %v2030_v15 = vld [vmem:[%s5986_s5 + $0x3f8] sm:$0xff]  ;;  %v1975_v63 = vld [vmem:[%s5986_s5 + $0x240] sm:$0xff] }
 0x1b1   :  { %2904 = vmatprep.mubr.msk.f32.mxu0 %vm2984_vm0, %v2983_v1  ;;  %2747 = vmatpush3.msra.mxu1 %v1033_v40  ;;  %v2029_v40 = vld [vmem:[%s5986_s5 + $0x3f0] sm:$0xff] }
 0x1b2   :  { %2905 = vmatmul.mubr.f32.vlgmr.msra.gmra.mxu0 %v2567_v14  ;;  %1822 = vmatmul.mubr.f32.vlgmr.msra.gmra.mxu1 %v2565_v38  ;;  %v1940_v38 = vld [vmem:[%s5986_s5 + $0x128] sm:$0xff]  ;;  %v1939_v14 = vld [vmem:[%s5986_s5 + $0x120] sm:$0xff] }
 0x1b3   :  { %2064 = vmatprep.subr.mxu1 %v1949_v53  ;;  %2199 = vmatprep.mubr.f32.mxu0 %v2983_v1  ;;  %v1973_v53 = vld [vmem:[%s5986_s5 + $0x230] sm:$0xff] }
 0x1b4   :  { %2065 = vmatpush1.msra.mxu1 %v1948_v61  ;;  %2135 = vmatprep.subr.mxu0 %v2045_v51  ;;  %v2027_v61 = vld [vmem:[%s5986_s5 + $0x3e0] sm:$0xff] }
 0x1b5   :  { %2066 = vmatprep.subr.mxu1 %v1946_v16  ;;  %2136 = vmatpush1.msra.mxu0 %v2044_v54  ;;  %v1972_v16 = vld [vmem:[%s5986_s5 + $0x228] sm:$0xff] }
 0x1b6   :  { %2067 = vmatpush1.msra.mxu1 %v1945_v34  ;;  %2137 = vmatprep.subr.mxu0 %v2042_v55  ;;  %v2026_v34 = vld [vmem:[%s5986_s5 + $0x3d8] sm:$0xff] }
 0x1b7   :  { %2068 = vmatprep.subr.mxu1 %v1943_v10  ;;  %2138 = vmatpush1.msra.mxu0 %v2041_v0  ;;  %v1970_v10 = vld [vmem:[%s5986_s5 + $0x218] sm:$0xff] }
 0x1b8   :  { %2069 = vmatpush1.msra.mxu1 %v1942_v26  ;;  %2139 = vmatprep.subr.mxu0 %v2039_v3  ;;  %v2024_v26 = vld [vmem:[%s5986_s5 + $0x3c8] sm:$0xff] }
 0x1b9   :  { %2070 = vmatprep.subr.mxu1 %v1940_v38  ;;  %2140 = vmatpush1.msra.mxu0 %v2038_v59  ;;  %v1969_v38 = vld [vmem:[%s5986_s5 + $0x210] sm:$0xff] }
 0x1ba   :  { %2071 = vmatpush1.msra.mxu1 %v1939_v14  ;;  %2141 = vmatprep.subr.mxu0 %v2036_v5  ;;  %v2023_v14 = vld [vmem:[%s5986_s5 + $0x3c0] sm:$0xff] }
 0x1bb   :  { %2072 = vmatprep.subr.mxu1 %v1937_v39  ;;  %2142 = vmatpush1.msra.mxu0 %v2035_v7  ;;  %v1967_v39 = vld [vmem:[%s5986_s5 + $0x200] sm:$0xff] }
 0x1bc   :  { %2073 = vmatpush1.msra.mxu1 %v1936_v17  ;;  %2143 = vmatprep.subr.mxu0 %v2033_v9  ;;  %v2021_v17 = vld [vmem:[%s5986_s5 + $0x3b0] sm:$0xff] }
 0x1bd   :  { %2074 = vmatprep.subr.mxu1 %v1934_v18  ;;  %2144 = vmatpush1.msra.mxu0 %v2032_v12  ;;  %v1966_v18 = vld [vmem:[%s5986_s5 + $0x1f8] sm:$0xff] }
 0x1be   :  { %2075 = vmatpush1.msra.mxu1 %v1933_v19  ;;  %2145 = vmatprep.subr.mxu0 %v2030_v15  ;;  %v2020_v19 = vld [vmem:[%s5986_s5 + $0x3a8] sm:$0xff] }
 0x1bf   :  { %2076 = vmatprep.subr.mxu1 %v1931_v57  ;;  %2146 = vmatpush1.msra.mxu0 %v2029_v40  ;;  %v1964_v57 = vld [vmem:[%s5986_s5 + $0x1e8] sm:$0xff] }
 0x1c0   :  { %2077 = vmatpush1.msra.mxu1 %v1930_v60  ;;  %2147 = vmatprep.subr.mxu0 %v2027_v61  ;;  %v2018_v60 = vld [vmem:[%s5986_s5 + $0x398] sm:$0xff] }
 0x1c1   :  { %2078 = vmatprep.subr.mxu1 %v1928_v20  ;;  %2148 = vmatpush1.msra.mxu0 %v2026_v34  ;;  %v1963_v20 = vld [vmem:[%s5986_s5 + $0x1e0] sm:$0xff] }
 0x1c2   :  { %2079 = vmatpush1.msra.mxu1 %v1927_v21  ;;  %2149 = vmatprep.subr.mxu0 %v2024_v26  ;;  %v2017_v21 = vld [vmem:[%s5986_s5 + $0x390] sm:$0xff]  ;;  %v2043_v34 = vld [vmem:[%s5986_s5 + $0x460] sm:$0xff] }
 0x1c3   :  { %2080 = vmatprep.subr.mxu1 %v1925_v22  ;;  %2150 = vmatpush1.msra.mxu0 %v2023_v14  ;;  %v1961_v22 = vld [vmem:[%s5986_s5 + $0x1d0] sm:$0xff]  ;;  %v2031_v14 = vld [vmem:[%s5986_s5 + $0x400] sm:$0xff] }
 0x1c4   :  { %2081 = vmatpush1.msra.mxu1 %v1924_v29  ;;  %2151 = vmatprep.subr.mxu0 %v2021_v17  ;;  %v2015_v29 = vld [vmem:[%s5986_s5 + $0x380] sm:$0xff]  ;;  %v2037_v26 = vld [vmem:[%s5986_s5 + $0x430] sm:$0xff] }
 0x1c5   :  { %2082 = vmatprep.subr.mxu1 %v1922_v52  ;;  %2152 = vmatpush1.msra.mxu0 %v2020_v19  ;;  %v1960_v52 = vld [vmem:[%s5986_s5 + $0x1c8] sm:$0xff]  ;;  %v2025_v17 = vld [vmem:[%s5986_s5 + $0x3d0] sm:$0xff]  ;;  %v2019_v19 = vld [vmem:[%s5986_s5 + $0x3a0] sm:$0xff] }
 0x1c6   :  { %2083 = vmatpush1.msra.mxu1 %v1921_v58  ;;  %2153 = vmatprep.subr.mxu0 %v2018_v60  ;;  %v1958_v58 = vld [vmem:[%s5986_s5 + $0x1b8] sm:$0xff]  ;;  %v2013_v60 = vld [vmem:[%s5986_s5 + $0x370] sm:$0xff] }
 0x1c7   :  { %2084 = vmatprep.subr.mxu1 %v1919_v46  ;;  %2154 = vmatpush1.msra.mxu0 %v2017_v21  ;;  %v1957_v46 = vld [vmem:[%s5986_s5 + $0x1b0] sm:$0xff]  ;;  %v2007_v21 = vld [vmem:[%s5986_s5 + $0x340] sm:$0xff] }
 0x1c8   :  { %2085 = vmatpush1.msra.mxu1 %v1918_v35  ;;  %2155 = vmatprep.subr.mxu0 %v2015_v29  ;;  %v1955_v35 = vld [vmem:[%s5986_s5 + $0x1a0] sm:$0xff]  ;;  %v2001_v29 = vld [vmem:[%s5986_s5 + $0x310] sm:$0xff] }
 0x1c9   :  { %2086 = vmatprep.subr.mxu1 %v1916_v45  ;;  %v1954_v45 = vld [vmem:[%s5986_s5 + $0x198] sm:$0xff] }
 0x1ca   :  { %2087 = vmatpush1.msra.mxu1 %v1915_v23  ;;  %v1952_v23 = vld [vmem:[%s5986_s5 + $0x188] sm:$0xff] }
 0x1cb   :  { %2088 = vmatprep.subr.mxu1 %v1913_v24  ;;  %v1951_v24 = vld [vmem:[%s5986_s5 + $0x180] sm:$0xff] }
 0x1cc   :  { %2089 = vmatpush1.msra.mxu1 %v1912_v25  ;;  %v2014_v25 = vld [vmem:[%s5986_s5 + $0x378] sm:$0xff] }
 0x1cd   :  { %2090 = vmatprep.subr.mxu1 %v1910_v43  ;;  %2156 = vmatpush1.msra.mxu0 %v2014_v25  ;;  %v2012_v43 = vld [vmem:[%s5986_s5 + $0x368] sm:$0xff] }
 0x1ce   :  { %2091 = vmatpush1.msra.mxu1 %v1909_v27  ;;  %2157 = vmatprep.subr.mxu0 %v2012_v43  ;;  %v2011_v27 = vld [vmem:[%s5986_s5 + $0x360] sm:$0xff] }
 0x1cf   :  { %2092 = vmatprep.subr.mxu1 %v1907_v28  ;;  %2158 = vmatpush1.msra.mxu0 %v2011_v27  ;;  %v2009_v28 = vld [vmem:[%s5986_s5 + $0x350] sm:$0xff] }
 0x1d0   :  { %2093 = vmatpush1.msra.mxu1 %v1906_v30  ;;  %2159 = vmatprep.subr.mxu0 %v2009_v28  ;;  %v2008_v30 = vld [vmem:[%s5986_s5 + $0x348] sm:$0xff] }
 0x1d1   :  { %2094 = vmatprep.subr.mxu1 %v1904_v31  ;;  %2160 = vmatpush1.msra.mxu0 %v2008_v30  ;;  %v2006_v31 = vld [vmem:[%s5986_s5 + $0x338] sm:$0xff] }
 0x1d2   :  { %2095 = vmatpush1.msra.mxu1 %v1903_v32  ;;  %2161 = vmatprep.subr.mxu0 %v2006_v31  ;;  %v2005_v32 = vld [vmem:[%s5986_s5 + $0x330] sm:$0xff] }
 0x1d3   :  { %2096 = vmatprep.subr.mxu1 %v1997_v33  ;;  %2162 = vmatpush1.msra.mxu0 %v2005_v32  ;;  %v2003_v33 = vld [vmem:[%s5986_s5 + $0x320] sm:$0xff] }
 0x1d4   :  { %2097 = vmatpush2.msra.mxu1 %v1996_v36  ;;  %2163 = vmatprep.subr.mxu0 %v2003_v33  ;;  %v2002_v36 = vld [vmem:[%s5986_s5 + $0x318] sm:$0xff] }
 0x1d5   :  { %2098 = vmatprep.subr.mxu1 %v1994_v37  ;;  %2164 = vmatpush1.msra.mxu0 %v2002_v36  ;;  %v2000_v37 = vld [vmem:[%s5986_s5 + $0x308] sm:$0xff] }
 0x1d6   :  { %2099 = vmatpush2.msra.mxu1 %v1993_v47  ;;  %2165 = vmatprep.subr.mxu0 %v2000_v37  ;;  %v1999_v47 = vld [vmem:[%s5986_s5 + $0x300] sm:$0xff] }
 0x1d7   :  { %2100 = vmatprep.subr.mxu1 %v1991_v48  ;;  %v1998_v48 = vld [vmem:[%s5986_s5 + $0x2f8] sm:$0xff]  ;;  %2166 = vmatpush1.msra.mxu0 %v1999_v47 }
 0x1d8   :  { %2101 = vmatpush2.msra.mxu1 %v1990_v49  ;;  %2768 = vmatprep.subr.mxu0 %v1998_v48  ;;  %v5628_v49 = vld [vmem:[%s5987_s4] sm:$0x7] }
 0x1d9   :  { %2102 = vmatprep.subr.mxu1 %v1988_v50  ;;  %v1258_v50 = vpop.f32.mrf.mxu1  ;;  %v1180_v51 = vrot.slane %v5628_v49, %v4315_v42  ;;  %v1184_v54 = vrot.slane %v5628_v49, %v4323_v44 }
 0x1da   :  { %2103 = vmatpush2.msra.mxu1 %v1987_v62  ;;  %v1329_v62 = vpop.f32.mrf.mxu0 }
 0x1db   :  { %2104 = vmatprep.subr.mxu1 %v1985_v2  ;;  %v1260_v55 = vpop.f32.mrf.mxu1  ;;  %v1259_v0 = vadd.f32 %v1258_v50, %v1180_v51 }
 0x1dc   :  { %2105 = vmatpush2.msra.mxu1 %v1984_v56  ;;  %v1261_v3 = vadd.f32 %v1260_v55, %v1184_v54  ;;  %v1331_v56 = vpop.f32.mrf.mxu0  ;;  %v1995_v54 = vld [vmem:[%s5986_s5 + $0x2e0] sm:$0xff] }
 0x1dd   :  { %2106 = vmatprep.subr.mxu1 %v1982_v4  ;;  %v1330_v59 = vadd.f32 %v1329_v62, %v1259_v0  ;;  %v1947_v55 = vld [vmem:[%s5986_s5 + $0x160] sm:$0xff]  ;;  %v1992_v62 = vld [vmem:[%s5986_s5 + $0x2c8] sm:$0xff] }
 0x1de   :  { %2107 = vmatpush2.msra.mxu1 %v1981_v6  ;;  %v1332_v6 = vadd.f32 %v1331_v56, %v1261_v3  ;;  %v1944_v0 = vld [vmem:[%s5986_s5 + $0x148] sm:$0xff]  ;;  %v1941_v3 = vld [vmem:[%s5986_s5 + $0x130] sm:$0xff]  ;;  %v1986_v56 = vld [vmem:[%s5986_s5 + $0x298] sm:$0xff] }
 0x1df   :  { %2108 = vmatprep.subr.mxu1 %v1979_v8 }
 0x1e0   :  { %2109 = vmatpush2.msra.mxu1 %v1978_v11 }
 0x1e1   :  { %2110 = vmatprep.subr.mxu1 %v1976_v13 }
 0x1e2   :  { %2111 = vmatpush2.msra.mxu1 %v1975_v63 }
 0x1e3   :  { %2112 = vmatprep.subr.mxu1 %v1973_v53 }
 0x1e4   :  { %2113 = vmatpush2.msra.mxu1 %v1972_v16  ;;  %v2046_v16 = vld [vmem:[%s5986_s5 + $0x478] sm:$0xff] }
 0x1e5   :  { %2114 = vmatprep.subr.mxu1 %v1970_v10  ;;  %v2040_v10 = vld [vmem:[%s5986_s5 + $0x448] sm:$0xff] }
 0x1e6   :  { %2115 = vmatpush2.msra.mxu1 %v1969_v38  ;;  %v2034_v38 = vld [vmem:[%s5986_s5 + $0x418] sm:$0xff] }
 0x1e7   :  { %2116 = vmatprep.subr.mxu1 %v1967_v39  ;;  %v2028_v39 = vld [vmem:[%s5986_s5 + $0x3e8] sm:$0xff] }
 0x1e8   :  { %2117 = vmatpush2.msra.mxu1 %v1966_v18  ;;  %v2022_v18 = vld [vmem:[%s5986_s5 + $0x3b8] sm:$0xff] }
 0x1e9   :  { %2118 = vmatprep.subr.mxu1 %v1964_v57  ;;  %v2016_v57 = vld [vmem:[%s5986_s5 + $0x388] sm:$0xff] }
 0x1ea   :  { %2119 = vmatpush2.msra.mxu1 %v1963_v20  ;;  %v2010_v20 = vld [vmem:[%s5986_s5 + $0x358] sm:$0xff] }
 0x1eb   :  { %2120 = vmatprep.subr.mxu1 %v1961_v22  ;;  %v2004_v22 = vld [vmem:[%s5986_s5 + $0x328] sm:$0xff] }
 0x1ec   :  { %2121 = vmatpush2.msra.mxu1 %v1960_v52 }
 0x1ed   :  { %2122 = vmatprep.subr.mxu1 %v1958_v58 }
 0x1ee   :  { %2123 = vmatpush2.msra.mxu1 %v1957_v46 }
 0x1ef   :  { %2124 = vmatprep.subr.mxu1 %v1955_v35 }
 0x1f0   :  { %2125 = vmatpush2.msra.mxu1 %v1954_v45  ;;  %v1188_v45 = vrot.slane %v5628_v49, %v4312_v41  ;;  %v1950_v49 = vld [vmem:[%s5986_s5 + $0x178] sm:$0xff] }
 0x1f1   :  { %2126 = vmatprep.subr.mxu1 %v1952_v23 }
 0x1f2   :  { %2127 = vmatpush2.msra.mxu1 %v1951_v24 }
 0x1f3   :  { %2907 = vmatprep.subr.mxu1 %v2983_v1 }
 0x20d   :  { %v1400_v2 = vpop.f32.mrf.mxu1  ;;  %v1471_v5 = vpop.f32.mrf.mxu0 }
 0x20e   :  { %v1401_v7 = vadd.f32 %v1400_v2, %v1330_v59  ;;  %v1989_v2 = vld [vmem:[%s5986_s5 + $0x2b0] sm:$0xff]  ;;  %v1938_v59 = vld [vmem:[%s5986_s5 + $0x118] sm:$0xff] }
 0x20f   :  { %v1402_v4 = vpop.f32.mrf.mxu1  ;;  %v1473_v9 = vpop.f32.mrf.mxu0 }
 0x210   :  { %v1403_v8 = vadd.f32 %v1402_v4, %v1332_v6  ;;  %v1472_v11 = vadd.f32 %v1471_v5, %v1401_v7  ;;  %v1983_v4 = vld [vmem:[%s5986_s5 + $0x280] sm:$0xff]  ;;  %v1980_v6 = vld [vmem:[%s5986_s5 + $0x268] sm:$0xff] }
 0x211   :  { %v1935_v5 = vld [vmem:[%s5986_s5 + $0x100] sm:$0xff]  ;;  %v1932_v7 = vld [vmem:[%s5986_s5 + $0xe8] sm:$0xff] }
 0x212   :  { %v1474_v13 = vadd.f32 %v1473_v9, %v1403_v8  ;;  %v1977_v8 = vld [vmem:[%s5986_s5 + $0x250] sm:$0xff] }
 0x213   :  { %v1929_v9 = vld [vmem:[%s5986_s5 + $0xd0] sm:$0xff] }
 0x22d   :  { %v2643_v52 = vpop.f32.mrf.mxu0 }
 0x22f   :  { %v2644_v46 = vpop.f32.mrf.mxu0 }
 0x230   :  { %v1542_v12 = vpop.f32.mrf.mxu1  ;;  %v2645_v23 = vadd.f32 %v2644_v46, %v2643_v52  ;;  %v2379_v52 = vld [vmem:[%s5988_s7 + $0xd8] sm:$0xff]  ;;  %v2378_v46 = vld [vmem:[%s5988_s7 + $0xd0] sm:$0xff] }
 0x231   :  { %v5634_v15 = vadd.f32 %v1542_v12, %v1472_v11  ;;  %v1974_v11 = vld [vmem:[%s5986_s5 + $0x238] sm:$0xff] }
 0x232   :  { %v1544_v63 = vpop.f32.mrf.mxu1  ;;  %v1614_v43 = vadd.f32 %v2645_v23, %v1188_v45  ;;  %v1926_v12 = vld [vmem:[%s5986_s5 + $0xb8] sm:$0xff]  ;;  %v2377_v45 = vld [vmem:[%s5988_s7 + $0xc8] sm:$0xff] }
 0x233   :  { %v5636_v40 = vadd.f32 %v1544_v63, %v1474_v13  ;;  %v2568_v61 = vclamps-f32 %v5634_v15, 1.0  ;;  %v1971_v13 = vld [vmem:[%s5986_s5 + $0x220] sm:$0xff]  ;;  %v2361_v23 = vld [vmem:[%s5988_s7 + $0x48] sm:$0xff] }
 0x234   :  { %v1923_v63 = vld [vmem:[%s5986_s5 + $0xa0] sm:$0xff] }
 0x235   :  { %v2569_v53 = vclamps-f32 %v5636_v40, 1.0  ;;  %v1968_v40 = vld [vmem:[%s5986_s5 + $0x208] sm:$0xff]  ;;  %v2380_v15 = vld [vmem:[%s5988_s7 + $0xe0] sm:$0xff] }
 0x237   :  { %2128 = vmatprep.mubr.f32.mxu1 %v2569_v53 }
 0x238   :  { %2129 = vmatmul.mubr.f32.vlgmr.msra.gmra.mxu1 %v2568_v61 }
 0x239   :  { %2908 = vmatpush3.msra.mxu1 %v2046_v16  ;;  %2939 = vmatprep.mubr.msk.f32.mxu1 %vm2984_vm0, %v2983_v1  ;;  %v1965_v16 = vld [vmem:[%s5986_s5 + $0x1f0] sm:$0xff] }
 0x23a   :  { %2909 = vmatprep.subr.mxu1 %v2983_v1 }
 0x23b   :  { %2910 = vmatpush3.msra.mxu1 %v2043_v34  ;;  %v1917_v34 = vld [vmem:[%s5986_s5 + $0x70] sm:$0xff] }
 0x23c   :  { %2911 = vmatprep.subr.mxu1 %v2983_v1 }
 0x23d   :  { %2912 = vmatpush3.msra.mxu1 %v2040_v10  ;;  %v1962_v10 = vld [vmem:[%s5986_s5 + $0x1d8] sm:$0xff] }
 0x23e   :  { %2913 = vmatprep.subr.mxu1 %v2983_v1 }
 0x23f   :  { %2914 = vmatpush3.msra.mxu1 %v2037_v26  ;;  %v1914_v26 = vld [vmem:[%s5986_s5 + $0x58] sm:$0xff] }
 0x240   :  { %2915 = vmatprep.subr.mxu1 %v2983_v1 }
 0x241   :  { %2916 = vmatpush3.msra.mxu1 %v2034_v38  ;;  %v1959_v38 = vld [vmem:[%s5986_s5 + $0x1c0] sm:$0xff] }
 0x242   :  { %2917 = vmatprep.subr.mxu1 %v2983_v1 }
 0x243   :  { %2918 = vmatpush3.msra.mxu1 %v2031_v14  ;;  %v1911_v14 = vld [vmem:[%s5986_s5 + $0x40] sm:$0xff] }
 0x244   :  { %2919 = vmatprep.subr.mxu1 %v2983_v1 }
 0x245   :  { %2920 = vmatpush3.msra.mxu1 %v2028_v39  ;;  %v1956_v39 = vld [vmem:[%s5986_s5 + $0x1a8] sm:$0xff] }
 0x246   :  { %2921 = vmatprep.subr.mxu1 %v2983_v1 }
 0x247   :  { %2922 = vmatpush3.msra.mxu1 %v2025_v17  ;;  %v1908_v17 = vld [vmem:[%s5986_s5 + $0x28] sm:$0xff] }
 0x248   :  { %2923 = vmatprep.subr.mxu1 %v2983_v1 }
 0x249   :  { %2924 = vmatpush3.msra.mxu1 %v2022_v18  ;;  %v1953_v18 = vld [vmem:[%s5986_s5 + $0x190] sm:$0xff] }
 0x24a   :  { %2925 = vmatprep.subr.mxu1 %v2983_v1 }
 0x24b   :  { %2926 = vmatpush3.msra.mxu1 %v2019_v19  ;;  %v1905_v19 = vld [vmem:[%s5986_s5 + $0x10] sm:$0xff] }
 0x24c   :  { %2927 = vmatprep.subr.mxu1 %v2983_v1 }
 0x24d   :  { %2928 = vmatpush3.msra.mxu1 %v2016_v57  ;;  %v2383_v57 = vld [vmem:[%s5988_s7 + $0xf8] sm:$0xff] }
 0x24e   :  { %2929 = vmatprep.subr.mxu1 %v2983_v1 }
 0x24f   :  { %2930 = vmatpush3.msra.mxu1 %v2013_v60  ;;  %v2367_v60 = vld [vmem:[%s5988_s7 + $0x78] sm:$0xff] }
 0x250   :  { %2931 = vmatprep.subr.mxu1 %v2983_v1  ;;  %v2713_v24 = vpop.f32.mrf.mxu0 }
 0x251   :  { %2932 = vmatpush3.msra.mxu1 %v2010_v20  ;;  %v2678_v58 = vpop.f32.mrf.mxu1  ;;  %v2382_v20 = vld [vmem:[%s5988_s7 + $0xf0] sm:$0xff] }
 0x252   :  { %2933 = vmatprep.subr.mxu1 %v2983_v1  ;;  %v2714_v27 = vpop.f32.mrf.mxu0 }
 0x253   :  { %2934 = vmatpush3.msra.mxu1 %v2007_v21  ;;  %v2679_v35 = vpop.f32.mrf.mxu1  ;;  %v2715_v32 = vadd.f32 %v2714_v27, %v2713_v24  ;;  %v2366_v21 = vld [vmem:[%s5988_s7 + $0x70] sm:$0xff]  ;;  %v2376_v24 = vld [vmem:[%s5988_s7 + $0xc0] sm:$0xff]  ;;  %v2359_v27 = vld [vmem:[%s5988_s7 + $0x38] sm:$0xff] }
 0x254   :  { %2935 = vmatprep.subr.mxu1 %v2983_v1  ;;  %v2680_v25 = vadd.f32 %v2679_v35, %v2678_v58  ;;  %v2363_v58 = vld [vmem:[%s5988_s7 + $0x58] sm:$0xff]  ;;  %v2362_v35 = vld [vmem:[%s5988_s7 + $0x50] sm:$0xff] }
 0x255   :  { %2936 = vmatpush3.msra.mxu1 %v2004_v22  ;;  %v2381_v22 = vld [vmem:[%s5988_s7 + $0xe8] sm:$0xff] }
 0x256   :  { %2937 = vmatprep.subr.mxu1 %v2983_v1  ;;  %v1684_v28 = vadd.f32 %v2680_v25, %v1614_v43  ;;  %v2360_v25 = vld [vmem:[%s5988_s7 + $0x40] sm:$0xff]  ;;  %v2375_v43 = vld [vmem:[%s5988_s7 + $0xb8] sm:$0xff] }
 0x257   :  { %2938 = vmatpush3.msra.mxu1 %v2001_v29  ;;  %v2365_v29 = vld [vmem:[%s5988_s7 + $0x68] sm:$0xff] }
 0x258   :  { %2942 = vmatprep.subr.mxu1 %v2983_v1  ;;  %v1754_v37 = vadd.f32 %v2715_v32, %v1684_v28  ;;  %v2374_v28 = vld [vmem:[%s5988_s7 + $0xb0] sm:$0xff]  ;;  %v2357_v32 = vld [vmem:[%s5988_s7 + $0x28] sm:$0xff] }
 0x272   :  { %v1893_v30 = vpop.f32.mrf.mxu0  ;;  %v2748_v31 = vpop.f32.mrf.mxu1 }
 0x274   :  { %v2906_v33 = vpop.f32.mrf.mxu0  ;;  %v2749_v36 = vpop.f32.mrf.mxu1 }
 0x275   :  { %v2750_v47 = vadd.f32 %v2749_v36, %v2748_v31  ;;  %v2373_v31 = vld [vmem:[%s5988_s7 + $0xa8] sm:$0xff]  ;;  %v2372_v33 = vld [vmem:[%s5988_s7 + $0xa0] sm:$0xff] }
 0x276   :  { %v2356_v36 = vld [vmem:[%s5988_s7 + $0x20] sm:$0xff] }
 0x277   :  { %v1824_v48 = vadd.f32 %v2750_v47, %v1754_v37  ;;  %v2371_v37 = vld [vmem:[%s5988_s7 + $0x98] sm:$0xff] }
 0x278   :  { %v2355_v47 = vld [vmem:[%s5988_s7 + $0x18] sm:$0xff] }
 0x279   :  { %v1894_v50 = vadd.f32 %v1893_v30, %v1824_v48  ;;  %v2358_v30 = vld [vmem:[%s5988_s7 + $0x30] sm:$0xff] }
 0x27a   :  { %v2370_v48 = vld [vmem:[%s5988_s7 + $0x90] sm:$0xff] }
 0x27b   :  { %v2570_v51 = vclamps-f32 %v1894_v50, 1.0  ;;  %v2354_v50 = vld [vmem:[%s5988_s7 + $0x10] sm:$0xff] }
 0x27d   :  { %2200 = vmatmul.mubr.f32.vlgmr.msra.gmra.mxu0 %v2570_v51  ;;  %2940 = vmatmul.mubr.f32.vlgmr.msra.gmra.mxu1 %v2570_v51  ;;  %v2369_v51 = vld [vmem:[%s5988_s7 + $0x88] sm:$0xff] }
 0x27e   :  { %2769 = vmatpush3.msra.mxu0 %v1950_v49  ;;  %2270 = vmatprep.mubr.f32.mxu0 %v2569_v53  ;;  %v1920_v53 = vld [vmem:[%s5986_s5 + $0x88] sm:$0xff] }
 0x27f   :  { %2770 = vmatprep.subr.mxu0 %v1995_v54  ;;  %2974 = vmatprep.mubr.msk.f32.mxu1 %vm2984_vm0, %v2983_v1  ;;  %v2353_v49 = vld [vmem:[%s5988_s7 + $0x8] sm:$0xff]  ;;  %v2368_v54 = vld [vmem:[%s5988_s7 + $0x80] sm:$0xff] }
 0x280   :  { %2771 = vmatpush3.msra.mxu0 %v1947_v55  ;;  %v2352_v55 = vld [vmem:[%s5988_s7] sm:$0xff] }
 0x281   :  { %2772 = vmatprep.subr.mxu0 %v1992_v62  ;;  %v2399_v62 = vld [vmem:[%s5988_s7 + $0x178] sm:$0xff] }
 0x282   :  { %2773 = vmatpush3.msra.mxu0 %v1944_v0  ;;  %v2398_v0 = vld [vmem:[%s5988_s7 + $0x170] sm:$0xff]  ;;  %2943 = vmatpush3.msra.mxu1 %v2399_v62 }
 0x283   :  { %2774 = vmatprep.subr.mxu0 %v1989_v2  ;;  %2944 = vmatprep.subr.mxu1 %v2983_v1  ;;  %v2397_v2 = vld [vmem:[%s5988_s7 + $0x168] sm:$0xff] }
 0x284   :  { %2775 = vmatpush3.msra.mxu0 %v1941_v3  ;;  %2945 = vmatpush3.msra.mxu1 %v2398_v0  ;;  %v2396_v3 = vld [vmem:[%s5988_s7 + $0x160] sm:$0xff] }
 0x285   :  { %2776 = vmatprep.subr.mxu0 %v1986_v56  ;;  %2946 = vmatprep.subr.mxu1 %v2983_v1  ;;  %v2395_v56 = vld [vmem:[%s5988_s7 + $0x158] sm:$0xff] }
 0x286   :  { %2777 = vmatpush3.msra.mxu0 %v1938_v59  ;;  %2947 = vmatpush3.msra.mxu1 %v2397_v2  ;;  %v2394_v59 = vld [vmem:[%s5988_s7 + $0x150] sm:$0xff] }
 0x287   :  { %2778 = vmatprep.subr.mxu0 %v1983_v4  ;;  %2948 = vmatprep.subr.mxu1 %v2983_v1  ;;  %v2393_v4 = vld [vmem:[%s5988_s7 + $0x148] sm:$0xff] }
 0x288   :  { %2779 = vmatpush3.msra.mxu0 %v1935_v5  ;;  %2949 = vmatpush3.msra.mxu1 %v2396_v3  ;;  %v2392_v5 = vld [vmem:[%s5988_s7 + $0x140] sm:$0xff] }
 0x289   :  { %2780 = vmatprep.subr.mxu0 %v1980_v6  ;;  %2950 = vmatprep.subr.mxu1 %v2983_v1  ;;  %v2391_v6 = vld [vmem:[%s5988_s7 + $0x138] sm:$0xff] }
 0x28a   :  { %2781 = vmatpush3.msra.mxu0 %v1932_v7  ;;  %2951 = vmatpush3.msra.mxu1 %v2395_v56  ;;  %v2390_v7 = vld [vmem:[%s5988_s7 + $0x130] sm:$0xff] }
 0x28b   :  { %2782 = vmatprep.subr.mxu0 %v1977_v8  ;;  %2952 = vmatprep.subr.mxu1 %v2983_v1  ;;  %v2389_v8 = vld [vmem:[%s5988_s7 + $0x128] sm:$0xff] }
 0x28c   :  { %2783 = vmatpush3.msra.mxu0 %v1929_v9  ;;  %2953 = vmatpush3.msra.mxu1 %v2394_v59  ;;  %v2388_v9 = vld [vmem:[%s5988_s7 + $0x120] sm:$0xff] }
 0x28d   :  { %2784 = vmatprep.subr.mxu0 %v1974_v11  ;;  %2954 = vmatprep.subr.mxu1 %v2983_v1  ;;  %v2387_v11 = vld [vmem:[%s5988_s7 + $0x118] sm:$0xff] }
 0x28e   :  { %2785 = vmatpush3.msra.mxu0 %v1926_v12  ;;  %2955 = vmatpush3.msra.mxu1 %v2393_v4  ;;  %v2386_v12 = vld [vmem:[%s5988_s7 + $0x110] sm:$0xff] }
 0x28f   :  { %2786 = vmatprep.subr.mxu0 %v1971_v13  ;;  %2956 = vmatprep.subr.mxu1 %v2983_v1  ;;  %v2385_v13 = vld [vmem:[%s5988_s7 + $0x108] sm:$0xff] }
 0x290   :  { %2787 = vmatpush3.msra.mxu0 %v1923_v63  ;;  %2957 = vmatpush3.msra.mxu1 %v2392_v5  ;;  %v2384_v63 = vld [vmem:[%s5988_s7 + $0x100] sm:$0xff] }
 0x291   :  { %2788 = vmatprep.subr.mxu0 %v1968_v40  ;;  %2958 = vmatprep.subr.mxu1 %v2983_v1  ;;  %v2047_v40 = vld [vmem:[%s5989_s6] sm:$0x7] }
 0x292   :  { %2789 = vmatpush3.msra.mxu0 %v1920_v53  ;;  %2959 = vmatpush3.msra.mxu1 %v2391_v6 }
 0x293   :  { %2790 = vmatprep.subr.mxu0 %v1965_v16  ;;  %2960 = vmatprep.subr.mxu1 %v2983_v1  ;;  %v2052_v16 = vrot.slane %v2047_v40, %v4315_v42 }
 0x294   :  { %2791 = vmatpush3.msra.mxu0 %v1917_v34  ;;  %2961 = vmatpush3.msra.mxu1 %v2390_v7  ;;  %v2056_v34 = vrot.slane %v2047_v40, %v4323_v44 }
 0x295   :  { %2792 = vmatprep.subr.mxu0 %v1962_v10  ;;  %2962 = vmatprep.subr.mxu1 %v2983_v1 }
 0x296   :  { %2793 = vmatpush3.msra.mxu0 %v1914_v26  ;;  %2963 = vmatpush3.msra.mxu1 %v2389_v8 }
 0x297   :  { %2794 = vmatprep.subr.mxu0 %v1959_v38  ;;  %2964 = vmatprep.subr.mxu1 %v2983_v1 }
 0x298   :  { %2795 = vmatpush3.msra.mxu0 %v1911_v14  ;;  %2965 = vmatpush3.msra.mxu1 %v2388_v9 }
 0x299   :  { %2796 = vmatprep.subr.mxu0 %v1956_v39  ;;  %2966 = vmatprep.subr.mxu1 %v2983_v1 }
 0x29a   :  { %2797 = vmatpush3.msra.mxu0 %v1908_v17  ;;  %2967 = vmatpush3.msra.mxu1 %v2387_v11 }
 0x29b   :  { %2798 = vmatprep.subr.mxu0 %v1953_v18  ;;  %2968 = vmatprep.subr.mxu1 %v2983_v1 }
 0x29c   :  { %2799 = vmatpush3.msra.mxu0 %v1905_v19  ;;  %2969 = vmatpush3.msra.mxu1 %v2386_v12 }
 0x29d   :  { %2271 = vmatmul.mubr.f32.vlgmr.msra.gmra.mxu0 %v2568_v61  ;;  %2820 = vmatprep.subr.mxu0 %v2383_v57  ;;  %v2364_v61 = vld [vmem:[%s5988_s7 + $0x60] sm:$0xff] }
 0x29e   :  { %2821 = vmatpush3.msra.mxu0 %v2367_v60  ;;  %2970 = vmatprep.subr.mxu1 %v2983_v1 }
 0x29f   :  { %2822 = vmatprep.subr.mxu0 %v2382_v20  ;;  %2971 = vmatpush3.msra.mxu1 %v2385_v13 }
 0x2a0   :  { %2823 = vmatpush3.msra.mxu0 %v2366_v21  ;;  %2972 = vmatprep.subr.mxu1 %v2983_v1  ;;  %v2060_v21 = vrot.slane %v2047_v40, %v4312_v41 }
 0x2a1   :  { %2824 = vmatprep.subr.mxu0 %v2381_v22  ;;  %2973 = vmatpush3.msra.mxu1 %v2384_v63 }
 0x2a2   :  { %2825 = vmatpush3.msra.mxu0 %v2365_v29 }
 0x2a3   :  { %2826 = vmatprep.subr.mxu0 %v2380_v15 }
 0x2a4   :  { %2827 = vmatpush3.msra.mxu0 %v2364_v61 }
 0x2a5   :  { %2828 = vmatprep.subr.mxu0 %v2379_v52 }
 0x2a6   :  { %2829 = vmatpush3.msra.mxu0 %v2363_v58 }
 0x2a7   :  { %2830 = vmatprep.subr.mxu0 %v2378_v46  ;;  %v2574_v46 = vld [vmem:[%s5990_s8] ss:$0 sm:$0xff] }
 0x2a8   :  { %2831 = vmatpush3.msra.mxu0 %v2362_v35 }
 0x2a9   :  { %2832 = vmatprep.subr.mxu0 %v2377_v45 }
 0x2aa   :  { %2833 = vmatpush3.msra.mxu0 %v2361_v23 }
 0x2ab   :  { %2834 = vmatprep.subr.mxu0 %v2376_v24 }
 0x2ac   :  { %2835 = vmatpush3.msra.mxu0 %v2360_v25 }
 0x2ad   :  { %2836 = vmatprep.subr.mxu0 %v2375_v43 }
 0x2ae   :  { %2837 = vmatpush3.msra.mxu0 %v2359_v27 }
 0x2af   :  { %2838 = vmatprep.subr.mxu0 %v2374_v28 }
 0x2b0   :  { %2839 = vmatpush3.msra.mxu0 %v2358_v30 }
 0x2b1   :  { %2840 = vmatprep.subr.mxu0 %v2373_v31 }
 0x2b2   :  { %2841 = vmatpush3.msra.mxu0 %v2357_v32 }
 0x2b3   :  { %2842 = vmatprep.subr.mxu0 %v2372_v33 }
 0x2b4   :  { %2843 = vmatpush3.msra.mxu0 %v2356_v36 }
 0x2b5   :  { %2844 = vmatprep.subr.mxu0 %v2371_v37 }
 0x2b6   :  { %2845 = vmatpush3.msra.mxu0 %v2355_v47 }
 0x2b7   :  { %2846 = vmatprep.subr.mxu0 %v2370_v48 }
 0x2b8   :  { %2847 = vmatpush3.msra.mxu0 %v2354_v50 }
 0x2b9   :  { %2848 = vmatprep.subr.mxu0 %v2369_v51 }
 0x2ba   :  { %2849 = vmatpush3.msra.mxu0 %v2353_v49 }
 0x2bb   :  { %2850 = vmatprep.subr.mxu0 %v2368_v54 }
 0x2bc   :  { %2851 = vmatpush3.msra.mxu0 %v2352_v55 }
 0x2f8   :  { %v2130_v53 = vpop.f32.mrf.mxu1 }
 0x2f9   :  { %v2131_v26 = vadd.f32 %v2130_v53, %v2052_v16 }
 0x2fa   :  { %v2132_v10 = vpop.f32.mrf.mxu1 }
 0x2fb   :  { %v2133_v39 = vadd.f32 %v2132_v10, %v2056_v34 }
 0x33d   :  { %v2201_v38 = vpop.f32.mrf.mxu0  ;;  %v2342_v14 = vpop.f32.mrf.mxu1 }
 0x33e   :  { %v2202_v1 = vadd.f32 %v2201_v38, %v2131_v26 }
 0x33f   :  { %v2203_v17 = vpop.f32.mrf.mxu0  ;;  %v2941_v18 = vpop.f32.mrf.mxu1 }
 0x340   :  { %v2204_v19 = vadd.f32 %v2203_v17, %v2133_v39  ;;  %v2571_v60 = vclamps-f32 %v2202_v1, 1.0 }
 0x342   :  { %v2572_v57 = vclamps-f32 %v2204_v19, 1.0 }
 0x344   :  { %2471 = vmatprep.mubr.f32.mxu0 %v2572_v57 }
 0x345   :  { %2472 = vmatmul.mubr.f32.vlgmr.msra.gmra.mxu0 %v2571_v60 }
 0x35d   :  { %v2800_v20 = vpop.f32.mrf.mxu0 }
 0x35f   :  { %v2801_v22 = vpop.f32.mrf.mxu0 }
 0x360   :  { %v2802_v42 = vadd.f32 %v2801_v22, %v2800_v20 }
 0x362   :  { %v2273_v29 = vadd.f32 %v2802_v42, %v2060_v21 }
 0x364   :  { %v2343_v44 = vadd.f32 %v2342_v14, %v2273_v29 }
 0x366   :  { %v2573_v15 = vclamps-f32 %v2343_v44, 1.0 }
 0x368   :  { %2975 = vmatmul.mubr.f32.vlgmr.msra.gmra.mxu1 %v2573_v15 }
 0x405   :  { %v2852_v61 = vpop.f32.mrf.mxu0 }
 0x407   :  { %v2853_v52 = vpop.f32.mrf.mxu0 }
 0x408   :  { %v2854_v58 = vadd.f32 %v2853_v52, %v2852_v61 }
 0x40a   :  { %v2474_v35 = vadd.f32 %v2854_v58, %v2574_v46 }
 0x428   :  { %v2543_v45 = vpop.f32.mrf.mxu1 }
 0x429   :  { %v2544_v23 = vadd.f32 %v2543_v45, %v2474_v35 }
 0x42a   :  { %v2976_v24 = vpop.f32.mrf.mxu1 }
 0x42b   :  { %v2575_v25 = vmul.f32 -1.442695, %v2544_v23 }
 0x42d   :  { %2979 = vpow2.f32 %v2575_v25 }
 0x43a   :  { %v2980_v41 = vpop.eup %2979 }
 0x43b   :  { %v2550_v43 = vadd.f32 1.0, %v2980_v41 }
 0x43d   :  { %2981 = vrcp.f32 %v2550_v43 }
 0x44a   :  { %v2982_v27 = vpop.eup %2981 }
 0x44b   :  { %2553 = vst [vmem:[%s5991_s9] sm:$0xff] %v2982_v27 }

</bundles_post_ra>
